<compile_context>
chip_gen: v6e
topology: v6e:2x2x1
jax: 0.10.0
libtpu: 0.0.40
codegen_flags: <defaults>
</compile_context>

<pallas_src>
import functools

import jax
import jax.numpy as jnp
import numpy as np
from jax.experimental import pallas as pl
from jax.experimental.pallas import tpu as pltpu

_BN_EPS = 1.1e-5  # matches nn.BatchNorm3d(..., eps=1.1e-05) in the spec


def _round_up(x, m):
    return (x + m - 1) // m * m


def dense_block_kernel(x_ref, smask_ref, tmask_ref, *refs,
                       L, C0_pad, G_pad, C_mid, H, W, T):
    """Fully fused DenseBlock forward.

    x_ref     : (C0_pad, M)   M = B*H*W*T positions on the lane axis
    smask_ref : (9, 1, M)     spatial tap validity masks ({0,1} float)
    tmask_ref : (3, 1, M)     temporal tap validity masks
    per layer i (7 refs): bn1s (Csc_i,1), bn1b (Csc_i,1), w1 (C_mid, Csc_i),
                          bn2s (C_mid,1), bn2b (C_mid,1),
                          w3s (G_pad, 9*C_mid)  [wp folded in],
                          wts (G_pad, 3*G_pad)
    o_ref     : (C0_pad + L*G_pad, M) resident concatenated activations
    """
    o_ref = refs[-1]
    wrefs = refs[:-1]
    M = x_ref.shape[-1]
    spatial_offsets = tuple(dh * (W * T) + dw * T
                            for dh in (-1, 0, 1) for dw in (-1, 0, 1))

    # Seed the resident activation buffer with the (channel-padded) input.
    o_ref[pl.ds(0, C0_pad), :] = x_ref[...]

    for i in range(L):                      # L is small & static -> unrolled
        bn1s, bn1b, w1, bn2s, bn2b, w3s, wts = wrefs[7 * i:7 * (i + 1)]
        csz = C0_pad + i * G_pad            # channels visible to this layer

        a = o_ref[pl.ds(0, csz), :]                               # (csz, M)
        # BatchNorm + ReLU (folded, eval mode)
        h = jnp.maximum(a * bn1s[...] + bn1b[...], 0.0)
        # Conv3d 1x1x1 bottleneck: csz -> C_mid, all positions in one matmul
        h = jnp.dot(w1[...], h, preferred_element_type=jnp.float32)
        h = jnp.maximum(h * bn2s[...] + bn2b[...], 0.0)           # (C_mid, M)

        # Conv3d (3,3,1), padding (1,1,0), with the following 1x1x1 conv (wp)
        # folded into the tap weights: stack the 9 masked+rolled taps along
        # the contraction dim -> one (G_pad, 9*C_mid) @ (9*C_mid, M) matmul.
        pieces = []
        for k, off in enumerate(spatial_offsets):
            src = h if off == 0 else pltpu.roll(h, shift=(-off) % M, axis=1)
            if k != 4:                      # center tap mask is all ones
                src = src * smask_ref[k]
            pieces.append(src)
        hstk = jnp.concatenate(pieces, axis=0)                    # (9*C_mid, M)
        acc = jnp.dot(w3s[...], hstk,
                      preferred_element_type=jnp.float32)         # (G_pad, M)

        # Conv3d (1,1,3), padding (0,0,1): same trick with 3 temporal taps.
        tpieces = []
        for k, dt in enumerate((-1, 0, 1)):
            src = acc if dt == 0 else pltpu.roll(acc, shift=(-dt) % M, axis=1)
            if dt != 0:
                src = src * tmask_ref[k]
            tpieces.append(src)
        tstk = jnp.concatenate(tpieces, axis=0)                   # (3*G_pad, M)
        out = jnp.dot(wts[...], tstk,
                      preferred_element_type=jnp.float32)         # (G_pad, M)

        # Dense "concat": write the new channels at their 8-aligned offset.
        o_ref[pl.ds(csz, G_pad), :] = out.astype(o_ref.dtype)


def _fold_bn(gamma, beta, mean, var, eps=_BN_EPS):
    scale = (gamma / jnp.sqrt(var + eps)).astype(jnp.float32)
    bias = (beta - mean * scale).astype(jnp.float32)
    return scale, bias


def _build_masks(H, W, T, B):
    """Per-tap validity masks over flattened positions m = b*N + (h*W+w)*T + t.

    The masks also zero every roll that would wrap across a batch boundary or
    around the global lane axis, so folding B into the lane axis is exact.
    """
    n = np.arange(H * W * T)
    h, w, t = n // (W * T), (n // T) % W, n % T
    smasks = [((h + dh >= 0) & (h + dh < H) & (w + dw >= 0) & (w + dw < W))
              for dh in (-1, 0, 1) for dw in (-1, 0, 1)]
    tmasks = [((t + dt >= 0) & (t + dt < T)) for dt in (-1, 0, 1)]
    smask = np.tile(np.stack(smasks).astype(np.float32).reshape(9, 1, -1),
                    (1, 1, B))
    tmask = np.tile(np.stack(tmasks).astype(np.float32).reshape(3, 1, -1),
                    (1, 1, B))
    return jnp.asarray(smask), jnp.asarray(tmask)


def dense_block_pallas(x5, layer_params):
    """x5: (B, C0, H, W, T) -> (B, C0 + L*growth_rate, H, W, T)."""
    B, C0, H, W, T = x5.shape
    N = H * W * T
    M = B * N                        # lane axis (ideally a multiple of 128)
    L = len(layer_params)
    G, C_mid = layer_params[0]["w3"].shape[:2]
    G_pad = _round_up(G, 8)
    C0_pad = _round_up(C0, 8)
    C_scr = C0_pad + L * G_pad       # padded resident channel count

    def to_scratch(j):               # real channel index -> scratch index
        if j < C0:
            return j
        l, r = divmod(j - C0, G)
        return C0_pad + l * G_pad + r

    # Activations: (B, C0, H, W, T) -> lane-dense (C0_pad, B*N).
    x = jnp.transpose(x5.reshape(B, C0, N), (1, 0, 2)).reshape(C0, M)
    x = jnp.pad(x, ((0, C0_pad - C0), (0, 0)))

    smask, tmask = _build_masks(H, W, T, B)

    args = [x, smask, tmask]
    flops = 0
    for i, p in enumerate(layer_params):
        C_in = C0 + i * G
        csz = C0_pad + i * G_pad
        idx = np.array([to_scratch(j) for j in range(C_in)])

        bn1s, bn1b = _fold_bn(*p["bn1"])
        bn2s, bn2b = _fold_bn(*p["bn2"])
        bn1s_p = jnp.zeros((csz, 1), jnp.float32).at[idx, 0].set(bn1s)
        bn1b_p = jnp.zeros((csz, 1), jnp.float32).at[idx, 0].set(bn1b)

        w1 = p["w1"][:, :, 0, 0, 0]                               # (C_mid, C_in)
        w1_p = jnp.zeros((C_mid, csz), jnp.float32).at[:, idx].set(w1)

        wp = p["wp"][:, :, 0, 0, 0]                               # (G, G)
        # Fold wp into every (3,3,1) tap and stack taps on the contraction dim.
        w3_taps = [wp @ p["w3"][:, :, dh + 1, dw + 1, 0]
                   for dh in (-1, 0, 1) for dw in (-1, 0, 1)]     # 9 x (G, C_mid)
        w3s = jnp.pad(jnp.concatenate(w3_taps, axis=1),
                      ((0, G_pad - G), (0, 0)))                   # (G_pad, 9*C_mid)

        wt_taps = [jnp.pad(p["wt"][:, :, 0, 0, k],
                           ((0, G_pad - G), (0, G_pad - G)))
                   for k in range(3)]
        wts = jnp.concatenate(wt_taps, axis=1)                    # (G_pad, 3*G_pad)

        args += [bn1s_p, bn1b_p, w1_p,
                 bn2s.reshape(-1, 1), bn2b.reshape(-1, 1), w3s, wts]
        flops += 2 * M * (csz * C_mid + 9 * C_mid * G_pad + 3 * G_pad * G_pad)

    bytes_accessed = 4 * (x.size + smask.size + tmask.size + C_scr * M
                          + sum(int(np.prod(a.shape)) for a in args[3:]))

    kernel = functools.partial(dense_block_kernel, L=L, C0_pad=C0_pad,
                               G_pad=G_pad, C_mid=C_mid, H=H, W=W, T=T)
    out_scr = pl.pallas_call(
        kernel,
        out_shape=jax.ShapeDtypeStruct((C_scr, M), jnp.float32),
        cost_estimate=pl.CostEstimate(flops=flops, transcendentals=0,
                                      bytes_accessed=bytes_accessed),
    )(*args)

    # Drop padding channels and restore (B, C_total, H, W, T).
    C_total = C0 + L * G
    out_idx = np.array([to_scratch(j) for j in range(C_total)])
    out = out_scr[out_idx].reshape(C_total, B, H, W, T)
    return jnp.transpose(out, (1, 0, 2, 3, 4))


# ----------------------------- pure-JAX reference -----------------------------

def _conv3d(x, w, padding):
    return jax.lax.conv_general_dilated(
        x, w, window_strides=(1, 1, 1), padding=padding,
        dimension_numbers=("NCDHW", "OIDHW", "NCDHW"),
        precision=jax.lax.Precision.HIGHEST)


def _bn_ref(x, gamma, beta, mean, var, eps=_BN_EPS):
    shp = (1, -1, 1, 1, 1)
    return ((x - mean.reshape(shp)) / jnp.sqrt(var.reshape(shp) + eps)
            * gamma.reshape(shp) + beta.reshape(shp))


def conv_block_ref(x, p):
    h = jax.nn.relu(_bn_ref(x, *p["bn1"]))
    h = _conv3d(h, p["w1"], "VALID")
    h = jax.nn.relu(_bn_ref(h, *p["bn2"]))
    h = _conv3d(h, p["w3"], ((1, 1), (1, 1), (0, 0)))
    h = _conv3d(h, p["wp"], "VALID")
    h = _conv3d(h, p["wt"], ((0, 0), (0, 0), (1, 1)))
    return h


def dense_block_ref(x, layer_params):
    for p in layer_params:
        cb = conv_block_ref(x, p)
        x = jnp.concatenate([x, cb], axis=1)
    return x


# ----------------------------- parameter init ---------------------------------

def init_dense_block_params(key, num_layers, num_filters, growth_rate):
    params = []
    C_in, G = num_filters, growth_rate
    C_mid = 4 * G                                   # bottleneck inter_channel
    for _ in range(num_layers):
        keys = jax.random.split(key, 13)
        key = keys[0]
        bn1 = (1.0 + 0.1 * jax.random.normal(keys[1], (C_in,), jnp.float32),
               0.1 * jax.random.normal(keys[2], (C_in,), jnp.float32),
               0.1 * jax.random.normal(keys[3], (C_in,), jnp.float32),
               0.5 + jax.random.uniform(keys[4], (C_in,), jnp.float32))
        bn2 = (1.0 + 0.1 * jax.random.normal(keys[5], (C_mid,), jnp.float32),
               0.1 * jax.random.normal(keys[6], (C_mid,), jnp.float32),
               0.1 * jax.random.normal(keys[7], (C_mid,), jnp.float32),
               0.5 + jax.random.uniform(keys[8], (C_mid,), jnp.float32))
        w1 = 0.2 * jax.random.normal(keys[9], (C_mid, C_in, 1, 1, 1), jnp.float32)
        w3 = 0.2 * jax.random.normal(keys[10], (G, C_mid, 3, 3, 1), jnp.float32)
        wp = 0.2 * jax.random.normal(keys[11], (G, G, 1, 1, 1), jnp.float32)
        wt = 0.2 * jax.random.normal(keys[12], (G, G, 1, 1, 3), jnp.float32)
        params.append(dict(bn1=bn1, bn2=bn2, w1=w1, w3=w3, wp=wp, wt=wt))
        C_in += G
    return params


if __name__ == "__main__":
    # Small shapes consistent with the module: 8x8 spatial grid, 8 "temporal"
    # positions (last Conv3d axis), 8 input feature maps, 2 dense layers with
    # growth_rate 4 (bottleneck width 16).
    B, C0, H, W, T = 2, 8, 8, 8, 8
    num_layers, growth_rate = 2, 4

    key = jax.random.PRNGKey(0)
    kx, kp = jax.random.split(key)
    x = jax.random.normal(kx, (B, C0, H, W, T), dtype=jnp.float32)
    params = init_dense_block_params(kp, num_layers, C0, growth_rate)

    out = dense_block_pallas(x, params)
    out = jax.block_until_ready(out)

    ref = dense_block_ref(x, params)
    assert out.shape == (B, C0 + num_layers * growth_rate, H, W, T)
    np.testing.assert_allclose(np.asarray(out), np.asarray(ref),
                               rtol=5e-3, atol=5e-3)

    print("KERNEL_OK")
</pallas_src>

<mosaic_0001>
module attributes {stable_mosaic.version = 11 : i64} {
  func.func @dense_block_kernel(%arg0: memref<8x1024xf32, #tpu.memory_space<vmem>>, %arg1: memref<9x1x1024xf32, #tpu.memory_space<vmem>>, %arg2: memref<3x1x1024xf32, #tpu.memory_space<vmem>>, %arg3: memref<8x1xf32, #tpu.memory_space<vmem>>, %arg4: memref<8x1xf32, #tpu.memory_space<vmem>>, %arg5: memref<16x8xf32, #tpu.memory_space<vmem>>, %arg6: memref<16x1xf32, #tpu.memory_space<vmem>>, %arg7: memref<16x1xf32, #tpu.memory_space<vmem>>, %arg8: memref<8x144xf32, #tpu.memory_space<vmem>>, %arg9: memref<8x24xf32, #tpu.memory_space<vmem>>, %arg10: memref<16x1xf32, #tpu.memory_space<vmem>>, %arg11: memref<16x1xf32, #tpu.memory_space<vmem>>, %arg12: memref<16x16xf32, #tpu.memory_space<vmem>>, %arg13: memref<16x1xf32, #tpu.memory_space<vmem>>, %arg14: memref<16x1xf32, #tpu.memory_space<vmem>>, %arg15: memref<8x144xf32, #tpu.memory_space<vmem>>, %arg16: memref<8x24xf32, #tpu.memory_space<vmem>>, %arg17: memref<24x1024xf32, #tpu.memory_space<vmem>>) attributes {dimension_semantics = [], scalar_prefetch = 0 : i64, scratch_operands = 0 : i64, tpu.core_type = #tpu.core_type<tc>} {
    %c0 = arith.constant 0 : index
    %c0_0 = arith.constant 0 : index
    %0 = vector.load %arg0[%c0, %c0_0] : memref<8x1024xf32, #tpu.memory_space<vmem>>, vector<8x1024xf32>
    %c0_1 = arith.constant 0 : index
    %c0_2 = arith.constant 0 : index
    %1 = vector.load %arg17[%c0_1, %c0_2] : memref<24x1024xf32, #tpu.memory_space<vmem>>, vector<8x1024xf32>
    tpu.vector_store %arg17[%c0_1, %c0_2], %0 {strides = array<i32>} : memref<24x1024xf32, #tpu.memory_space<vmem>>, vector<8x1024xf32>,
    %c0_3 = arith.constant 0 : index
    %c0_4 = arith.constant 0 : index
    %2 = vector.load %arg17[%c0_3, %c0_4] : memref<24x1024xf32, #tpu.memory_space<vmem>>, vector<8x1024xf32>
    %c0_5 = arith.constant 0 : index
    %c0_6 = arith.constant 0 : index
    %3 = vector.load %arg3[%c0_5, %c0_6] : memref<8x1xf32, #tpu.memory_space<vmem>>, vector<8x1xf32>
    %4 = vector.broadcast %3 : vector<8x1xf32> to vector<8x1024xf32>
    %5 = arith.mulf %2, %4 : vector<8x1024xf32>
    %c0_7 = arith.constant 0 : index
    %c0_8 = arith.constant 0 : index
    %6 = vector.load %arg4[%c0_7, %c0_8] : memref<8x1xf32, #tpu.memory_space<vmem>>, vector<8x1xf32>
    %7 = vector.broadcast %6 : vector<8x1xf32> to vector<8x1024xf32>
    %8 = arith.addf %5, %7 : vector<8x1024xf32>
    %cst = arith.constant 0.000000e+00 : f32
    %9 = vector.broadcast %cst : f32 to vector<8x1024xf32>
    %10 = arith.maximumf %8, %9 : vector<8x1024xf32>
    %c0_9 = arith.constant 0 : index
    %c0_10 = arith.constant 0 : index
    %11 = vector.load %arg5[%c0_9, %c0_10] : memref<16x8xf32, #tpu.memory_space<vmem>>, vector<16x8xf32>
    %cst_11 = arith.constant dense<0.000000e+00> : vector<16x1024xf32>
    %12 = tpu.matmul %11, %10, %cst_11 {dimension_numbers = #tpu.dot_dimension_numbers<[1], [0], [0], [1], [0, 0, 1, 1], [], []>} : vector<16x8xf32>, vector<8x1024xf32>, vector<16x1024xf32> -> vector<16x1024xf32>
    %c0_12 = arith.constant 0 : index
    %c0_13 = arith.constant 0 : index
    %13 = vector.load %arg6[%c0_12, %c0_13] : memref<16x1xf32, #tpu.memory_space<vmem>>, vector<16x1xf32>
    %14 = vector.broadcast %13 : vector<16x1xf32> to vector<16x1024xf32>
    %15 = arith.mulf %12, %14 : vector<16x1024xf32>
    %c0_14 = arith.constant 0 : index
    %c0_15 = arith.constant 0 : index
    %16 = vector.load %arg7[%c0_14, %c0_15] : memref<16x1xf32, #tpu.memory_space<vmem>>, vector<16x1xf32>
    %17 = vector.broadcast %16 : vector<16x1xf32> to vector<16x1024xf32>
    %18 = arith.addf %15, %17 : vector<16x1024xf32>
    %cst_16 = arith.constant 0.000000e+00 : f32
    %19 = vector.broadcast %cst_16 : f32 to vector<16x1024xf32>
    %20 = arith.maximumf %18, %19 : vector<16x1024xf32>
    %c72_i32 = arith.constant 72 : i32
    %21 = tpu.dynamic_rotate %20 by %c72_i32 dim 1 : vector<16x1024xf32>, i32 -> vector<16x1024xf32>
    %c0_17 = arith.constant 0 : index
    %c0_18 = arith.constant 0 : index
    %c0_19 = arith.constant 0 : index
    %22 = vector.load %arg1[%c0_17, %c0_18, %c0_19] : memref<9x1x1024xf32, #tpu.memory_space<vmem>>, vector<1x1x1024xf32>
    %23 = vector.shape_cast %22 : vector<1x1x1024xf32> to vector<1x1024xf32>
    %24 = vector.broadcast %23 : vector<1x1024xf32> to vector<16x1024xf32>
    %25 = arith.mulf %21, %24 : vector<16x1024xf32>
    %c64_i32 = arith.constant 64 : i32
    %26 = tpu.dynamic_rotate %20 by %c64_i32 dim 1 : vector<16x1024xf32>, i32 -> vector<16x1024xf32>
    %c1 = arith.constant 1 : index
    %c0_20 = arith.constant 0 : index
    %c0_21 = arith.constant 0 : index
    %27 = vector.load %arg1[%c1, %c0_20, %c0_21] : memref<9x1x1024xf32, #tpu.memory_space<vmem>>, vector<1x1x1024xf32>
    %28 = vector.shape_cast %27 : vector<1x1x1024xf32> to vector<1x1024xf32>
    %29 = vector.broadcast %28 : vector<1x1024xf32> to vector<16x1024xf32>
    %30 = arith.mulf %26, %29 : vector<16x1024xf32>
    %c56_i32 = arith.constant 56 : i32
    %31 = tpu.dynamic_rotate %20 by %c56_i32 dim 1 : vector<16x1024xf32>, i32 -> vector<16x1024xf32>
    %c2 = arith.constant 2 : index
    %c0_22 = arith.constant 0 : index
    %c0_23 = arith.constant 0 : index
    %32 = vector.load %arg1[%c2, %c0_22, %c0_23] : memref<9x1x1024xf32, #tpu.memory_space<vmem>>, vector<1x1x1024xf32>
    %33 = vector.shape_cast %32 : vector<1x1x1024xf32> to vector<1x1024xf32>
    %34 = vector.broadcast %33 : vector<1x1024xf32> to vector<16x1024xf32>
    %35 = arith.mulf %31, %34 : vector<16x1024xf32>
    %c8_i32 = arith.constant 8 : i32
    %36 = tpu.dynamic_rotate %20 by %c8_i32 dim 1 : vector<16x1024xf32>, i32 -> vector<16x1024xf32>
    %c3 = arith.constant 3 : index
    %c0_24 = arith.constant 0 : index
    %c0_25 = arith.constant 0 : index
    %37 = vector.load %arg1[%c3, %c0_24, %c0_25] : memref<9x1x1024xf32, #tpu.memory_space<vmem>>, vector<1x1x1024xf32>
    %38 = vector.shape_cast %37 : vector<1x1x1024xf32> to vector<1x1024xf32>
    %39 = vector.broadcast %38 : vector<1x1024xf32> to vector<16x1024xf32>
    %40 = arith.mulf %36, %39 : vector<16x1024xf32>
    %c1016_i32 = arith.constant 1016 : i32
    %41 = tpu.dynamic_rotate %20 by %c1016_i32 dim 1 : vector<16x1024xf32>, i32 -> vector<16x1024xf32>
    %c5 = arith.constant 5 : index
    %c0_26 = arith.constant 0 : index
    %c0_27 = arith.constant 0 : index
    %42 = vector.load %arg1[%c5, %c0_26, %c0_27] : memref<9x1x1024xf32, #tpu.memory_space<vmem>>, vector<1x1x1024xf32>
    %43 = vector.shape_cast %42 : vector<1x1x1024xf32> to vector<1x1024xf32>
    %44 = vector.broadcast %43 : vector<1x1024xf32> to vector<16x1024xf32>
    %45 = arith.mulf %41, %44 : vector<16x1024xf32>
    %c968_i32 = arith.constant 968 : i32
    %46 = tpu.dynamic_rotate %20 by %c968_i32 dim 1 : vector<16x1024xf32>, i32 -> vector<16x1024xf32>
    %c6 = arith.constant 6 : index
    %c0_28 = arith.constant 0 : index
    %c0_29 = arith.constant 0 : index
    %47 = vector.load %arg1[%c6, %c0_28, %c0_29] : memref<9x1x1024xf32, #tpu.memory_space<vmem>>, vector<1x1x1024xf32>
    %48 = vector.shape_cast %47 : vector<1x1x1024xf32> to vector<1x1024xf32>
    %49 = vector.broadcast %48 : vector<1x1024xf32> to vector<16x1024xf32>
    %50 = arith.mulf %46, %49 : vector<16x1024xf32>
    %c960_i32 = arith.constant 960 : i32
    %51 = tpu.dynamic_rotate %20 by %c960_i32 dim 1 : vector<16x1024xf32>, i32 -> vector<16x1024xf32>
    %c7 = arith.constant 7 : index
    %c0_30 = arith.constant 0 : index
    %c0_31 = arith.constant 0 : index
    %52 = vector.load %arg1[%c7, %c0_30, %c0_31] : memref<9x1x1024xf32, #tpu.memory_space<vmem>>, vector<1x1x1024xf32>
    %53 = vector.shape_cast %52 : vector<1x1x1024xf32> to vector<1x1024xf32>
    %54 = vector.broadcast %53 : vector<1x1024xf32> to vector<16x1024xf32>
    %55 = arith.mulf %51, %54 : vector<16x1024xf32>
    %c952_i32 = arith.constant 952 : i32
    %56 = tpu.dynamic_rotate %20 by %c952_i32 dim 1 : vector<16x1024xf32>, i32 -> vector<16x1024xf32>
    %c8 = arith.constant 8 : index
    %c0_32 = arith.constant 0 : index
    %c0_33 = arith.constant 0 : index
    %57 = vector.load %arg1[%c8, %c0_32, %c0_33] : memref<9x1x1024xf32, #tpu.memory_space<vmem>>, vector<1x1x1024xf32>
    %58 = vector.shape_cast %57 : vector<1x1x1024xf32> to vector<1x1024xf32>
    %59 = vector.broadcast %58 : vector<1x1024xf32> to vector<16x1024xf32>
    %60 = arith.mulf %56, %59 : vector<16x1024xf32>
    %61 = tpu.concatenate %25, %30, %35, %40, %20, %45, %50, %55, %60 in 0 : vector<16x1024xf32>, vector<16x1024xf32>, vector<16x1024xf32>, vector<16x1024xf32>, vector<16x1024xf32>, vector<16x1024xf32>, vector<16x1024xf32>, vector<16x1024xf32>, vector<16x1024xf32> -> vector<144x1024xf32>
    %c0_34 = arith.constant 0 : index
    %c0_35 = arith.constant 0 : index
    %62 = vector.load %arg8[%c0_34, %c0_35] : memref<8x144xf32, #tpu.memory_space<vmem>>, vector<8x144xf32>
    %cst_36 = arith.constant dense<0.000000e+00> : vector<8x1024xf32>
    %63 = tpu.matmul %62, %61, %cst_36 {dimension_numbers = #tpu.dot_dimension_numbers<[1], [0], [0], [1], [0, 0, 1, 1], [], []>} : vector<8x144xf32>, vector<144x1024xf32>, vector<8x1024xf32> -> vector<8x1024xf32>
    %c1_i32 = arith.constant 1 : i32
    %64 = tpu.dynamic_rotate %63 by %c1_i32 dim 1 : vector<8x1024xf32>, i32 -> vector<8x1024xf32>
    %c0_37 = arith.constant 0 : index
    %c0_38 = arith.constant 0 : index
    %c0_39 = arith.constant 0 : index
    %65 = vector.load %arg2[%c0_37, %c0_38, %c0_39] : memref<3x1x1024xf32, #tpu.memory_space<vmem>>, vector<1x1x1024xf32>
    %66 = vector.shape_cast %65 : vector<1x1x1024xf32> to vector<1x1024xf32>
    %67 = vector.broadcast %66 : vector<1x1024xf32> to vector<8x1024xf32>
    %68 = arith.mulf %64, %67 : vector<8x1024xf32>
    %c1023_i32 = arith.constant 1023 : i32
    %69 = tpu.dynamic_rotate %63 by %c1023_i32 dim 1 : vector<8x1024xf32>, i32 -> vector<8x1024xf32>
    %c2_40 = arith.constant 2 : index
    %c0_41 = arith.constant 0 : index
    %c0_42 = arith.constant 0 : index
    %70 = vector.load %arg2[%c2_40, %c0_41, %c0_42] : memref<3x1x1024xf32, #tpu.memory_space<vmem>>, vector<1x1x1024xf32>
    %71 = vector.shape_cast %70 : vector<1x1x1024xf32> to vector<1x1024xf32>
    %72 = vector.broadcast %71 : vector<1x1024xf32> to vector<8x1024xf32>
    %73 = arith.mulf %69, %72 : vector<8x1024xf32>
    %74 = tpu.concatenate %68, %63, %73 in 0 : vector<8x1024xf32>, vector<8x1024xf32>, vector<8x1024xf32> -> vector<24x1024xf32>
    %c0_43 = arith.constant 0 : index
    %c0_44 = arith.constant 0 : index
    %75 = vector.load %arg9[%c0_43, %c0_44] : memref<8x24xf32, #tpu.memory_space<vmem>>, vector<8x24xf32>
    %cst_45 = arith.constant dense<0.000000e+00> : vector<8x1024xf32>
    %76 = tpu.matmul %75, %74, %cst_45 {dimension_numbers = #tpu.dot_dimension_numbers<[1], [0], [0], [1], [0, 0, 1, 1], [], []>} : vector<8x24xf32>, vector<24x1024xf32>, vector<8x1024xf32> -> vector<8x1024xf32>
    %c8_46 = arith.constant 8 : index
    %c0_47 = arith.constant 0 : index
    %77 = vector.load %arg17[%c8_46, %c0_47] : memref<24x1024xf32, #tpu.memory_space<vmem>>, vector<8x1024xf32>
    tpu.vector_store %arg17[%c8_46, %c0_47], %76 {strides = array<i32>} : memref<24x1024xf32, #tpu.memory_space<vmem>>, vector<8x1024xf32>,
    %c0_48 = arith.constant 0 : index
    %c0_49 = arith.constant 0 : index
    %78 = vector.load %arg17[%c0_48, %c0_49] : memref<24x1024xf32, #tpu.memory_space<vmem>>, vector<16x1024xf32>
    %c0_50 = arith.constant 0 : index
    %c0_51 = arith.constant 0 : index
    %79 = vector.load %arg10[%c0_50, %c0_51] : memref<16x1xf32, #tpu.memory_space<vmem>>, vector<16x1xf32>
    %80 = vector.broadcast %79 : vector<16x1xf32> to vector<16x1024xf32>
    %81 = arith.mulf %78, %80 : vector<16x1024xf32>
    %c0_52 = arith.constant 0 : index
    %c0_53 = arith.constant 0 : index
    %82 = vector.load %arg11[%c0_52, %c0_53] : memref<16x1xf32, #tpu.memory_space<vmem>>, vector<16x1xf32>
    %83 = vector.broadcast %82 : vector<16x1xf32> to vector<16x1024xf32>
    %84 = arith.addf %81, %83 : vector<16x1024xf32>
    %cst_54 = arith.constant 0.000000e+00 : f32
    %85 = vector.broadcast %cst_54 : f32 to vector<16x1024xf32>
    %86 = arith.maximumf %84, %85 : vector<16x1024xf32>
    %c0_55 = arith.constant 0 : index
    %c0_56 = arith.constant 0 : index
    %87 = vector.load %arg12[%c0_55, %c0_56] : memref<16x16xf32, #tpu.memory_space<vmem>>, vector<16x16xf32>
    %cst_57 = arith.constant dense<0.000000e+00> : vector<16x1024xf32>
    %88 = tpu.matmul %87, %86, %cst_57 {dimension_numbers = #tpu.dot_dimension_numbers<[1], [0], [0], [1], [0, 0, 1, 1], [], []>} : vector<16x16xf32>, vector<16x1024xf32>, vector<16x1024xf32> -> vector<16x1024xf32>
    %c0_58 = arith.constant 0 : index
    %c0_59 = arith.constant 0 : index
    %89 = vector.load %arg13[%c0_58, %c0_59] : memref<16x1xf32, #tpu.memory_space<vmem>>, vector<16x1xf32>
    %90 = vector.broadcast %89 : vector<16x1xf32> to vector<16x1024xf32>
    %91 = arith.mulf %88, %90 : vector<16x1024xf32>
    %c0_60 = arith.constant 0 : index
    %c0_61 = arith.constant 0 : index
    %92 = vector.load %arg14[%c0_60, %c0_61] : memref<16x1xf32, #tpu.memory_space<vmem>>, vector<16x1xf32>
    %93 = vector.broadcast %92 : vector<16x1xf32> to vector<16x1024xf32>
    %94 = arith.addf %91, %93 : vector<16x1024xf32>
    %cst_62 = arith.constant 0.000000e+00 : f32
    %95 = vector.broadcast %cst_62 : f32 to vector<16x1024xf32>
    %96 = arith.maximumf %94, %95 : vector<16x1024xf32>
    %c72_i32_63 = arith.constant 72 : i32
    %97 = tpu.dynamic_rotate %96 by %c72_i32_63 dim 1 : vector<16x1024xf32>, i32 -> vector<16x1024xf32>
    %c0_64 = arith.constant 0 : index
    %c0_65 = arith.constant 0 : index
    %c0_66 = arith.constant 0 : index
    %98 = vector.load %arg1[%c0_64, %c0_65, %c0_66] : memref<9x1x1024xf32, #tpu.memory_space<vmem>>, vector<1x1x1024xf32>
    %99 = vector.shape_cast %98 : vector<1x1x1024xf32> to vector<1x1024xf32>
    %100 = vector.broadcast %99 : vector<1x1024xf32> to vector<16x1024xf32>
    %101 = arith.mulf %97, %100 : vector<16x1024xf32>
    %c64_i32_67 = arith.constant 64 : i32
    %102 = tpu.dynamic_rotate %96 by %c64_i32_67 dim 1 : vector<16x1024xf32>, i32 -> vector<16x1024xf32>
    %c1_68 = arith.constant 1 : index
    %c0_69 = arith.constant 0 : index
    %c0_70 = arith.constant 0 : index
    %103 = vector.load %arg1[%c1_68, %c0_69, %c0_70] : memref<9x1x1024xf32, #tpu.memory_space<vmem>>, vector<1x1x1024xf32>
    %104 = vector.shape_cast %103 : vector<1x1x1024xf32> to vector<1x1024xf32>
    %105 = vector.broadcast %104 : vector<1x1024xf32> to vector<16x1024xf32>
    %106 = arith.mulf %102, %105 : vector<16x1024xf32>
    %c56_i32_71 = arith.constant 56 : i32
    %107 = tpu.dynamic_rotate %96 by %c56_i32_71 dim 1 : vector<16x1024xf32>, i32 -> vector<16x1024xf32>
    %c2_72 = arith.constant 2 : index
    %c0_73 = arith.constant 0 : index
    %c0_74 = arith.constant 0 : index
    %108 = vector.load %arg1[%c2_72, %c0_73, %c0_74] : memref<9x1x1024xf32, #tpu.memory_space<vmem>>, vector<1x1x1024xf32>
    %109 = vector.shape_cast %108 : vector<1x1x1024xf32> to vector<1x1024xf32>
    %110 = vector.broadcast %109 : vector<1x1024xf32> to vector<16x1024xf32>
    %111 = arith.mulf %107, %110 : vector<16x1024xf32>
    %c8_i32_75 = arith.constant 8 : i32
    %112 = tpu.dynamic_rotate %96 by %c8_i32_75 dim 1 : vector<16x1024xf32>, i32 -> vector<16x1024xf32>
    %c3_76 = arith.constant 3 : index
    %c0_77 = arith.constant 0 : index
    %c0_78 = arith.constant 0 : index
    %113 = vector.load %arg1[%c3_76, %c0_77, %c0_78] : memref<9x1x1024xf32, #tpu.memory_space<vmem>>, vector<1x1x1024xf32>
    %114 = vector.shape_cast %113 : vector<1x1x1024xf32> to vector<1x1024xf32>
    %115 = vector.broadcast %114 : vector<1x1024xf32> to vector<16x1024xf32>
    %116 = arith.mulf %112, %115 : vector<16x1024xf32>
    %c1016_i32_79 = arith.constant 1016 : i32
    %117 = tpu.dynamic_rotate %96 by %c1016_i32_79 dim 1 : vector<16x1024xf32>, i32 -> vector<16x1024xf32>
    %c5_80 = arith.constant 5 : index
    %c0_81 = arith.constant 0 : index
    %c0_82 = arith.constant 0 : index
    %118 = vector.load %arg1[%c5_80, %c0_81, %c0_82] : memref<9x1x1024xf32, #tpu.memory_space<vmem>>, vector<1x1x1024xf32>
    %119 = vector.shape_cast %118 : vector<1x1x1024xf32> to vector<1x1024xf32>
    %120 = vector.broadcast %119 : vector<1x1024xf32> to vector<16x1024xf32>
    %121 = arith.mulf %117, %120 : vector<16x1024xf32>
    %c968_i32_83 = arith.constant 968 : i32
    %122 = tpu.dynamic_rotate %96 by %c968_i32_83 dim 1 : vector<16x1024xf32>, i32 -> vector<16x1024xf32>
    %c6_84 = arith.constant 6 : index
    %c0_85 = arith.constant 0 : index
    %c0_86 = arith.constant 0 : index
    %123 = vector.load %arg1[%c6_84, %c0_85, %c0_86] : memref<9x1x1024xf32, #tpu.memory_space<vmem>>, vector<1x1x1024xf32>
    %124 = vector.shape_cast %123 : vector<1x1x1024xf32> to vector<1x1024xf32>
    %125 = vector.broadcast %124 : vector<1x1024xf32> to vector<16x1024xf32>
    %126 = arith.mulf %122, %125 : vector<16x1024xf32>
    %c960_i32_87 = arith.constant 960 : i32
    %127 = tpu.dynamic_rotate %96 by %c960_i32_87 dim 1 : vector<16x1024xf32>, i32 -> vector<16x1024xf32>
    %c7_88 = arith.constant 7 : index
    %c0_89 = arith.constant 0 : index
    %c0_90 = arith.constant 0 : index
    %128 = vector.load %arg1[%c7_88, %c0_89, %c0_90] : memref<9x1x1024xf32, #tpu.memory_space<vmem>>, vector<1x1x1024xf32>
    %129 = vector.shape_cast %128 : vector<1x1x1024xf32> to vector<1x1024xf32>
    %130 = vector.broadcast %129 : vector<1x1024xf32> to vector<16x1024xf32>
    %131 = arith.mulf %127, %130 : vector<16x1024xf32>
    %c952_i32_91 = arith.constant 952 : i32
    %132 = tpu.dynamic_rotate %96 by %c952_i32_91 dim 1 : vector<16x1024xf32>, i32 -> vector<16x1024xf32>
    %c8_92 = arith.constant 8 : index
    %c0_93 = arith.constant 0 : index
    %c0_94 = arith.constant 0 : index
    %133 = vector.load %arg1[%c8_92, %c0_93, %c0_94] : memref<9x1x1024xf32, #tpu.memory_space<vmem>>, vector<1x1x1024xf32>
    %134 = vector.shape_cast %133 : vector<1x1x1024xf32> to vector<1x1024xf32>
    %135 = vector.broadcast %134 : vector<1x1024xf32> to vector<16x1024xf32>
    %136 = arith.mulf %132, %135 : vector<16x1024xf32>
    %137 = tpu.concatenate %101, %106, %111, %116, %96, %121, %126, %131, %136 in 0 : vector<16x1024xf32>, vector<16x1024xf32>, vector<16x1024xf32>, vector<16x1024xf32>, vector<16x1024xf32>, vector<16x1024xf32>, vector<16x1024xf32>, vector<16x1024xf32>, vector<16x1024xf32> -> vector<144x1024xf32>
    %c0_95 = arith.constant 0 : index
    %c0_96 = arith.constant 0 : index
    %138 = vector.load %arg15[%c0_95, %c0_96] : memref<8x144xf32, #tpu.memory_space<vmem>>, vector<8x144xf32>
    %cst_97 = arith.constant dense<0.000000e+00> : vector<8x1024xf32>
    %139 = tpu.matmul %138, %137, %cst_97 {dimension_numbers = #tpu.dot_dimension_numbers<[1], [0], [0], [1], [0, 0, 1, 1], [], []>} : vector<8x144xf32>, vector<144x1024xf32>, vector<8x1024xf32> -> vector<8x1024xf32>
    %c1_i32_98 = arith.constant 1 : i32
    %140 = tpu.dynamic_rotate %139 by %c1_i32_98 dim 1 : vector<8x1024xf32>, i32 -> vector<8x1024xf32>
    %c0_99 = arith.constant 0 : index
    %c0_100 = arith.constant 0 : index
    %c0_101 = arith.constant 0 : index
    %141 = vector.load %arg2[%c0_99, %c0_100, %c0_101] : memref<3x1x1024xf32, #tpu.memory_space<vmem>>, vector<1x1x1024xf32>
    %142 = vector.shape_cast %141 : vector<1x1x1024xf32> to vector<1x1024xf32>
    %143 = vector.broadcast %142 : vector<1x1024xf32> to vector<8x1024xf32>
    %144 = arith.mulf %140, %143 : vector<8x1024xf32>
    %c1023_i32_102 = arith.constant 1023 : i32
    %145 = tpu.dynamic_rotate %139 by %c1023_i32_102 dim 1 : vector<8x1024xf32>, i32 -> vector<8x1024xf32>
    %c2_103 = arith.constant 2 : index
    %c0_104 = arith.constant 0 : index
    %c0_105 = arith.constant 0 : index
    %146 = vector.load %arg2[%c2_103, %c0_104, %c0_105] : memref<3x1x1024xf32, #tpu.memory_space<vmem>>, vector<1x1x1024xf32>
    %147 = vector.shape_cast %146 : vector<1x1x1024xf32> to vector<1x1024xf32>
    %148 = vector.broadcast %147 : vector<1x1024xf32> to vector<8x1024xf32>
    %149 = arith.mulf %145, %148 : vector<8x1024xf32>
    %150 = tpu.concatenate %144, %139, %149 in 0 : vector<8x1024xf32>, vector<8x1024xf32>, vector<8x1024xf32> -> vector<24x1024xf32>
    %c0_106 = arith.constant 0 : index
    %c0_107 = arith.constant 0 : index
    %151 = vector.load %arg16[%c0_106, %c0_107] : memref<8x24xf32, #tpu.memory_space<vmem>>, vector<8x24xf32>
    %cst_108 = arith.constant dense<0.000000e+00> : vector<8x1024xf32>
    %152 = tpu.matmul %151, %150, %cst_108 {dimension_numbers = #tpu.dot_dimension_numbers<[1], [0], [0], [1], [0, 0, 1, 1], [], []>} : vector<8x24xf32>, vector<24x1024xf32>, vector<8x1024xf32> -> vector<8x1024xf32>
    %c16 = arith.constant 16 : index
    %c0_109 = arith.constant 0 : index
    %153 = vector.load %arg17[%c16, %c0_109] : memref<24x1024xf32, #tpu.memory_space<vmem>>, vector<8x1024xf32>
    tpu.vector_store %arg17[%c16, %c0_109], %152 {strides = array<i32>} : memref<24x1024xf32, #tpu.memory_space<vmem>>, vector<8x1024xf32>,
    return
  }
}

</mosaic_0001>

<bundles_post_ra>
// kernel: tpu_custom_call.1
= control target key start
LH: loop header
LB: loop body
LE: loop exit
PB: predicated region body
PF: predicated region fallthrough
CT: control target
= control target key end

     0   :  { %s6866_s0 = inlined_call_operand.vmem [shape: f32[8,1024], index: 0, kind: input, shape index: {}]   ;;  %s6867_s1 = inlined_call_operand.vmem [shape: f32[9,1,1024], index: 1, kind: input, shape index: {}]   ;;  %s6868_s2 = inlined_call_operand.hbm [shape: f32[3,1,1024], index: 2, kind: input, shape index: {}]   ;;  %s6869_s3 = inlined_call_operand.vmem [shape: f32[8,1], index: 3, kind: input, shape index: {}]   ;;  %s6870_s4 = inlined_call_operand.vmem [shape: f32[8,1], index: 4, kind: input, shape index: {}]   ;;  %s6871_s5 = inlined_call_operand.vmem [shape: f32[16,8], index: 5, kind: input, shape index: {}]   ;;  %s6872_s6 = inlined_call_operand.vmem [shape: f32[16,1], index: 6, kind: input, shape index: {}]   ;;  %s6873_s7 = inlined_call_operand.vmem [shape: f32[16,1], index: 7, kind: input, shape index: {}]   ;;  %s6874_s8 = inlined_call_operand.vmem [shape: f32[8,144], index: 8, kind: input, shape index: {}]   ;;  %s6875_s9 = inlined_call_operand.hbm [shape: f32[8,24], index: 9, kind: input, shape index: {}]   ;;  %s6876_s10 = inlined_call_operand.vmem [shape: f32[16,1], index: 10, kind: input, shape index: {}]   ;;  %s6877_s11 = inlined_call_operand.vmem [shape: f32[16,1], index: 11, kind: input, shape index: {}]   ;;  %s6878_s12 = inlined_call_operand.hbm [shape: f32[16,16], index: 12, kind: input, shape index: {}]   ;;  %s6879_s13 = inlined_call_operand.vmem [shape: f32[16,1], index: 13, kind: input, shape index: {}]   ;;  %s6880_s14 = inlined_call_operand.vmem [shape: f32[16,1], index: 14, kind: input, shape index: {}]   ;;  %s6881_s15 = inlined_call_operand.vmem [shape: f32[8,144], index: 15, kind: input, shape index: {}]   ;;  %s6882_s16 = inlined_call_operand.hbm [shape: f32[8,24], index: 16, kind: input, shape index: {}]   ;;  %s6883_s17 = inlined_call_operand.hbm [shape: f32[24,1024], index: 17, kind: output, shape index: {}]  }
   0x1   :  { %7017 = sst [smem:[#allocation74_spill]] %s6866_s0 }
   0x2   :  { %7018 = sst [smem:[#allocation75_spill]] %s6867_s1 }
   0x3   :  { %22 = vsyncpa [#allocation3], 0 }
   0x4   :  { %23 = vsyncpa [#allocation6], 0 }
   0x5   :  { %24 = vsyncpa [#allocation9], 0 }
   0x6   :  { %25 = vsyncpa [#allocation4], 0  ;;  %s4118_s24 = smov [#allocation5]   ;;  %s4119_s26 = smov [#allocation2]  }
   0x7   :  { %s60_s25 = sshll.u32 %s4118_s24, 4  ;;  %s35_s27 = sshll.u32 %s4119_s26, 4  ;;  %s61_s25 = int_to_ptr.vmem [resolvable:$true] %s60_s25  ;;  %s36_s27 = int_to_ptr.vmem [resolvable:$true] %s35_s27 }
   0x8   :  { %s4018_s28 = scalar_lea.vmem %s61_s25, 128  ;;  %p4023_p1 = scmp.lt.s32.totalorder %s61_s25, %s61_s25 }
   0x9   :  { %p4019_p0 = scmp.ne.s32.totalorder %s61_s25, %s4018_s28  ;;  %p4024_p2 = scmp.lt.s32.totalorder %s4018_s28, %s4018_s28 }
   0xb   :  { %p4025_p3 = por %p4024_p2, %p4023_p1 }
   0xd   :  { %p4026_p4 = pnand %p4025_p3, %p4019_p0 }
   0xf   :  { %4029 = shalt.err (!%p4026_p4)
}
  0x10   :  { %63 = dma.hbm_to_vmem [thread:$0]  %s6875_s9, 128, %s61_s25, [#allocation6]  }
  0x11   :  { %s4038_s30 = scalar_lea.vmem %s36_s27, 384  ;;  %p4043_p6 = scmp.lt.s32.totalorder %s36_s27, %s36_s27 }
  0x12   :  { %p4039_p5 = scmp.ne.s32.totalorder %s36_s27, %s4038_s30  ;;  %p4044_p7 = scmp.lt.s32.totalorder %s4038_s30, %s4038_s30 }
  0x14   :  { %p4045_p8 = por %p4044_p7, %p4043_p6 }
  0x16   :  { %p4046_p9 = pnand %p4045_p8, %p4039_p5 }
  0x18   :  { %4049 = shalt.err (!%p4046_p9)
}
  0x19   :  { %s4120_s18 = smov 128   ;;  %s4121_s19 = smov 8  }
  0x1a   :  { %41 = dma.hbm_to_vmem [thread:$0]  %s6868_s2, 384, %s36_s27, [#allocation3], %s4120_s18, %s4120_s18, %s4121_s19  }
  0x1b   :  { %s4122_s21 = smov [#allocation7]   ;;  %s4123_s23 = smov [#allocation8]  }
  0x1c   :  { %s73_s22 = sshll.u32 %s4122_s21, 4  ;;  %s92_s24 = sshll.u32 %s4123_s23, 4  ;;  %s74_s22 = int_to_ptr.vmem [resolvable:$true] %s73_s22  ;;  %s93_s24 = int_to_ptr.vmem [resolvable:$true] %s92_s24 }
  0x1d   :  { %s4058_s9 = scalar_lea.vmem %s74_s22, 256  ;;  %p4063_p11 = scmp.lt.s32.totalorder %s74_s22, %s74_s22 }
  0x1e   :  { %p4059_p10 = scmp.ne.s32.totalorder %s74_s22, %s4058_s9  ;;  %p4064_p12 = scmp.lt.s32.totalorder %s4058_s9, %s4058_s9 }
  0x20   :  { %p4065_p13 = por %p4064_p12, %p4063_p11 }
  0x22   :  { %p4066_p0 = pnand %p4065_p13, %p4059_p10 }
  0x24   :  { %4069 = shalt.err (!%p4066_p0)
}
  0x25   :  { %79 = dma.hbm_to_vmem [thread:$0]  %s6878_s12, 256, %s74_s22, [#allocation6], %s4120_s18, %s4120_s18, %s4121_s19  }
  0x26   :  { %s4078_s28 = scalar_lea.vmem %s93_s24, 128  ;;  %p4083_p2 = scmp.lt.s32.totalorder %s93_s24, %s93_s24 }
  0x27   :  { %p4079_p1 = scmp.ne.s32.totalorder %s93_s24, %s4078_s28  ;;  %p4084_p3 = scmp.lt.s32.totalorder %s4078_s28, %s4078_s28 }
  0x29   :  { %p4085_p4 = por %p4084_p3, %p4083_p2 }
  0x2b   :  { %p4086_p5 = pnand %p4085_p4, %p4079_p1 }
  0x2d   :  { %4089 = shalt.err (!%p4086_p5)
}
  0x2e   :  { %95 = dma.hbm_to_vmem [thread:$0]  %s6882_s16, 128, %s93_s24, [#allocation9]  }
  0x2f   :  { %4110 = dma.done.wait [#allocation3], 384  }
  0x30   :  { %4111 = vsyncadd [#allocation3], 4294966912 }
  0x31   :  { %4112 = dma.done.wait [#allocation6], 384  }
  0x32   :  { %4113 = vsyncadd [#allocation6], 4294966912 }
  0x33   :  { %4114 = dma.done.wait [#allocation9], 128  }
  0x34   :  { %4115 = vsyncadd [#allocation9], 4294967168  ;;  %v4124_v0 = vmov 0   ;;  %v132_v1 = vld [vmem:[%s6869_s3] sm:$0xff]  ;;  %s7019_s1 = sld [smem:[#allocation74_spill]]  ;;  %v514_v11 = vld [vmem:[%s6873_s7 + $0x8] sm:$0xff] }
  0x35   :  { %4007 = vset.pattern.permute.xlu0 %v4124_v0  ;;  %4008 = vset.pattern.permute.xlu1 %v4124_v0  ;;  %v146_v2 = vld [vmem:[%s6870_s4] sm:$0xff]  ;;  %v6886_v12 = vmov 0.0   ;;  %v486_v13 = vld [vmem:[%s6872_s6 + $0x8] sm:$0xff]  ;;  %vm170_vm0 = vcmask 64512   ;;  %s4127_s3 = smov 72   ;;  %s4128_s24 = smov 120  }
  0x36   :  { %135 = vperm.xlu0 %4007, %v132_v1   ;;  %241 = vmatprep.mubr.f32.mxu0 %v6886_v12  ;;  %v485_v14 = vld [vmem:[%s6872_s6] sm:$0xff]  ;;  %v169_v43 = vld [vmem:[%s6871_s5 + $0x8] sm:$0xff]  ;;  %s4129_s4 = smov 56   ;;  %vm1277_vm1 = vcmask 130048   ;;  %s7034_s2 = sld [smem:[#allocation75_spill]]  ;;  %vm1717_vm9 = vcmask 195584  }
  0x37   :  { %318 = vmatprep.mubr.f32.mxu1 %v6886_v12  ;;  %494 = vperm.xlu1 %4008, %v486_v13   ;;  %v513_v15 = vld [vmem:[%s6873_s7] sm:$0xff]  ;;  %s4130_s27 = smov 127   ;;  %s4131_s12 = smov 1  }
  0x38   :  { %v168_v38 = vld [vmem:[%s6871_s5] sm:$0xff]  ;;  %s4126_s5 = smov 64  }
  0x3a   :  { %v109_v3 = vld [vmem:[%s7019_s1 + $0x8] sm:$0xff]  ;;  %v111_v4 = vld [vmem:[%s7019_s1 + $0x18] sm:$0xff]  ;;  %v108_v5 = vld [vmem:[%s7019_s1] sm:$0xff]  ;;  %149 = vperm.xlu0 %4007, %v146_v2  }
  0x3b   :  { %117 = vst [vmem:[#allocation10 + $0x8] sm:$0xff] %v109_v3  ;;  %119 = vst [vmem:[#allocation10 + $0x18] sm:$0xff] %v111_v4  ;;  %v110_v6 = vld [vmem:[%s7019_s1 + $0x10] sm:$0xff]  ;;  %v113_v7 = vld [vmem:[%s7019_s1 + $0x28] sm:$0xff]  ;;  %489 = vperm.xlu1 %4008, %v485_v14  }
  0x3c   :  { %116 = vst [vmem:[#allocation10] sm:$0xff] %v108_v5  ;;  %v115_v8 = vld [vmem:[%s7019_s1 + $0x38] sm:$0xff]  ;;  %118 = vst [vmem:[#allocation10 + $0x10] sm:$0xff] %v110_v6  ;;  %v112_v9 = vld [vmem:[%s7019_s1 + $0x20] sm:$0xff] }
  0x3d   :  { %121 = vst [vmem:[#allocation10 + $0x28] sm:$0xff] %v113_v7  ;;  %123 = vst [vmem:[#allocation10 + $0x38] sm:$0xff] %v115_v8  ;;  %v114_v10 = vld [vmem:[%s7019_s1 + $0x30] sm:$0xff] }
  0x3e   :  { %120 = vst [vmem:[#allocation10 + $0x20] sm:$0xff] %v112_v9  ;;  %122 = vst [vmem:[#allocation10 + $0x30] sm:$0xff] %v114_v10  ;;  %522 = vperm.xlu0 %4007, %v514_v11  }
  0x3f   :  { %517 = vperm.xlu1 %4008, %v513_v15  }
  0xb1   :  { %v136_v16 = vpop.permute.xlu0 %135 }
  0xb2   :  { %v139_v17 = vmul.f32 %v136_v16, %v109_v3  ;;  %v141_v18 = vmul.f32 %v136_v16, %v111_v4  ;;  %v138_v19 = vmul.f32 %v136_v16, %v108_v5  ;;  %v140_v20 = vmul.f32 %v136_v16, %v110_v6  ;;  %v4302_v44 = vpop.permute.xlu1 %494 }
  0xb3   :  { %v143_v22 = vmul.f32 %v136_v16, %v113_v7  ;;  %v145_v23 = vmul.f32 %v136_v16, %v115_v8  ;;  %v142_v24 = vmul.f32 %v136_v16, %v112_v9  ;;  %v144_v25 = vmul.f32 %v136_v16, %v114_v10 }
  0xb5   :  { %v150_v21 = vpop.permute.xlu0 %149 }
  0xb6   :  { %v153_v26 = vadd.f32 %v150_v21, %v139_v17  ;;  %v155_v27 = vadd.f32 %v150_v21, %v141_v18  ;;  %v152_v28 = vadd.f32 %v150_v21, %v138_v19  ;;  %v154_v29 = vadd.f32 %v150_v21, %v140_v20  ;;  %v4304_v45 = vpop.permute.xlu1 %489 }
  0xb7   :  { %v157_v30 = vadd.f32 %v150_v21, %v143_v22  ;;  %v159_v31 = vadd.f32 %v150_v21, %v145_v23  ;;  %v156_v32 = vadd.f32 %v150_v21, %v142_v24  ;;  %v158_v33 = vadd.f32 %v150_v21, %v144_v25 }
  0xb8   :  { %v161_v34 = vmax.f32 %v153_v26, 0.0  ;;  %v163_v35 = vmax.f32 %v155_v27, 0.0  ;;  %v160_v36 = vmax.f32 %v152_v28, 0.0  ;;  %v162_v37 = vmax.f32 %v154_v29, 0.0 }
  0xb9   :  { %v165_v39 = vmax.f32 %v157_v30, 0.0  ;;  %v167_v40 = vmax.f32 %v159_v31, 0.0  ;;  %v164_v41 = vmax.f32 %v156_v32, 0.0  ;;  %v166_v42 = vmax.f32 %v158_v33, 0.0  ;;  %v4345_v1 = vpop.permute.xlu0 %522 }
  0xba   :  { %207 = vmatprep.subr.mxu0 %v161_v34  ;;  %284 = vmatprep.subr.mxu1 %v163_v35  ;;  %v4308_v50 = vpop.permute.xlu1 %517 }
  0xbb   :  { %208 = vmatpush1.msra.mxu0 %v160_v36  ;;  %285 = vmatpush1.msra.mxu1 %v162_v37 }
  0xbc   :  { %3945 = vmatmul.mubr.msk.f32.vlgmr.msra.gmra.mxu0 %vm170_vm0, %v168_v38  ;;  %3947 = vmatmul.mubr.msk.f32.vlgmr.msra.gmra.mxu1 %vm170_vm0, %v168_v38 }
  0xbd   :  { %361 = vmatprep.subr.mxu0 %v165_v39  ;;  %438 = vmatprep.subr.mxu1 %v167_v40 }
  0xbe   :  { %362 = vmatpush1.msra.mxu0 %v164_v41  ;;  %439 = vmatpush1.msra.mxu1 %v166_v42 }
  0xbf   :  { %247 = vmatprep.mubr.f32.mxu0 %v6886_v12  ;;  %324 = vmatprep.mubr.f32.mxu1 %v6886_v12 }
  0xc0   :  { %3946 = vmatmul.mubr.msk.f32.gmra.mxu0 %vm170_vm0, %v169_v43  ;;  %3948 = vmatmul.mubr.msk.f32.gmra.mxu1 %vm170_vm0, %v169_v43 }
  0xc1   :  { %395 = vmatprep.mubr.f32.mxu0 %v6886_v12  ;;  %472 = vmatprep.mubr.f32.mxu1 %v6886_v12 }
  0xc4   :  { %3949 = vmatmul.mubr.msk.f32.vlgmr.msra.gmra.mxu0 %vm170_vm0, %v168_v38  ;;  %3951 = vmatmul.mubr.msk.f32.vlgmr.msra.gmra.mxu1 %vm170_vm0, %v168_v38 }
  0xc5   :  { %401 = vmatprep.mubr.f32.mxu0 %v6886_v12  ;;  %478 = vmatprep.mubr.f32.mxu1 %v6886_v12 }
  0xc8   :  { %3950 = vmatmul.mubr.msk.f32.gmra.mxu0 %vm170_vm0, %v169_v43  ;;  %3952 = vmatmul.mubr.msk.f32.gmra.mxu1 %vm170_vm0, %v169_v43 }
 0x17c   :  { %v243_v46 = vpop.f32.mrf.mxu0  ;;  %v320_v47 = vpop.f32.mrf.mxu1 }
 0x17d   :  { %v497_v48 = vmul.f32 %v4304_v45, %v243_v46  ;;  %v499_v49 = vmul.f32 %v4304_v45, %v320_v47 }
 0x17e   :  { %v322_v55 = vpop.f32.mrf.mxu1  ;;  %v245_v57 = vpop.f32.mrf.mxu0 }
 0x17f   :  { %v525_v51 = vadd.f32 %v4308_v50, %v497_v48  ;;  %v527_v52 = vadd.f32 %v4308_v50, %v499_v49  ;;  %v500_v56 = vmul.f32 %v4304_v45, %v322_v55  ;;  %v498_v59 = vmul.f32 %v4304_v45, %v245_v57  ;;  %v4508_v55 = vld [vmem:[%s6874_s8 + $0x8] sm:$0xff] }
 0x180   :  { %v326_v60 = vpop.f32.mrf.mxu1  ;;  %v249_v0 = vpop.f32.mrf.mxu0  ;;  %7029 = vst [vmem:[#allocation24_spill] sm:$0xff] %v4508_v55  ;;  %3961 = vmatprep.mubr.msk.f32.mxu1 %vm1277_vm1, %v4508_v55  ;;  %3960 = vmatprep.mubr.msk.f32.mxu0 %vm1277_vm1, %v4508_v55 }
 0x181   :  { %v4312_v53 = vmax.f32 %v525_v51, 0.0  ;;  %v4314_v54 = vmax.f32 %v527_v52, 0.0  ;;  %v528_v58 = vadd.f32 %v4308_v50, %v500_v56  ;;  %v507_v62 = vmul.f32 %v4302_v44, %v326_v60 }
 0x182   :  { %v526_v63 = vadd.f32 %v4308_v50, %v498_v59  ;;  %v505_v2 = vmul.f32 %v4302_v44, %v249_v0  ;;  %v251_v7 = vpop.f32.mrf.mxu0  ;;  %v328_v11 = vpop.f32.mrf.mxu1 }
 0x183   :  { %674 = vrot.lane.b32.xlu1 %v4314_v54, %s4126_s5  ;;  %666 = vrot.lane.b32.xlu0 %v4312_v53, %s4126_s5  ;;  %v4339_v61 = vmax.f32 %v528_v58, 0.0  ;;  %v535_v3 = vadd.f32 %v4345_v1, %v507_v62  ;;  %v506_v9 = vmul.f32 %v4302_v44, %v251_v7  ;;  %v508_v14 = vmul.f32 %v4302_v44, %v328_v11 }
 0x184   :  { %v4351_v4 = vmax.f32 %v526_v63, 0.0  ;;  %v533_v5 = vadd.f32 %v4345_v1, %v505_v2  ;;  %v397_v17 = vpop.f32.mrf.mxu0  ;;  %v474_v21 = vpop.f32.mrf.mxu1 }
 0x185   :  { %v4358_v6 = vmax.f32 %v535_v3, 0.0  ;;  %v534_v10 = vadd.f32 %v4345_v1, %v506_v9  ;;  %v536_v15 = vadd.f32 %v4345_v1, %v508_v14  ;;  %v501_v18 = vmul.f32 %v4304_v45, %v397_v17 }
 0x186   :  { %v4364_v8 = vmax.f32 %v533_v5, 0.0  ;;  %v476_v22 = vpop.f32.mrf.mxu1  ;;  %v399_v25 = vpop.f32.mrf.mxu0  ;;  %v503_v28 = vmul.f32 %v4304_v45, %v474_v21  ;;  %v589_v17 = vlaneseq }
 0x187   :  { %565 = vrot.lane.b32.xlu1 %v4314_v54, %s4127_s3  ;;  %890 = vrot.lane.b32.xlu0 %v4314_v54, %s4121_s19  ;;  %v4376_v13 = vmax.f32 %v534_v10, 0.0  ;;  %v4388_v16 = vmax.f32 %v536_v15, 0.0  ;;  %v529_v19 = vadd.f32 %v4308_v50, %v501_v18  ;;  %v504_v23 = vmul.f32 %v4304_v45, %v476_v22 }
 0x188   :  { %v502_v26 = vmul.f32 %v4304_v45, %v399_v25  ;;  %v403_v29 = vpop.f32.mrf.mxu0  ;;  %v531_v32 = vadd.f32 %v4308_v50, %v503_v28  ;;  %v480_v37 = vpop.f32.mrf.mxu1  ;;  %v4583_v21 = vshrl.u32 %v589_v17, 7 }
 0x189   :  { %v4412_v20 = vmax.f32 %v529_v19, 0.0  ;;  %v532_v24 = vadd.f32 %v4308_v50, %v504_v23  ;;  %v509_v31 = vmul.f32 %v4302_v44, %v403_v29  ;;  %v511_v38 = vmul.f32 %v4302_v44, %v480_v37 }
 0x18a   :  { %v530_v30 = vadd.f32 %v4308_v50, %v502_v26  ;;  %v4450_v35 = vmax.f32 %v531_v32, 0.0  ;;  %v482_v39 = vpop.f32.mrf.mxu1  ;;  %v405_v50 = vpop.f32.mrf.mxu0  ;;  %v4587_v23 = vand.u32 127, %v589_v17  ;;  %v4592_v25 = vsub.s32 1, %v4583_v21  ;;  %v4597_v26 = vld [vmem:[%s7034_s2 + $0x38] sm:$0xff] }
 0x18b   :  { %557 = vrot.lane.b32.xlu1 %v4312_v53, %s4127_s3  ;;  %882 = vrot.lane.b32.xlu0 %v4312_v53, %s4121_s19  ;;  %7020 = vst [vmem:[#allocation15_spill] sm:$0xff] %v4412_v20  ;;  %v4433_v27 = vmax.f32 %v532_v24, 0.0  ;;  %v537_v34 = vadd.f32 %v4345_v1, %v509_v31  ;;  %v539_v40 = vadd.f32 %v4345_v1, %v511_v38  ;;  %v4601_v29 = vsub.s32 0, %v4583_v21 }
 0x18c   :  { %v4447_v33 = vmax.f32 %v530_v30, 0.0  ;;  %7023 = vst [vmem:[#allocation18_spill] sm:$0xff] %v4450_v35  ;;  %v512_v41 = vmul.f32 %v4302_v44, %v482_v39  ;;  %v510_v51 = vmul.f32 %v4302_v44, %v405_v50  ;;  %7033 = vst [vmem:[#allocation28_spill] sm:$0xff] %v4592_v25  ;;  %vm698_vm2 = vcmp.lt.s32.totalorder %v4587_v23, 64  ;;  %v4638_v50 = vld [vmem:[%s7034_s2 + $0x30] sm:$0xff] }
 0x18d   :  { %7021 = vst [vmem:[#allocation16_spill] sm:$0xff] %v4433_v27  ;;  %v4456_v36 = vmax.f32 %v537_v34, 0.0  ;;  %v4477_v42 = vmax.f32 %v539_v40, 0.0  ;;  %7035 = vst [vmem:[#allocation29_spill] sm:$0xff] %v4601_v29  ;;  %v1167_v31 = vrot.slane %v4597_v26, %v4592_v25  ;;  %v1163_v38 = vrot.slane %v4597_v26, %v4601_v29 }
 0x18e   :  { %7022 = vst [vmem:[#allocation17_spill] sm:$0xff] %v4447_v33  ;;  %v540_v43 = vadd.f32 %v4345_v1, %v512_v41  ;;  %v538_v44 = vadd.f32 %v4345_v1, %v510_v51  ;;  %vm591_vm3 = vcmp.lt.s32.totalorder %v4587_v23, 72  ;;  %v1104_v12 = vrot.slane %v4638_v50, %v4601_v29 }
 0x18f   :  { %998 = vrot.lane.b32.xlu1 %v4314_v54, %s4128_s24  ;;  %782 = vrot.lane.b32.xlu0 %v4314_v54, %s4129_s4  ;;  %7024 = vst [vmem:[#allocation19_spill] sm:$0xff] %v4456_v36  ;;  %7025 = vst [vmem:[#allocation20_spill] sm:$0xff] %v4477_v42  ;;  %vm1022_vm4 = vcmp.lt.s32.totalorder %v4587_v23, 120  ;;  %vm914_vm5 = vcmp.lt.s32.totalorder %v4587_v23, 8  ;;  %vm806_vm6 = vcmp.lt.s32.totalorder %v4587_v23, 56  ;;  %vm1656_vm7 = vcmp.lt.s32.totalorder %v4587_v23, 127 }
 0x190   :  { %v4484_v45 = vmax.f32 %v540_v43, 0.0  ;;  %v4529_v59 = vmax.f32 %v538_v44, 0.0  ;;  %vm1581_vm8 = vcmp.lt.s32.totalorder %v4587_v23, 1 }
 0x192   :  { %7026 = vst [vmem:[#allocation21_spill] sm:$0xff] %v4484_v45  ;;  %7030 = vst [vmem:[#allocation25_spill] sm:$0xff] %v4529_v59 }
 0x193   :  { %990 = vrot.lane.b32.xlu1 %v4312_v53, %s4128_s24  ;;  %774 = vrot.lane.b32.xlu0 %v4312_v53, %s4129_s4 }
 0x197   :  { %894 = vrot.lane.b32.xlu1 %v4339_v61, %s4121_s19  ;;  %678 = vrot.lane.b32.xlu0 %v4339_v61, %s4126_s5 }
 0x19b   :  { %786 = vrot.lane.b32.xlu1 %v4339_v61, %s4129_s4  ;;  %670 = vrot.lane.b32.xlu0 %v4351_v4, %s4126_s5 }
 0x19f   :  { %567 = vrot.lane.b32.xlu1 %v4358_v6, %s4127_s3  ;;  %569 = vrot.lane.b32.xlu0 %v4339_v61, %s4127_s3 }
 0x1a3   :  { %884 = vrot.lane.b32.xlu1 %v4364_v8, %s4121_s19  ;;  %561 = vrot.lane.b32.xlu0 %v4351_v4, %s4127_s3 }
 0x1a7   :  { %776 = vrot.lane.b32.xlu1 %v4364_v8, %s4129_s4  ;;  %1002 = vrot.lane.b32.xlu0 %v4339_v61, %s4128_s24 }
 0x1ab   :  { %672 = vrot.lane.b32.xlu1 %v4376_v13, %s4126_s5  ;;  %994 = vrot.lane.b32.xlu0 %v4351_v4, %s4128_s24 }
 0x1af   :  { %563 = vrot.lane.b32.xlu1 %v4376_v13, %s4127_s3  ;;  %886 = vrot.lane.b32.xlu0 %v4351_v4, %s4121_s19 }
 0x1b3   :  { %1004 = vrot.lane.b32.xlu1 %v4388_v16, %s4128_s24  ;;  %778 = vrot.lane.b32.xlu0 %v4351_v4, %s4129_s4 }
 0x1b7   :  { %996 = vrot.lane.b32.xlu1 %v4376_v13, %s4128_s24  ;;  %676 = vrot.lane.b32.xlu0 %v4358_v6, %s4126_s5 }
 0x1bb   :  { %896 = vrot.lane.b32.xlu1 %v4388_v16, %s4121_s19  ;;  %668 = vrot.lane.b32.xlu0 %v4364_v8, %s4126_s5 }
 0x1bf   :  { %788 = vrot.lane.b32.xlu1 %v4388_v16, %s4129_s4  ;;  %559 = vrot.lane.b32.xlu0 %v4364_v8, %s4127_s3 }
 0x1c3   :  { %780 = vrot.lane.b32.xlu1 %v4376_v13, %s4129_s4  ;;  %1000 = vrot.lane.b32.xlu0 %v4358_v6, %s4128_s24 }
 0x1c7   :  { %682 = vrot.lane.b32.xlu1 %v4412_v20, %s4126_s5  ;;  %992 = vrot.lane.b32.xlu0 %v4364_v8, %s4128_s24 }
 0x1cb   :  { %573 = vrot.lane.b32.xlu1 %v4412_v20, %s4127_s3  ;;  %892 = vrot.lane.b32.xlu0 %v4358_v6, %s4121_s19 }
 0x1cf   :  { %1006 = vrot.lane.b32.xlu1 %v4412_v20, %s4128_s24  ;;  %784 = vrot.lane.b32.xlu0 %v4358_v6, %s4129_s4 }
 0x1d3   :  { %790 = vrot.lane.b32.xlu1 %v4412_v20, %s4129_s4  ;;  %680 = vrot.lane.b32.xlu0 %v4388_v16, %s4126_s5 }
 0x1d7   :  { %802 = vrot.lane.b32.xlu1 %v4433_v27, %s4129_s4  ;;  %571 = vrot.lane.b32.xlu0 %v4388_v16, %s4127_s3 }
 0x1db   :  { %694 = vrot.lane.b32.xlu1 %v4433_v27, %s4126_s5  ;;  %888 = vrot.lane.b32.xlu0 %v4376_v13, %s4121_s19 }
 0x1df   :  { %686 = vrot.lane.b32.xlu1 %v4447_v33, %s4126_s5  ;;  %690 = vrot.lane.b32.xlu0 %v4450_v35, %s4126_s5 }
 0x1e3   :  { %684 = vrot.lane.b32.xlu1 %v4456_v36, %s4126_s5  ;;  %910 = vrot.lane.b32.xlu0 %v4433_v27, %s4121_s19 }
 0x1e7   :  { %575 = vrot.lane.b32.xlu1 %v4456_v36, %s4127_s3  ;;  %585 = vrot.lane.b32.xlu0 %v4433_v27, %s4127_s3 }
 0x1eb   :  { %577 = vrot.lane.b32.xlu1 %v4447_v33, %s4127_s3  ;;  %1008 = vrot.lane.b32.xlu0 %v4456_v36, %s4128_s24 }
 0x1ef   :  { %792 = vrot.lane.b32.xlu1 %v4456_v36, %s4129_s4  ;;  %581 = vrot.lane.b32.xlu0 %v4450_v35, %s4127_s3 }
 0x1f3   :  { %1016 = vrot.lane.b32.xlu1 %v4477_v42, %s4128_s24  ;;  %692 = vrot.lane.b32.xlu0 %v4477_v42, %s4126_s5 }
 0x1f5   :  { %v4486_v46 = vpop.permute.xlu1 %674  ;;  %v4488_v47 = vpop.permute.xlu0 %666 }
 0x1f6   :  { %7027 = vst [vmem:[#allocation22_spill] sm:$0xff] %v4488_v47 }
 0x1f7   :  { %912 = vrot.lane.b32.xlu1 %v4484_v45, %s4121_s19  ;;  %583 = vrot.lane.b32.xlu0 %v4477_v42, %s4127_s3 }
 0x1f9   :  { %v4494_v48 = vpop.permute.xlu1 %565  ;;  %v4496_v49 = vpop.permute.xlu0 %890 }
 0x1fb   :  { %804 = vrot.lane.b32.xlu1 %v4484_v45, %s4129_s4  ;;  %1014 = vrot.lane.b32.xlu0 %v4450_v35, %s4128_s24 }
 0x1fd   :  { %v4503_v52 = vpop.permute.xlu1 %557  ;;  %v4510_v56 = vpop.permute.xlu0 %882 }
 0x1fe   :  { %7028 = vst [vmem:[#allocation23_spill] sm:$0xff] %v4503_v52 }
 0x1ff   :  { %1018 = vrot.lane.b32.xlu1 %v4433_v27, %s4128_s24  ;;  %696 = vrot.lane.b32.xlu0 %v4484_v45, %s4126_s5 }
 0x201   :  { %v4521_v57 = vpop.permute.xlu1 %998  ;;  %v4523_v58 = vpop.permute.xlu0 %782 }
 0x203   :  { %1010 = vrot.lane.b32.xlu1 %v4447_v33, %s4128_s24  ;;  %587 = vrot.lane.b32.xlu0 %v4484_v45, %s4127_s3 }
 0x205   :  { %v4531_v60 = vpop.permute.xlu1 %990  ;;  %v4533_v62 = vpop.permute.xlu0 %774 }
 0x206   :  { %7031 = vst [vmem:[#allocation26_spill] sm:$0xff] %v4531_v60 }
 0x207   :  { %688 = vrot.lane.b32.xlu1 %v4529_v59, %s4126_s5  ;;  %908 = vrot.lane.b32.xlu0 %v4477_v42, %s4121_s19 }
 0x209   :  { %v4539_v63 = vpop.permute.xlu1 %894  ;;  %v4541_v0 = vpop.permute.xlu0 %678 }
 0x20a   :  { %7032 = vst [vmem:[#allocation27_spill] sm:$0xff] %v4539_v63 }
 0x20b   :  { %579 = vrot.lane.b32.xlu1 %v4529_v59, %s4127_s3  ;;  %900 = vrot.lane.b32.xlu0 %v4456_v36, %s4121_s19 }
 0x20d   :  { %v4547_v1 = vpop.permute.xlu1 %786  ;;  %v671_v2 = vpop.permute.xlu0 %670 }
 0x20e   :  { %v4620_v39 = vsel %vm698_vm2, %v671_v2, %v4486_v46  ;;  %v4627_v41 = vsel %vm698_vm2, %v4488_v47, %v671_v2 }
 0x20f   :  { %906 = vrot.lane.b32.xlu1 %v4450_v35, %s4121_s19  ;;  %1020 = vrot.lane.b32.xlu0 %v4484_v45, %s4128_s24  ;;  %7038 = vst [vmem:[#allocation32_spill] sm:$0xff] %v4627_v41  ;;  %v1201_v17 = vmul.f32 %v1167_v31, %v4620_v39 }
 0x211   :  { %v4553_v3 = vpop.permute.xlu1 %567  ;;  %v4555_v5 = vpop.permute.xlu0 %569 }
 0x213   :  { %800 = vrot.lane.b32.xlu1 %v4477_v42, %s4129_s4  ;;  %1012 = vrot.lane.b32.xlu0 %v4529_v59, %s4128_s24 }
 0x215   :  { %v4561_v7 = vpop.permute.xlu1 %884  ;;  %v562_v9 = vpop.permute.xlu0 %561 }
 0x216   :  { %v4657_v55 = vsel %vm591_vm3, %v562_v9, %v4494_v48 }
 0x217   :  { %904 = vrot.lane.b32.xlu1 %v4529_v59, %s4121_s19  ;;  %902 = vrot.lane.b32.xlu0 %v4447_v33, %s4121_s19  ;;  %7040 = vst [vmem:[#allocation34_spill] sm:$0xff] %v4657_v55 }
 0x219   :  { %v4567_v10 = vpop.permute.xlu1 %776  ;;  %v4569_v11 = vpop.permute.xlu0 %1002 }
 0x21b   :  { %796 = vrot.lane.b32.xlu1 %v4529_v59, %s4129_s4  ;;  %898 = vrot.lane.b32.xlu0 %v4412_v20, %s4121_s19 }
 0x21d   :  { %v673_v14 = vpop.permute.xlu1 %672  ;;  %v4575_v15 = vpop.permute.xlu0 %994 }
 0x21f   :  { %794 = vrot.lane.b32.xlu1 %v4447_v33, %s4129_s4  ;;  %798 = vrot.lane.b32.xlu0 %v4450_v35, %s4129_s4 }
 0x221   :  { %v564_v18 = vpop.permute.xlu1 %563  ;;  %v4581_v19 = vpop.permute.xlu0 %886 }
 0x222   :  { %v4643_v51 = vsel %vm591_vm3, %v564_v18, %v4553_v3 }
 0x223   :  { %7039 = vst [vmem:[#allocation33_spill] sm:$0xff] %v4643_v51 }
 0x225   :  { %v4585_v22 = vpop.permute.xlu1 %1004  ;;  %v4589_v24 = vpop.permute.xlu0 %778 }
 0x229   :  { %v997_v28 = vpop.permute.xlu1 %996  ;;  %v4603_v30 = vpop.permute.xlu0 %676 }
 0x22a   :  { %v4610_v32 = vsel %vm698_vm2, %v673_v14, %v4603_v30 }
 0x22b   :  { %v1209_v34 = vmul.f32 %v1167_v31, %v4610_v32  ;;  %v4664_v31 = vsel %vm591_vm3, %v4503_v52, %v562_v9 }
 0x22c   :  { %7042 = vst [vmem:[#allocation36_spill] sm:$0xff] %v4664_v31  ;;  %v1141_v35 = vmul.f32 %v1104_v12, %v4664_v31 }
 0x22d   :  { %v4613_v37 = vpop.permute.xlu1 %896  ;;  %v4622_v40 = vpop.permute.xlu0 %668  ;;  %1281 = vmatprep.subr.mxu0 %v1209_v34  ;;  %v1200_v34 = vmul.f32 %v1163_v38, %v4627_v41 }
 0x22e   :  { %7036 = vst [vmem:[#allocation30_spill] sm:$0xff] %v4613_v37  ;;  %7037 = vst [vmem:[#allocation31_spill] sm:$0xff] %v4622_v40  ;;  %v4633_v43 = vsel %vm698_vm2, %v4622_v40, %v673_v14  ;;  %v1108_v14 = vrot.slane %v4638_v50, %v4592_v25  ;;  %v1031_v40 = vsel %vm1022_vm4, %v4521_v57, %v4569_v11 }
 0x22f   :  { %v1208_v44 = vmul.f32 %v1163_v38, %v4633_v43 }
 0x230   :  { %v1150_v33 = vmul.f32 %v1108_v14, %v4643_v51  ;;  %v1142_v9 = vmul.f32 %v1108_v14, %v4657_v55 }
 0x231   :  { %v4646_v2 = vpop.permute.xlu1 %788  ;;  %v4659_v20 = vpop.permute.xlu0 %559  ;;  %1282 = vmatpush1.msra.mxu0 %v1208_v44  ;;  %v4676_v44 = vld [vmem:[%s7034_s2 + $0x28] sm:$0xff] }
 0x232   :  { %7041 = vst [vmem:[#allocation35_spill] sm:$0xff] %v4659_v20  ;;  %v4669_v38 = vsel %vm591_vm3, %v4659_v20, %v564_v18  ;;  %1283 = vmatprep.subr.mxu0 %v1201_v17  ;;  %v1049_v17 = vrot.slane %v4676_v44, %v4592_v25 }
 0x233   :  { %7043 = vst [vmem:[#allocation37_spill] sm:$0xff] %v4669_v38  ;;  %v1149_v36 = vmul.f32 %v1104_v12, %v4669_v38  ;;  %1284 = vmatpush1.msra.mxu0 %v1200_v34  ;;  %v1045_v12 = vrot.slane %v4676_v44, %v4601_v29 }
 0x234   :  { %1285 = vmatprep.subr.mxu0 %v1150_v33 }
 0x235   :  { %v4678_v59 = vpop.permute.xlu1 %780  ;;  %v4683_v18 = vpop.permute.xlu0 %1000  ;;  %1286 = vmatpush1.msra.mxu0 %v1149_v36  ;;  %v1033_v36 = vsel %vm1022_vm4, %v4575_v15, %v4521_v57 }
 0x236   :  { %v1034_v34 = vsel %vm1022_vm4, %v997_v28, %v4683_v18  ;;  %1287 = vmatprep.subr.mxu0 %v1142_v9  ;;  %v1035_v9 = vsel %vm1022_vm4, %v4531_v60, %v4575_v15  ;;  %v1083_v45 = vmul.f32 %v1049_v17, %v1033_v36 }
 0x237   :  { %1288 = vmatpush1.msra.mxu0 %v1141_v35  ;;  %v1091_v33 = vmul.f32 %v1049_v17, %v1034_v34  ;;  %v1082_v20 = vmul.f32 %v1045_v12, %v1035_v9  ;;  %v4745_v9 = vsub.s32 2, %v4583_v21 }
 0x239   :  { %v4690_v27 = vpop.permute.xlu1 %682  ;;  %v4698_v14 = vpop.permute.xlu0 %992  ;;  %1289 = vmatprep.subr.mxu0 %v1091_v33  ;;  %7052 = vst [vmem:[#allocation46_spill] sm:$0xff] %v4745_v9  ;;  %v1112_v55 = vrot.slane %v4638_v50, %v4745_v9 }
 0x23a   :  { %7044 = vst [vmem:[#allocation38_spill] sm:$0xff] %v4690_v27  ;;  %7045 = vst [vmem:[#allocation39_spill] sm:$0xff] %v4698_v14  ;;  %v1036_v35 = vsel %vm1022_vm4, %v4698_v14, %v997_v28 }
 0x23b   :  { %v1090_v34 = vmul.f32 %v1045_v12, %v1036_v35 }
 0x23d   :  { %v4707_v42 = vpop.permute.xlu1 %573  ;;  %v4709_v52 = vpop.permute.xlu0 %892  ;;  %1290 = vmatpush1.msra.mxu0 %v1090_v34  ;;  %v4750_v34 = vsub.s32 3, %v4583_v21 }
 0x23e   :  { %7046 = vst [vmem:[#allocation40_spill] sm:$0xff] %v4707_v42  ;;  %1291 = vmatprep.subr.mxu0 %v1083_v45  ;;  %v4806_v41 = vsel %vm591_vm3, %v4555_v5, %v4707_v42 }
 0x23f   :  { %1292 = vmatpush1.msra.mxu0 %v1082_v20  ;;  %7054 = vst [vmem:[#allocation48_spill] sm:$0xff] %v4750_v34  ;;  %7061 = vst [vmem:[#allocation55_spill] sm:$0xff] %v4806_v41 }
 0x240   :  { %1293 = vmatprep.subr.mxu0 %v4376_v13  ;;  %v4726_v13 = vld [vmem:[%s7034_s2 + $0x18] sm:$0xff] }
 0x241   :  { %v4712_v33 = vpop.permute.xlu1 %1006  ;;  %v4714_v38 = vpop.permute.xlu0 %784  ;;  %1294 = vmatpush1.msra.mxu0 %v4364_v8  ;;  %7049 = vst [vmem:[#allocation43_spill] sm:$0xff] %v4726_v13 }
 0x242   :  { %7047 = vst [vmem:[#allocation41_spill] sm:$0xff] %v4712_v33  ;;  %1295 = vmatprep.subr.mxu0 %v4351_v4 }
 0x243   :  { %1296 = vmatpush1.msra.mxu0 %v4312_v53  ;;  %v4735_v53 = vrot.slane %v4726_v13, %v4592_v25 }
 0x245   :  { %v4719_v15 = vpop.permute.xlu1 %790  ;;  %v681_v28 = vpop.permute.xlu0 %680 }
 0x246   :  { %7048 = vst [vmem:[#allocation42_spill] sm:$0xff] %v4719_v15  ;;  %v4755_v14 = vsel %vm698_vm2, %v4603_v30, %v681_v28  ;;  %v4780_v15 = vsel %vm698_vm2, %v4486_v46, %v4541_v0 }
 0x249   :  { %v4721_v17 = vpop.permute.xlu1 %802  ;;  %v572_v12 = vpop.permute.xlu0 %571 }
 0x24d   :  { %v4728_v20 = vpop.permute.xlu1 %694  ;;  %v4731_v8 = vpop.permute.xlu0 %888 }
 0x24e   :  { %7050 = vst [vmem:[#allocation44_spill] sm:$0xff] %v4728_v20  ;;  %v928_v4 = vsel %vm914_vm5, %v4561_v7, %v4731_v8 }
 0x24f   :  { %v983_v45 = vmul.f32 %v4735_v53, %v928_v4  ;;  %v1175_v4 = vrot.slane %v4597_v26, %v4750_v34 }
 0x251   :  { %v4742_v36 = vpop.permute.xlu1 %686  ;;  %v4747_v35 = vpop.permute.xlu0 %690  ;;  %1297 = vmatprep.subr.mxu0 %v983_v45  ;;  %v4767_v45 = vsel %vm698_vm2, %v4541_v0, %v4690_v27  ;;  %v4787_v27 = vld [vmem:[%s7034_s2 + $0x40] sm:$0xff]  ;;  %v1116_v0 = vrot.slane %v4638_v50, %v4750_v34 }
 0x252   :  { %7051 = vst [vmem:[#allocation45_spill] sm:$0xff] %v4742_v36  ;;  %7053 = vst [vmem:[#allocation47_spill] sm:$0xff] %v4747_v35  ;;  %v1171_v36 = vrot.slane %v4597_v26, %v4745_v9  ;;  %v1203_v46 = vmul.f32 %v1175_v4, %v4767_v45  ;;  %v4829_v42 = vrot.slane %v4787_v27, %v4745_v9 }
 0x253   :  { %7056 = vst [vmem:[#allocation50_spill] sm:$0xff] %v4767_v45  ;;  %7058 = vst [vmem:[#allocation52_spill] sm:$0xff] %v4787_v27 }
 0x254   :  { %v1210_v51 = vmul.f32 %v1171_v36, %v4755_v14 }
 0x255   :  { %v4757_v60 = vpop.permute.xlu1 %684  ;;  %v4769_v35 = vpop.permute.xlu0 %910 }
 0x256   :  { %7055 = vst [vmem:[#allocation49_spill] sm:$0xff] %v4757_v60  ;;  %v4774_v30 = vsel %vm698_vm2, %v681_v28, %v4757_v60  ;;  %v4792_v28 = vsel %vm591_vm3, %v4553_v3, %v572_v12 }
 0x257   :  { %7057 = vst [vmem:[#allocation51_spill] sm:$0xff] %v4774_v30  ;;  %v1211_v31 = vmul.f32 %v1175_v4, %v4774_v30  ;;  %7059 = vst [vmem:[#allocation53_spill] sm:$0xff] %v4792_v28  ;;  %v1202_v30 = vmul.f32 %v1171_v36, %v4780_v15  ;;  %v4819_v36 = vsel %vm591_vm3, %v4494_v48, %v4555_v5  ;;  %v4824_v4 = vld [vmem:[%s7034_s2 + $0x10] sm:$0xff] }
 0x258   :  { %7064 = vst [vmem:[#allocation58_spill] sm:$0xff] %v4819_v36  ;;  %7065 = vst [vmem:[#allocation59_spill] sm:$0xff] %v4824_v4  ;;  %v1151_v48 = vmul.f32 %v1112_v55, %v4792_v28  ;;  %v1053_v28 = vrot.slane %v4676_v44, %v4745_v9  ;;  %v4910_v57 = vrot.slane %v4824_v4, %v4745_v9 }
 0x259   :  { %1352 = vmatprep.subr.mxu1 %v1211_v31  ;;  %v4794_v60 = vpop.permute.xlu1 %575  ;;  %v4808_v3 = vpop.permute.xlu0 %585 }
 0x25a   :  { %7060 = vst [vmem:[#allocation54_spill] sm:$0xff] %v4794_v60  ;;  %7062 = vst [vmem:[#allocation56_spill] sm:$0xff] %v4808_v3  ;;  %v4813_v31 = vsel %vm591_vm3, %v572_v12, %v4794_v60  ;;  %1353 = vmatpush1.msra.mxu1 %v1210_v51  ;;  %v4834_v51 = vld [vmem:[%s7034_s2 + $0x8] sm:$0xff]  ;;  %v4844_v12 = vld [vmem:[%s7034_s2] sm:$0xff]  ;;  %v4851_v60 = vrot.slane %v4726_v13, %v4750_v34  ;;  %v1143_v3 = vmul.f32 %v1112_v55, %v4819_v36 }
 0x25b   :  { %7063 = vst [vmem:[#allocation57_spill] sm:$0xff] %v4813_v31  ;;  %1354 = vmatprep.subr.mxu1 %v1203_v46  ;;  %v1152_v45 = vmul.f32 %v1116_v0, %v4813_v31  ;;  %7066 = vst [vmem:[#allocation60_spill] sm:$0xff] %v4834_v51  ;;  %v4839_v5 = vrot.slane %v4834_v51, %v4745_v9  ;;  %v1144_v31 = vmul.f32 %v1116_v0, %v4806_v41 }
 0x25c   :  { %1355 = vmatpush1.msra.mxu1 %v1202_v30  ;;  %7067 = vst [vmem:[#allocation61_spill] sm:$0xff] %v4844_v12  ;;  %v4855_v30 = vrot.slane %v4834_v51, %v4592_v25  ;;  %v1057_v0 = vrot.slane %v4676_v44, %v4750_v34  ;;  %v4869_v41 = vrot.slane %v4824_v4, %v4750_v34 }
 0x25d   :  { %1356 = vmatprep.subr.mxu1 %v1152_v45  ;;  %v4846_v46 = vpop.permute.xlu1 %577  ;;  %v1032_v45 = vsel %vm1022_vm4, %v4683_v18, %v4585_v22  ;;  %v1029_v55 = vsel %vm1022_vm4, %v4569_v11, %v4712_v33  ;;  %v4887_v36 = vrot.slane %v4844_v12, %v4745_v9  ;;  %v4895_v20 = vrot.slane %v4844_v12, %v4750_v34 }
 0x25e   :  { %7068 = vst [vmem:[#allocation62_spill] sm:$0xff] %v4846_v46  ;;  %v4863_v46 = vpop.permute.xlu0 %1008  ;;  %1357 = vmatpush1.msra.mxu1 %v1151_v48  ;;  %v4883_v48 = vrot.slane %v4834_v51, %v4750_v34  ;;  %v4914_v11 = vrot.slane %v4787_v27, %v4601_v29 }
 0x25f   :  { %7069 = vst [vmem:[#allocation63_spill] sm:$0xff] %v4863_v46  ;;  %v1030_v18 = vsel %vm1022_vm4, %v4585_v22, %v4863_v46  ;;  %1358 = vmatprep.subr.mxu1 %v1144_v31  ;;  %7070 = vst [vmem:[#allocation64_spill] sm:$0xff] %v4887_v36  ;;  %v945_v22 = vrot.slane %v4726_v13, %v4745_v9  ;;  %v1092_v31 = vmul.f32 %v1053_v28, %v1032_v45 }
 0x260   :  { %1359 = vmatpush1.msra.mxu1 %v1143_v3  ;;  %v1093_v33 = vmul.f32 %v1057_v0, %v1030_v18  ;;  %7071 = vst [vmem:[#allocation65_spill] sm:$0xff] %v4895_v20  ;;  %v4900_v46 = vsub.s32 6, %v4583_v21  ;;  %v4906_v36 = vrot.slane %v4844_v12, %v4592_v25  ;;  %v1085_v45 = vmul.f32 %v1057_v0, %v1029_v55 }
 0x261   :  { %v4902_v47 = vpop.permute.xlu1 %792  ;;  %v4919_v18 = vsub.s32 5, %v4583_v21  ;;  %v4922_v20 = vsub.s32 4, %v4583_v21  ;;  %v4926_v9 = vrot.slane %v4824_v4, %v4592_v25 }
 0x262   :  { %7072 = vst [vmem:[#allocation66_spill] sm:$0xff] %v4900_v46  ;;  %7073 = vst [vmem:[#allocation67_spill] sm:$0xff] %v4902_v47  ;;  %v4916_v3 = vpop.permute.xlu0 %581  ;;  %1360 = vmatprep.subr.mxu1 %v1093_v33  ;;  %v1084_v47 = vmul.f32 %v1053_v28, %v1031_v40  ;;  %v4937_v33 = vrot.slane %v4834_v51, %v4601_v29  ;;  %v4941_v40 = vrot.slane %v4787_v27, %v4750_v34 }
 0x263   :  { %7074 = vst [vmem:[#allocation68_spill] sm:$0xff] %v4906_v36  ;;  %7075 = vst [vmem:[#allocation69_spill] sm:$0xff] %v4916_v3  ;;  %1361 = vmatpush1.msra.mxu1 %v1092_v31  ;;  %v4929_v36 = vsub.s32 7, %v4583_v21  ;;  %v4933_v3 = vrot.slane %v4824_v4, %v4601_v29  ;;  %v4945_v28 = vrot.slane %v4787_v27, %v4592_v25 }
 0x264   :  { %7076 = vst [vmem:[#allocation70_spill] sm:$0xff] %v4919_v18  ;;  %7077 = vst [vmem:[#allocation71_spill] sm:$0xff] %v4922_v20  ;;  %1362 = vmatprep.subr.mxu1 %v1085_v45  ;;  %v924_v21 = vsel %vm914_vm5, %v4709_v52, %v4613_v37  ;;  %v4953_v0 = vrot.slane %v4597_v26, %v4900_v46  ;;  %v4957_v55 = vrot.slane %v4597_v26, %v4922_v20 }
 0x265   :  { %7078 = vst [vmem:[#allocation72_spill] sm:$0xff] %v4929_v36  ;;  %1363 = vmatpush1.msra.mxu1 %v1084_v47  ;;  %v4959_v31 = vpop.permute.xlu1 %1016  ;;  %v4963_v45 = vrot.slane %v4597_v26, %v4929_v36  ;;  %v926_v34 = vsel %vm914_vm5, %v4731_v8, %v4709_v52  ;;  %v937_v25 = vrot.slane %v4726_v13, %v4601_v29 }
 0x266   :  { %v4973_v27 = vrot.slane %v4844_v12, %v4601_v29  ;;  %v4975_v51 = vpop.permute.xlu0 %692  ;;  %1364 = vmatprep.subr.mxu1 %v4388_v16  ;;  %v4980_v47 = vrot.slane %v4597_v26, %v4919_v18  ;;  %v923_v52 = vsel %vm914_vm5, %v4496_v49, %v4539_v63  ;;  %v4988_v8 = vrot.slane %v4638_v50, %v4922_v20 }
 0x267   :  { %v4992_v29 = vrot.slane %v4638_v50, %v4900_v46  ;;  %1365 = vmatpush1.msra.mxu1 %v4358_v6  ;;  %v4997_v16 = vrot.slane %v4638_v50, %v4929_v36  ;;  %v925_v26 = vsel %vm914_vm5, %v4581_v19, %v4496_v49  ;;  %v985_v12 = vmul.f32 %v4851_v60, %v924_v21 }
 0x268   :  { %7079 = vst [vmem:[#allocation73_spill] sm:$0xff] %v4988_v8  ;;  %1366 = vmatprep.subr.mxu1 %v4339_v61  ;;  %v5007_v63 = vrot.slane %v4676_v44, %v4900_v46  ;;  %v5011_v6 = vrot.slane %v4638_v50, %v4919_v18  ;;  %v815_v37 = vsel %vm806_vm6, %v4523_v58, %v4547_v1 }
 0x269   :  { %v927_v61 = vsel %vm914_vm5, %v4510_v56, %v4581_v19  ;;  %v5025_v49 = vsel %vm806_vm6, %v4714_v38, %v4646_v2  ;;  %v984_v21 = vmul.f32 %v945_v22, %v926_v34  ;;  %1367 = vmatpush1.msra.mxu1 %v4314_v54  ;;  %v5028_v50 = vpop.permute.xlu1 %912  ;;  %v5034_v4 = vsel %vm806_vm6, %v4678_v59, %v4714_v38 }
 0x26a   :  { %v929_v19 = vsel %vm914_vm5, %v4769_v35, %v4510_v56  ;;  %v5040_v13 = vpop.permute.xlu0 %583  ;;  %1368 = vmatprep.subr.mxu1 %v985_v12  ;;  %v930_v54 = vsel %vm914_vm5, %v5028_v50, %v4561_v7  ;;  %v977_v34 = vmul.f32 %v4851_v60, %v923_v52  ;;  %v976_v46 = vmul.f32 %v945_v22, %v925_v26 }
 0x26b   :  { %v5051_v38 = vsel %vm806_vm6, %v4567_v10, %v4678_v59  ;;  %v982_v8 = vmul.f32 %v937_v25, %v930_v54  ;;  %1369 = vmatpush1.msra.mxu1 %v984_v21  ;;  %v5055_v56 = vrot.slane %v4676_v44, %v4929_v36  ;;  %v5061_v7 = vsel %vm806_vm6, %v4589_v24, %v4523_v58 }
 0x26c   :  { %1370 = vmatprep.subr.mxu1 %v977_v34  ;;  %v877_v60 = vmul.f32 %v4869_v41, %v5025_v49  ;;  %v975_v12 = vmul.f32 %v4735_v53, %v927_v61  ;;  %v869_v59 = vmul.f32 %v4869_v41, %v815_v37  ;;  %v819_v22 = vsel %vm806_vm6, %v4533_v62, %v4589_v24 }
 0x26d   :  { %v876_v52 = vmul.f32 %v4910_v57, %v5034_v4  ;;  %v974_v26 = vmul.f32 %v937_v25, %v929_v19  ;;  %1371 = vmatpush1.msra.mxu1 %v976_v46  ;;  %1298 = vmatpush1.msra.mxu0 %v982_v8  ;;  %v5073_v58 = vpop.permute.xlu1 %804  ;;  %v5079_v53 = vsel %vm806_vm6, %v4721_v17, %v4533_v62 }
 0x26e   :  { %v5081_v41 = vpop.permute.xlu0 %1014  ;;  %1372 = vmatprep.subr.mxu1 %v877_v60  ;;  %v5087_v24 = vsel %vm806_vm6, %v5073_v58, %v4567_v10  ;;  %1299 = vmatprep.subr.mxu0 %v975_v12  ;;  %v875_v25 = vmul.f32 %v4926_v9, %v5051_v38  ;;  %v868_v46 = vmul.f32 %v4910_v57, %v5061_v7  ;;  %v7081_v60 = vld [vmem:[#allocation44_spill] sm:$0xff] }
 0x26f   :  { %v874_v62 = vmul.f32 %v4933_v3, %v5087_v24  ;;  %1373 = vmatpush1.msra.mxu1 %v876_v52  ;;  %1300 = vmatpush1.msra.mxu0 %v974_v26  ;;  %v5097_v8 = vrot.slane %v4676_v44, %v4922_v20  ;;  %v769_v10 = vmul.f32 %v4883_v48, %v4755_v14  ;;  %v7086_v26 = vld [vmem:[#allocation58_spill] sm:$0xff] }
 0x270   :  { %1374 = vmatprep.subr.mxu1 %v869_v59  ;;  %1301 = vmatprep.subr.mxu0 %v875_v25  ;;  %v867_v61 = vmul.f32 %v4926_v9, %v819_v22  ;;  %v5104_v21 = vrot.slane %v4676_v44, %v4919_v18  ;;  %v768_v57 = vmul.f32 %v4839_v5, %v4610_v32  ;;  %v7082_v59 = vld [vmem:[#allocation31_spill] sm:$0xff] }
 0x271   :  { %v866_v19 = vmul.f32 %v4933_v3, %v5079_v53  ;;  %1375 = vmatpush1.msra.mxu1 %v868_v46  ;;  %1302 = vmatpush1.msra.mxu0 %v874_v62  ;;  %v5110_v54 = vpop.permute.xlu1 %1018  ;;  %v761_v34 = vmul.f32 %v4883_v48, %v4780_v15  ;;  %v5115_v14 = vmul.f32 %v4829_v42, %v815_v37  ;;  %v7080_v3 = vld [vmem:[#allocation22_spill] sm:$0xff]  ;;  %v7083_v37 = vld [vmem:[#allocation32_spill] sm:$0xff]  ;;  %v7084_v48 = vld [vmem:[#allocation53_spill] sm:$0xff] }
 0x272   :  { %v760_v44 = vmul.f32 %v4839_v5, %v4620_v39  ;;  %v697_v9 = vpop.permute.xlu0 %696  ;;  %1376 = vmatprep.subr.mxu1 %v769_v10  ;;  %1303 = vmatprep.subr.mxu0 %v867_v61  ;;  %v767_v32 = vmul.f32 %v4855_v30, %v4633_v43  ;;  %v713_v12 = vsel %vm698_vm2, %v7081_v60, %v7080_v3  ;;  %v7085_v43 = vld [vmem:[#allocation65_spill] sm:$0xff]  ;;  %v7087_v46 = vld [vmem:[#allocation34_spill] sm:$0xff]  ;;  %v7088_v62 = vld [vmem:[#allocation64_spill] sm:$0xff] }
 0x273   :  { %v714_v15 = vsel %vm698_vm2, %v697_v9, %v7082_v59  ;;  %1377 = vmatpush1.msra.mxu1 %v768_v57  ;;  %1304 = vmatpush1.msra.mxu0 %v866_v19  ;;  %v759_v39 = vmul.f32 %v4855_v30, %v7083_v37  ;;  %v661_v52 = vmul.f32 %v7085_v43, %v7084_v48  ;;  %v7089_v61 = vld [vmem:[#allocation33_spill] sm:$0xff]  ;;  %v7090_v19 = vld [vmem:[#allocation67_spill] sm:$0xff]  ;;  %v7092_v3 = vld [vmem:[#allocation68_spill] sm:$0xff] }
 0x274   :  { %v766_v5 = vmul.f32 %v4937_v33, %v714_v15  ;;  %1378 = vmatprep.subr.mxu1 %v761_v34  ;;  %1305 = vmatprep.subr.mxu0 %v767_v32  ;;  %v653_v25 = vmul.f32 %v7085_v43, %v7086_v26  ;;  %v652_v10 = vmul.f32 %v7088_v62, %v7087_v46  ;;  %v7091_v32 = vld [vmem:[#allocation36_spill] sm:$0xff]  ;;  %v7093_v26 = vld [vmem:[#allocation37_spill] sm:$0xff] }
 0x275   :  { %v660_v57 = vmul.f32 %v7088_v62, %v7089_v61  ;;  %v5143_v30 = vsel %vm806_vm6, %v4646_v2, %v7090_v19  ;;  %1379 = vmatpush1.msra.mxu1 %v760_v44  ;;  %v5145_v34 = vpop.permute.xlu1 %1010  ;;  %v651_v59 = vmul.f32 %v7092_v3, %v7091_v32  ;;  %v1259_v37 = vmul.f32 %v4914_v11, %v819_v22  ;;  %v7094_v62 = vld [vmem:[#allocation42_spill] sm:$0xff]  ;;  %v7095_v44 = vld [vmem:[#allocation23_spill] sm:$0xff]  ;;  %v7096_v61 = vld [vmem:[#allocation56_spill] sm:$0xff] }
 0x276   :  { %v758_v48 = vmul.f32 %v4937_v33, %v713_v12  ;;  %v588_v43 = vpop.permute.xlu0 %587  ;;  %1306 = vmatpush1.msra.mxu0 %v766_v5  ;;  %1380 = vmatprep.subr.mxu1 %v661_v52  ;;  %v659_v46 = vmul.f32 %v7092_v3, %v7093_v26  ;;  %v5157_v2 = vsel %vm806_vm6, %v4547_v1, %v7094_v62  ;;  %v7097_v22 = vld [vmem:[#allocation35_spill] sm:$0xff] }
 0x277   :  { %v606_v32 = vsel %vm591_vm3, %v7096_v61, %v7095_v44  ;;  %v607_v33 = vsel %vm591_vm3, %v588_v43, %v7097_v22  ;;  %1307 = vmatprep.subr.mxu0 %v759_v39  ;;  %1381 = vmatpush1.msra.mxu1 %v660_v57  ;;  %v1270_v52 = vmul.f32 %v4941_v40, %v5143_v30  ;;  %v7098_v44 = vld [vmem:[#allocation45_spill] sm:$0xff]  ;;  %v7099_v22 = vld [vmem:[#allocation38_spill] sm:$0xff]  ;;  %v7100_v57 = vld [vmem:[#allocation47_spill] sm:$0xff] }
 0x278   :  { %v658_v5 = vmul.f32 %v4973_v27, %v607_v33  ;;  %1308 = vmatpush1.msra.mxu0 %v758_v48  ;;  %1382 = vmatprep.subr.mxu1 %v653_v25  ;;  %v1260_v1 = vmul.f32 %v4945_v28, %v5061_v7  ;;  %v1267_v3 = vmul.f32 %v4914_v11, %v5051_v38  ;;  %v5211_v48 = vld [vmem:[%s6874_s8] sm:$0xff] }
 0x279   :  { %v1269_v26 = vmul.f32 %v4829_v42, %v5025_v49  ;;  %v5179_v39 = vsel %vm698_vm2, %v7099_v22, %v7098_v44  ;;  %1309 = vmatprep.subr.mxu0 %v659_v46  ;;  %1383 = vmatpush1.msra.mxu1 %v652_v10  ;;  %v689_v25 = vpop.permute.xlu1 %688  ;;  %v5185_v7 = vsel %vm698_vm2, %v7100_v57, %v7081_v60  ;;  %v7101_v46 = vld [vmem:[#allocation69_spill] sm:$0xff] }
 0x27a   :  { %v650_v11 = vmul.f32 %v4973_v27, %v606_v32  ;;  %v5188_v38 = vpop.permute.xlu0 %908  ;;  %1310 = vmatpush1.msra.mxu0 %v658_v5  ;;  %1412 = vmatprep.subr.mxu1 %v1270_v52  ;;  %v1262_v42 = vmul.f32 %v4941_v40, %v5157_v2  ;;  %v5196_v49 = vsel %vm698_vm2, %v7098_v44, %v7100_v57 }
 0x27b   :  { %v5201_v60 = vsel %vm698_vm2, %v4975_v51, %v697_v9  ;;  %1311 = vmatprep.subr.mxu0 %v651_v59  ;;  %1413 = vmatpush2.msra.mxu1 %v1269_v26  ;;  %v1268_v27 = vmul.f32 %v4945_v28, %v5034_v4  ;;  %v1204_v10 = vmul.f32 %v4957_v55, %v5179_v39  ;;  %v7104_v26 = vld [vmem:[#allocation40_spill] sm:$0xff] }
 0x27c   :  { %1312 = vmatpush1.msra.mxu0 %v650_v11  ;;  %1414 = vmatprep.subr.mxu1 %v1262_v42  ;;  %v1215_v40 = vmul.f32 %v4963_v45, %v714_v15  ;;  %v1207_v9 = vmul.f32 %v4963_v45, %v713_v12  ;;  %v1206_v59 = vmul.f32 %v4953_v0, %v5185_v7  ;;  %v7102_v12 = vld [vmem:[#allocation49_spill] sm:$0xff]  ;;  %v7106_v42 = vld [vmem:[#allocation26_spill] sm:$0xff] }
 0x27d   :  { %v5220_v4 = vsel %vm591_vm3, %v7101_v46, %v7096_v61  ;;  %v5225_v28 = vsel %vm698_vm2, %v689_v25, %v4975_v51  ;;  %1341 = vmatprep.subr.mxu0 %v1268_v27  ;;  %1415 = vmatpush2.msra.mxu1 %v5115_v14  ;;  %v580_v15 = vpop.permute.xlu1 %579  ;;  %v1214_v45 = vmul.f32 %v4953_v0, %v5201_v60  ;;  %v7103_v61 = vld [vmem:[#allocation62_spill] sm:$0xff]  ;;  %v7107_v27 = vld [vmem:[#allocation39_spill] sm:$0xff] }
 0x27e   :  { %v5233_v5 = vsel %vm698_vm2, %v7102_v12, %v689_v25  ;;  %v5235_v52 = vpop.permute.xlu0 %900  ;;  %1342 = vmatpush2.msra.mxu0 %v1267_v3  ;;  %1494 = vmatprep.subr.mxu1 %v1215_v40  ;;  %v1205_v51 = vmul.f32 %v4980_v47, %v5196_v49  ;;  %v5243_v14 = vsel %vm591_vm3, %v7104_v26, %v7103_v61  ;;  %v7109_v12 = vld [vmem:[#allocation66_spill] sm:$0xff] }
 0x27f   :  { %v5248_v0 = vsel %vm591_vm3, %v5040_v13, %v588_v43  ;;  %1343 = vmatprep.subr.mxu0 %v1260_v1  ;;  %1417 = vmatmul.mubr.f32.vlgmr.msra.gmra.mxu1 %v5211_v48  ;;  %v1148_v3 = vmul.f32 %v4997_v16, %v606_v32  ;;  %v5256_v44 = vsel %vm591_vm3, %v7103_v61, %v7101_v46  ;;  %v7110_v61 = vld [vmem:[#allocation43_spill] sm:$0xff] }
 0x280   :  { %v1147_v22 = vmul.f32 %v4992_v29, %v5220_v4  ;;  %1495 = vmatpush1.msra.mxu1 %v1214_v45  ;;  %1344 = vmatpush2.msra.mxu0 %v1259_v37  ;;  %v1213_v43 = vmul.f32 %v4980_v47, %v5225_v28  ;;  %v1212_v1 = vmul.f32 %v4957_v55, %v5233_v5  ;;  %v7105_v55 = vld [vmem:[#allocation54_spill] sm:$0xff] }
 0x281   :  { %v5267_v32 = vsel %vm591_vm3, %v580_v15, %v5040_v13  ;;  %1496 = vmatprep.subr.mxu1 %v1207_v9  ;;  %1346 = vmatmul.mubr.f32.vlgmr.msra.gmra.mxu0 %v5211_v48  ;;  %v1156_v25 = vmul.f32 %v4997_v16, %v607_v33  ;;  %v907_v57 = vpop.permute.xlu1 %906  ;;  %v1023_v37 = vsel %vm1022_vm4, %v5081_v41, %v5110_v54 }
 0x282   :  { %v1155_v47 = vmul.f32 %v4992_v29, %v5248_v0  ;;  %v5280_v11 = vsel %vm591_vm3, %v7105_v55, %v580_v15  ;;  %1423 = vmatprep.subr.mxu0 %v1213_v43  ;;  %1497 = vmatpush1.msra.mxu1 %v1206_v59  ;;  %v1021_v13 = vpop.permute.xlu0 %1020  ;;  %v1037_v16 = vsel %vm1022_vm4, %v5110_v54, %v7106_v42  ;;  %v7108_v54 = vld [vmem:[#allocation73_spill] sm:$0xff] }
 0x283   :  { %v1024_v33 = vsel %vm1022_vm4, %v4959_v31, %v1021_v13  ;;  %v1038_v29 = vsel %vm1022_vm4, %v1021_v13, %v7107_v27  ;;  %1424 = vmatpush1.msra.mxu0 %v1212_v1  ;;  %1498 = vmatprep.subr.mxu1 %v1156_v25  ;;  %v1154_v9 = vmul.f32 %v5011_v6, %v5267_v32 }
 0x284   :  { %v1096_v40 = vmul.f32 %v5007_v63, %v1024_v33  ;;  %1425 = vmatprep.subr.mxu0 %v1205_v51  ;;  %1499 = vmatpush1.msra.mxu1 %v1155_v47  ;;  %v1097_v59 = vmul.f32 %v5055_v56, %v1038_v29  ;;  %v1145_v46 = vmul.f32 %v7108_v54, %v5243_v14  ;;  %v7111_v47 = vld [vmem:[#allocation63_spill] sm:$0xff] }
 0x285   :  { %v1153_v15 = vmul.f32 %v7108_v54, %v5280_v11  ;;  %1426 = vmatpush1.msra.mxu0 %v1204_v10  ;;  %1500 = vmatprep.subr.mxu1 %v1148_v3  ;;  %v801_v45 = vpop.permute.xlu1 %800  ;;  %v961_v26 = vrot.slane %v7110_v61, %v7109_v12  ;;  %v1088_v51 = vmul.f32 %v5007_v63, %v1023_v37  ;;  %v7113_v37 = vld [vmem:[#allocation59_spill] sm:$0xff]  ;;  %v7115_v54 = vld [vmem:[#allocation20_spill] sm:$0xff] }
 0x286   :  { %1427 = vmatprep.subr.mxu0 %v1154_v9  ;;  %1501 = vmatpush1.msra.mxu1 %v1147_v22  ;;  %v1013_v43 = vpop.permute.xlu0 %1012  ;;  %v1146_v1 = vmul.f32 %v5011_v6, %v5256_v44  ;;  %v1089_v25 = vmul.f32 %v5055_v56, %v1037_v16  ;;  %v1025_v10 = vsel %vm1022_vm4, %v5145_v34, %v5081_v41  ;;  %v7112_v22 = vld [vmem:[#allocation41_spill] sm:$0xff] }
 0x287   :  { %1502 = vmatprep.subr.mxu1 %v1097_v59  ;;  %v1026_v3 = vsel %vm1022_vm4, %v1013_v43, %v4959_v31  ;;  %v1028_v63 = vsel %vm1022_vm4, %v7111_v47, %v1013_v43  ;;  %1428 = vmatpush1.msra.mxu0 %v1153_v15  ;;  %v1027_v6 = vsel %vm1022_vm4, %v7112_v22, %v5145_v34  ;;  %v7121_v22 = vld [vmem:[#allocation60_spill] sm:$0xff] }
 0x288   :  { %v1094_v56 = vmul.f32 %v5097_v8, %v1028_v63  ;;  %1429 = vmatprep.subr.mxu0 %v1146_v1  ;;  %1503 = vmatpush1.msra.mxu1 %v1096_v40  ;;  %v1095_v41 = vmul.f32 %v5104_v21, %v1026_v3  ;;  %v5324_v55 = vrot.slane %v7113_v37, %v4922_v20  ;;  %v7114_v40 = vld [vmem:[#allocation21_spill] sm:$0xff]  ;;  %v7117_v1 = vld [vmem:[#allocation18_spill] sm:$0xff] }
 0x289   :  { %1430 = vmatpush1.msra.mxu0 %v1145_v46  ;;  %1504 = vmatprep.subr.mxu1 %v1089_v25  ;;  %v905_v31 = vpop.permute.xlu1 %904  ;;  %v965_v13 = vrot.slane %v7110_v61, %v4929_v36  ;;  %v916_v34 = vsel %vm914_vm5, %v5188_v38, %v5028_v50  ;;  %v1087_v33 = vmul.f32 %v5104_v21, %v1025_v10  ;;  %v7118_v25 = vld [vmem:[#allocation25_spill] sm:$0xff] }
 0x28a   :  { %1505 = vmatpush1.msra.mxu1 %v1088_v51  ;;  %v903_v42 = vpop.permute.xlu0 %902  ;;  %1431 = vmatprep.subr.mxu0 %v1095_v41  ;;  %v918_v16 = vsel %vm914_vm5, %v905_v31, %v5188_v38  ;;  %v1086_v27 = vmul.f32 %v5097_v8, %v1027_v6  ;;  %v953_v29 = vrot.slane %v7110_v61, %v4922_v20  ;;  %v7116_v38 = vld [vmem:[#allocation16_spill] sm:$0xff] }
 0x28b   :  { %1506 = vmatprep.subr.mxu1 %v7114_v40  ;;  %1432 = vmatpush1.msra.mxu0 %v1094_v56  ;;  %v857_v50 = vrot.slane %v7113_v37, %v4929_v36  ;;  %v915_v9 = vsel %vm914_vm5, %v907_v57, %v4769_v35  ;;  %v988_v59 = vmul.f32 %v961_v26, %v918_v16  ;;  %v7124_v40 = vld [vmem:[#allocation15_spill] sm:$0xff] }
 0x28c   :  { %1507 = vmatpush1.msra.mxu1 %v7115_v54  ;;  %1433 = vmatprep.subr.mxu0 %v1087_v33  ;;  %v853_v8 = vrot.slane %v7113_v37, %v7109_v12  ;;  %v917_v21 = vsel %vm914_vm5, %v903_v42, %v907_v57  ;;  %v989_v46 = vmul.f32 %v965_v13, %v916_v34  ;;  %v7123_v34 = vld [vmem:[#allocation17_spill] sm:$0xff] }
 0x28d   :  { %1508 = vmatprep.subr.mxu1 %v7116_v38  ;;  %1434 = vmatpush1.msra.mxu0 %v1086_v27  ;;  %v797_v15 = vpop.permute.xlu1 %796  ;;  %v957_v51 = vrot.slane %v7110_v61, %v4919_v18  ;;  %v5356_v35 = vsel %vm806_vm6, %v801_v45, %v5073_v58  ;;  %v920_v43 = vsel %vm914_vm5, %v5235_v52, %v905_v31  ;;  %v7119_v61 = vld [vmem:[#allocation30_spill] sm:$0xff]  ;;  %v7120_v58 = vld [vmem:[#allocation27_spill] sm:$0xff] }
 0x28e   :  { %1509 = vmatpush1.msra.mxu1 %v7117_v1  ;;  %v899_v57 = vpop.permute.xlu0 %898  ;;  %1435 = vmatprep.subr.mxu0 %v7118_v25  ;;  %v5365_v10 = vsel %vm806_vm6, %v797_v15, %v801_v45  ;;  %v922_v3 = vsel %vm914_vm5, %v7119_v61, %v5235_v52  ;;  %v981_v63 = vmul.f32 %v965_v13, %v915_v9  ;;  %v7122_v31 = vld [vmem:[#allocation19_spill] sm:$0xff] }
 0x28f   :  { %1510 = vmatprep.subr.mxu1 %v989_v46  ;;  %v921_v47 = vsel %vm914_vm5, %v7120_v58, %v899_v57  ;;  %v749_v6 = vrot.slane %v7121_v22, %v4929_v36  ;;  %v980_v56 = vmul.f32 %v961_v26, %v917_v21  ;;  %v919_v41 = vsel %vm914_vm5, %v899_v57, %v903_v42  ;;  %v7127_v58 = vld [vmem:[#allocation51_spill] sm:$0xff] }
 0x290   :  { %v880_v45 = vmul.f32 %v853_v8, %v5365_v10  ;;  %1436 = vmatpush1.msra.mxu0 %v7122_v31  ;;  %1511 = vmatpush1.msra.mxu1 %v988_v59  ;;  %v987_v52 = vmul.f32 %v957_v51, %v920_v43  ;;  %v881_v16 = vmul.f32 %v857_v50, %v5356_v35  ;;  %v7130_v31 = vld [vmem:[#allocation57_spill] sm:$0xff] }
 0x291   :  { %1437 = vmatprep.subr.mxu0 %v7123_v34  ;;  %1512 = vmatprep.subr.mxu1 %v981_v63  ;;  %v795_v33 = vpop.permute.xlu1 %794  ;;  %v849_v13 = vrot.slane %v7113_v37, %v4919_v18  ;;  %v986_v27 = vmul.f32 %v953_v29, %v922_v3  ;;  %v978_v26 = vmul.f32 %v953_v29, %v921_v47 }
 0x292   :  { %v5387_v42 = vsel %vm806_vm6, %v7090_v19, %v797_v15  ;;  %1438 = vmatpush1.msra.mxu0 %v7124_v40  ;;  %1513 = vmatpush1.msra.mxu1 %v980_v56  ;;  %v799_v9 = vpop.permute.xlu0 %798  ;;  %v979_v29 = vmul.f32 %v957_v51, %v919_v41  ;;  %v5402_v19 = vsel %vm806_vm6, %v7094_v62, %v795_v33  ;;  %v7125_v15 = vld [vmem:[#allocation24_spill] sm:$0xff]  ;;  %v7126_v62 = vld [vmem:[#allocation61_spill] sm:$0xff] }
 0x293   :  { %v5393_v59 = vsel %vm806_vm6, %v799_v9, %v4721_v17  ;;  %1439 = vmatprep.subr.mxu0 %v987_v52  ;;  %1514 = vmatprep.subr.mxu1 %v881_v16  ;;  %v5397_v37 = vsel %vm806_vm6, %v795_v33, %v799_v9  ;;  %v737_v17 = vrot.slane %v7121_v22, %v4922_v20  ;;  %v7131_v16 = vld [vmem:[#allocation55_spill] sm:$0xff] }
 0x294   :  { %v872_v54 = vmul.f32 %v853_v8, %v5397_v37  ;;  %1440 = vmatpush1.msra.mxu0 %v986_v27  ;;  %1515 = vmatpush1.msra.mxu1 %v880_v45  ;;  %v873_v21 = vmul.f32 %v857_v50, %v5393_v59  ;;  %v745_v38 = vrot.slane %v7121_v22, %v7109_v12 }
 0x295   :  { %1441 = vmatprep.subr.mxu0 %v979_v29  ;;  %v879_v46 = vmul.f32 %v849_v13, %v5387_v42  ;;  %3962 = vmatprep.mubr.msk.f32.mxu0 %vm1277_vm1, %v7125_v15  ;;  %v629_v51 = vrot.slane %v7126_v62, %v4922_v20  ;;  %v878_v8 = vmul.f32 %v5324_v55, %v5143_v30  ;;  %v2417_v15 = vld [vmem:[%s6879_s13] sm:$0xff] }
 0x296   :  { %1442 = vmatpush1.msra.mxu0 %v978_v26  ;;  %1516 = vmatprep.subr.mxu1 %v873_v21  ;;  %v773_v50 = vmul.f32 %v749_v6, %v5201_v60  ;;  %v772_v43 = vmul.f32 %v745_v38, %v5225_v28  ;;  %v871_v1 = vmul.f32 %v849_v13, %v5402_v19  ;;  %v2418_v21 = vld [vmem:[%s6879_s13 + $0x8] sm:$0xff] }
 0x297   :  { %1443 = vmatprep.subr.mxu0 %v879_v46  ;;  %1517 = vmatpush1.msra.mxu1 %v872_v54  ;;  %v741_v57 = vrot.slane %v7121_v22, %v4919_v18  ;;  %v870_v25 = vmul.f32 %v5324_v55, %v5157_v2  ;;  %v765_v30 = vmul.f32 %v749_v6, %v5185_v7  ;;  %v7129_v6 = vld [vmem:[#allocation50_spill] sm:$0xff]  ;;  %v2058_v54 = vld [vmem:[%s6877_s11 + $0x8] sm:$0xff]  ;;  %v2057_v46 = vld [vmem:[%s6877_s11] sm:$0xff] }
 0x298   :  { %1444 = vmatpush1.msra.mxu0 %v878_v8  ;;  %1518 = vmatprep.subr.mxu1 %v773_v50  ;;  %v641_v61 = vrot.slane %v7126_v62, %v4929_v36  ;;  %v764_v60 = vmul.f32 %v745_v38, %v5196_v49  ;;  %v637_v28 = vrot.slane %v7126_v62, %v7109_v12  ;;  %v7128_v49 = vld [vmem:[#allocation52_spill] sm:$0xff]  ;;  %v2446_v38 = vld [vmem:[%s6880_s14 + $0x8] sm:$0xff] }
 0x299   :  { %1445 = vmatprep.subr.mxu0 %v871_v1  ;;  %1519 = vmatpush1.msra.mxu1 %v772_v43  ;;  %v771_v3 = vmul.f32 %v741_v57, %v5233_v5  ;;  %v770_v47 = vmul.f32 %v737_v17, %v7127_v58  ;;  %v633_v7 = vrot.slane %v7126_v62, %v4919_v18  ;;  %v2445_v62 = vld [vmem:[%s6880_s14] sm:$0xff]  ;;  %v7133_v43 = vld [vmem:[#allocation29_spill] sm:$0xff] }
 0x29a   :  { %1446 = vmatpush1.msra.mxu0 %v870_v25  ;;  %1520 = vmatprep.subr.mxu1 %v765_v30  ;;  %v665_v2 = vmul.f32 %v641_v61, %v5248_v0  ;;  %v664_v55 = vmul.f32 %v637_v28, %v5267_v32  ;;  %v1246_v63 = vrot.slane %v7128_v49, %v7109_v12  ;;  %v5543_v30 = vld [vmem:[#allocation2] sm:$0xff] }
 0x29b   :  { %1447 = vmatprep.subr.mxu0 %v771_v3  ;;  %1521 = vmatpush1.msra.mxu1 %v764_v60  ;;  %v763_v22 = vmul.f32 %v741_v57, %v5179_v39  ;;  %v762_v5 = vmul.f32 %v737_v17, %v7129_v6  ;;  %v657_v56 = vmul.f32 %v641_v61, %v5220_v4  ;;  %v2029_v17 = vld [vmem:[%s6876_s10] sm:$0xff] }
 0x29c   :  { %1448 = vmatpush1.msra.mxu0 %v770_v47  ;;  %1522 = vmatprep.subr.mxu1 %v665_v2  ;;  %v1250_v0 = vrot.slane %v7128_v49, %v4929_v36  ;;  %v656_v41 = vmul.f32 %v637_v28, %v5256_v44  ;;  %v663_v32 = vmul.f32 %v633_v7, %v5280_v11  ;;  %v7134_v57 = vld [vmem:[#allocation28_spill] sm:$0xff] }
 0x29d   :  { %1449 = vmatprep.subr.mxu0 %v763_v22  ;;  %1523 = vmatpush1.msra.mxu1 %v664_v55  ;;  %v1242_v45 = vrot.slane %v7128_v49, %v4919_v18  ;;  %v662_v39 = vmul.f32 %v629_v51, %v7130_v31  ;;  %v1238_v34 = vrot.slane %v7128_v49, %v4922_v20  ;;  %v7135_v6 = vld [vmem:[#allocation48_spill] sm:$0xff] }
 0x29e   :  { %1450 = vmatpush1.msra.mxu0 %v762_v5  ;;  %1524 = vmatprep.subr.mxu1 %v657_v56  ;;  %v1274_v4 = vmul.f32 %v1250_v0, %v5087_v24  ;;  %v1273_v52 = vmul.f32 %v1246_v63, %v5356_v35  ;;  %v655_v44 = vmul.f32 %v633_v7, %v5243_v14  ;;  %v7136_v56 = vld [vmem:[#allocation46_spill] sm:$0xff] }
 0x29f   :  { %1451 = vmatprep.subr.mxu0 %v663_v32  ;;  %1525 = vmatpush1.msra.mxu1 %v656_v41  ;;  %v654_v11 = vmul.f32 %v629_v51, %v7131_v16  ;;  %v1266_v33 = vmul.f32 %v1250_v0, %v5079_v53  ;;  %v1265_v13 = vmul.f32 %v1246_v63, %v5393_v59  ;;  %v4009_v53 = vld [vmem:[%s6874_s8 + $0x8] sm:$0xff]  ;;  %v5536_v51 = vld [vmem:[#allocation2 + $0x10] sm:$0xff] }
 0x2a0   :  { %1452 = vmatpush1.msra.mxu0 %v662_v39  ;;  %1554 = vmatprep.subr.mxu1 %v1274_v4  ;;  %v1272_v27 = vmul.f32 %v1242_v45, %v5365_v10  ;;  %v1271_v24 = vmul.f32 %v1238_v34, %v5387_v42  ;;  %v1264_v14 = vmul.f32 %v1242_v45, %v5397_v37  ;;  %v7132_v10 = vmov 0.0  }
 0x2a1   :  { %1453 = vmatprep.subr.mxu0 %v655_v44  ;;  %1555 = vmatpush2.msra.mxu1 %v1273_v52  ;;  %v1263_v35 = vmul.f32 %v1238_v34, %v5402_v19  ;;  %v2030_v19 = vld [vmem:[%s6876_s10 + $0x8] sm:$0xff]  ;;  %v1671_v1 = vrot.slane %v5536_v51, %v7133_v43  ;;  %v1675_v25 = vrot.slane %v5536_v51, %v7134_v57 }
 0x2a2   :  { %1454 = vmatpush1.msra.mxu0 %v654_v11  ;;  %1556 = vmatprep.subr.mxu1 %v1266_v33  ;;  %v1599_v2 = vrot.slane %v5543_v30, %v7134_v57  ;;  %v1683_v5 = vrot.slane %v5536_v51, %v7135_v6  ;;  %v1679_v0 = vrot.slane %v5536_v51, %v7136_v56 }
 0x2a3   :  { %1483 = vmatprep.subr.mxu0 %v1272_v27  ;;  %1557 = vmatpush2.msra.mxu1 %v1265_v13  ;;  %v1595_v44 = vrot.slane %v5543_v30, %v7133_v43  ;;  %v1691_v16 = vrot.slane %v5536_v51, %v4919_v18  ;;  %v1687_v11 = vrot.slane %v5536_v51, %v4922_v20 }
 0x2a4   :  { %1484 = vmatpush2.msra.mxu0 %v1271_v24  ;;  %3963 = vmatprep.mubr.msk.f32.mxu1 %vm1277_vm1, %v4009_v53  ;;  %v1716_v53 = vld [vmem:[#allocation5] sm:$0xff] }
 0x2a5   :  { %1485 = vmatprep.subr.mxu0 %v1264_v14  ;;  %1559 = vmatmul.mubr.f32.vlgmr.msra.gmra.mxu1 %v5211_v48 }
 0x2a6   :  { %1486 = vmatpush2.msra.mxu0 %v1263_v35  ;;  %1856 = vmatprep.mubr.f32.mxu1 %v7132_v10 }
 0x2a7   :  { %1488 = vmatmul.mubr.f32.vlgmr.msra.gmra.mxu0 %v5211_v48 }
 0x2a8   :  { %1785 = vmatprep.mubr.f32.mxu0 %v7132_v10 }
 0x33f   :  { %v5474_v42 = vpop.f32.mrf.mxu1 }
 0x341   :  { %v5468_v26 = vpop.f32.mrf.mxu0  ;;  %v5482_v48 = vpop.f32.mrf.mxu1 }
 0x342   :  { %1640 = vrot.lane.b32.xlu0 %v5468_v26, %s4130_s27  ;;  %1565 = vrot.lane.b32.xlu1 %v5468_v26, %s4131_s12 }
 0x343   :  { %v1349_v40 = vpop.f32.mrf.mxu0 }
 0x346   :  { %1642 = vrot.lane.b32.xlu0 %v1349_v40, %s4130_s27  ;;  %1644 = vrot.lane.b32.xlu1 %v5474_v42, %s4130_s27 }
 0x34a   :  { %1567 = vrot.lane.b32.xlu0 %v1349_v40, %s4131_s12 }
 0x34e   :  { %1569 = vrot.lane.b32.xlu0 %v5474_v42, %s4131_s12 }
 0x352   :  { %1646 = vrot.lane.b32.xlu0 %v5482_v48, %s4130_s27 }
 0x365   :  { %v5494_v37 = vpop.f32.mrf.mxu1 }
 0x367   :  { %v5486_v9 = vpop.f32.mrf.mxu0  ;;  %v5500_v29 = vpop.f32.mrf.mxu1 }
 0x368   :  { %1648 = vrot.lane.b32.xlu1 %v5486_v9, %s4130_s27 }
 0x369   :  { %v5490_v59 = vpop.f32.mrf.mxu0 }
 0x36a   :  { %1650 = vrot.lane.b32.xlu0 %v5490_v59, %s4130_s27 }
 0x36c   :  { %1652 = vrot.lane.b32.xlu1 %v5494_v37, %s4130_s27 }
 0x36e   :  { %1573 = vrot.lane.b32.xlu0 %v5486_v9, %s4131_s12 }
 0x370   :  { %1579 = vrot.lane.b32.xlu1 %v5500_v29, %s4131_s12 }
 0x372   :  { %1654 = vrot.lane.b32.xlu0 %v5500_v29, %s4130_s27 }
 0x374   :  { %1571 = vrot.lane.b32.xlu1 %v5482_v48, %s4131_s12 }
 0x376   :  { %2038 = vperm.xlu0 %4007, %v2030_v19  }
 0x378   :  { %1575 = vrot.lane.b32.xlu1 %v5490_v59, %s4131_s12 }
 0x37a   :  { %2066 = vperm.xlu0 %4007, %v2058_v54  }
 0x37c   :  { %1577 = vrot.lane.b32.xlu1 %v5494_v37, %s4131_s12 }
 0x37e   :  { %2426 = vperm.xlu0 %4007, %v2418_v21   ;;  %v1699_v21 = vrot.slane %v5536_v51, %v4929_v36 }
 0x380   :  { %2033 = vperm.xlu1 %4008, %v2029_v17   ;;  %v1695_v17 = vrot.slane %v5536_v51, %v7109_v12 }
 0x382   :  { %2454 = vperm.xlu0 %4007, %v2446_v38  }
 0x384   :  { %2061 = vperm.xlu1 %4008, %v2057_v46  }
 0x388   :  { %2421 = vperm.xlu1 %4008, %v2417_v15  }
 0x38c   :  { %2449 = vperm.xlu1 %4008, %v2445_v62  }
 0x3b4   :  { %v1641_v8 = vpop.permute.xlu0 %1640  ;;  %v1566_v50 = vpop.permute.xlu1 %1565 }
 0x3b8   :  { %v1643_v61 = vpop.permute.xlu0 %1642  ;;  %v1645_v60 = vpop.permute.xlu1 %1644 }
 0x3b9   :  { %v1663_v28 = vsel %vm1656_vm7, %v1641_v8, %v1643_v61  ;;  %v1662_v3 = vsel %vm1656_vm7, %v1643_v61, %v1645_v60 }
 0x3ba   :  { %v1708_v58 = vmul.f32 %v1671_v1, %v1663_v28  ;;  %v1709_v47 = vmul.f32 %v1675_v25, %v1662_v3 }
 0x3bc   :  { %v1568_v7 = vpop.permute.xlu0 %1567  ;;  %1747 = vmatprep.subr.mxu0 %v1709_v47 }
 0x3bd   :  { %v1588_v55 = vsel %vm1581_vm8, %v1566_v50, %v1568_v7  ;;  %1748 = vmatpush1.msra.mxu0 %v1708_v58  ;;  %v1623_v58 = vrot.slane %v5543_v30, %v4929_v36 }
 0x3be   :  { %1749 = vmatprep.subr.mxu0 %v1349_v40  ;;  %v1633_v49 = vmul.f32 %v1599_v2, %v1588_v55 }
 0x3bf   :  { %1750 = vmatpush1.msra.mxu0 %v5468_v26  ;;  %v1607_v26 = vrot.slane %v5543_v30, %v7135_v6 }
 0x3c0   :  { %1751 = vmatprep.subr.mxu0 %v1633_v49  ;;  %v1570_v63 = vpop.permute.xlu0 %1569 }
 0x3c4   :  { %v1647_v22 = vpop.permute.xlu0 %1646 }
 0x3c5   :  { %v1661_v41 = vsel %vm1656_vm7, %v1645_v60, %v1647_v22 }
 0x3c6   :  { %v1710_v34 = vmul.f32 %v1679_v0, %v1661_v41 }
 0x3da   :  { %v1649_v32 = vpop.permute.xlu1 %1648 }
 0x3db   :  { %v1660_v45 = vsel %vm1656_vm7, %v1647_v22, %v1649_v32  ;;  %v2014_v22 = vld [vmem:[#allocation10 + $0x8] sm:$0xff] }
 0x3dc   :  { %v1651_v31 = vpop.permute.xlu0 %1650  ;;  %v1711_v39 = vmul.f32 %v1683_v5, %v1660_v45  ;;  %v2013_v5 = vld [vmem:[#allocation10] sm:$0xff] }
 0x3dd   :  { %v1659_v27 = vsel %vm1656_vm7, %v1649_v32, %v1651_v31 }
 0x3de   :  { %1818 = vmatprep.subr.mxu1 %v1711_v39  ;;  %v1653_v4 = vpop.permute.xlu1 %1652  ;;  %v1712_v19 = vmul.f32 %v1687_v11, %v1659_v27 }
 0x3df   :  { %1819 = vmatpush1.msra.mxu1 %v1710_v34  ;;  %v1658_v33 = vsel %vm1656_vm7, %v1651_v31, %v1653_v4 }
 0x3e0   :  { %v1574_v52 = vpop.permute.xlu0 %1573  ;;  %1820 = vmatprep.subr.mxu1 %v5482_v48  ;;  %v1713_v40 = vmul.f32 %v1691_v16, %v1658_v33  ;;  %v1587_v48 = vsel %vm1581_vm8, %v1568_v7, %v1570_v63  ;;  %v2016_v16 = vld [vmem:[#allocation10 + $0x18] sm:$0xff] }
 0x3e1   :  { %1821 = vmatpush1.msra.mxu1 %v5474_v42  ;;  %v1603_v42 = vrot.slane %v5543_v30, %v7136_v56 }
 0x3e2   :  { %v1580_v13 = vpop.permute.xlu1 %1579 }
 0x3e3   :  { %v1589_v24 = vsel %vm1581_vm8, %v1580_v13, %v1566_v50  ;;  %v1615_v50 = vrot.slane %v5543_v30, %v4919_v18  ;;  %v1634_v51 = vmul.f32 %v1603_v42, %v1587_v48 }
 0x3e4   :  { %v1632_v14 = vmul.f32 %v1595_v44, %v1589_v24  ;;  %v1655_v35 = vpop.permute.xlu0 %1654 }
 0x3e5   :  { %v1664_v38 = vsel %vm1656_vm7, %v1655_v35, %v1641_v8  ;;  %v1657_v15 = vsel %vm1656_vm7, %v1653_v4, %v1655_v35  ;;  %v1611_v8 = vrot.slane %v5543_v30, %v4922_v20 }
 0x3e6   :  { %1752 = vmatpush1.msra.mxu0 %v1632_v14  ;;  %v1572_v54 = vpop.permute.xlu1 %1571  ;;  %v1715_v61 = vmul.f32 %v1699_v21, %v1664_v38  ;;  %v1714_v60 = vmul.f32 %v1695_v17, %v1657_v15  ;;  %v5642_v21 = vld [vmem:[#allocation7] sm:$0xff]  ;;  %v2017_v15 = vld [vmem:[#allocation10 + $0x20] sm:$0xff] }
 0x3e7   :  { %v1586_v46 = vsel %vm1581_vm8, %v1570_v63, %v1572_v54  ;;  %3964 = vmatmul.mubr.msk.f32.vlgmr.msra.gmra.mxu0 %vm1717_vm9, %v1716_v53  ;;  %1889 = vmatprep.subr.mxu0 %v1713_v40  ;;  %v1585_v1 = vsel %vm1581_vm8, %v1572_v54, %v1574_v52 }
 0x3e8   :  { %1890 = vmatpush1.msra.mxu0 %v1712_v19  ;;  %v1635_v62 = vmul.f32 %v1607_v26, %v1586_v46  ;;  %1927 = vmatprep.mubr.f32.mxu0 %v7132_v10  ;;  %v1636_v47 = vmul.f32 %v1611_v8, %v1585_v1  ;;  %v2018_v19 = vld [vmem:[#allocation10 + $0x28] sm:$0xff] }
 0x3e9   :  { %1891 = vmatprep.subr.mxu0 %v5490_v59  ;;  %v1619_v59 = vrot.slane %v5543_v30, %v7109_v12 }
 0x3ea   :  { %1822 = vmatprep.subr.mxu1 %v1635_v62  ;;  %1892 = vmatpush1.msra.mxu0 %v5486_v9  ;;  %v1576_v25 = vpop.permute.xlu1 %1575 }
 0x3eb   :  { %v1584_v28 = vsel %vm1581_vm8, %v1574_v52, %v1576_v25  ;;  %1823 = vmatpush1.msra.mxu1 %v1634_v51 }
 0x3ec   :  { %3965 = vmatmul.mubr.msk.f32.vlgmr.msra.gmra.mxu1 %vm1717_vm9, %v1716_v53  ;;  %1960 = vmatprep.subr.mxu1 %v1715_v61  ;;  %v1637_v3 = vmul.f32 %v1615_v50, %v1584_v28 }
 0x3ed   :  { %1961 = vmatpush1.msra.mxu1 %v1714_v60  ;;  %1998 = vmatprep.mubr.f32.mxu1 %v7132_v10 }
 0x3ee   :  { %1893 = vmatprep.subr.mxu0 %v1637_v3  ;;  %1962 = vmatprep.subr.mxu1 %v5500_v29  ;;  %v1578_v9 = vpop.permute.xlu1 %1577 }
 0x3ef   :  { %v1582_v2 = vsel %vm1581_vm8, %v1578_v9, %v1580_v13  ;;  %v1583_v7 = vsel %vm1581_vm8, %v1576_v25, %v1578_v9  ;;  %1894 = vmatpush1.msra.mxu0 %v1636_v47  ;;  %1963 = vmatpush1.msra.mxu1 %v5494_v37  ;;  %v2015_v13 = vld [vmem:[#allocation10 + $0x10] sm:$0xff] }
 0x3f0   :  { %v1638_v55 = vmul.f32 %v1619_v59, %v1583_v7  ;;  %3966 = vmatmul.mubr.msk.f32.vlgmr.msra.gmra.mxu0 %vm1717_vm9, %v1716_v53  ;;  %v1639_v30 = vmul.f32 %v1623_v58, %v1582_v2  ;;  %v2102_v59 = vld [vmem:[#allocation7 + $0x8] sm:$0xff]  ;;  %v2020_v2 = vld [vmem:[#allocation10 + $0x38] sm:$0xff] }
 0x3f1   :  { %2173 = vmatprep.mubr.f32.mxu0 %v7132_v10  ;;  %v5623_v49 = vpop.permute.xlu0 %2038 }
 0x3f2   :  { %1964 = vmatprep.subr.mxu1 %v1639_v30 }
 0x3f3   :  { %1965 = vmatpush1.msra.mxu1 %v1638_v55 }
 0x3f4   :  { %3967 = vmatmul.mubr.msk.f32.vlgmr.msra.gmra.mxu1 %vm1717_vm9, %v1716_v53 }
 0x3f5   :  { %2250 = vmatprep.mubr.f32.mxu1 %v7132_v10  ;;  %v5628_v32 = vpop.permute.xlu0 %2066 }
 0x3fb   :  { %v5621_v29 = vpop.permute.xlu1 %2033 }
 0x3fc   :  { %v2042_v31 = vmul.f32 %v5621_v29, %v2014_v22  ;;  %v2041_v34 = vmul.f32 %v5621_v29, %v2013_v5  ;;  %v2044_v53 = vmul.f32 %v5621_v29, %v2016_v16  ;;  %v2043_v48 = vmul.f32 %v5621_v29, %v2015_v13 }
 0x3fd   :  { %v2046_v1 = vmul.f32 %v5621_v29, %v2018_v19  ;;  %v2045_v28 = vmul.f32 %v5621_v29, %v2017_v15 }
 0x3ff   :  { %v5626_v0 = vpop.permute.xlu1 %2061 }
 0x400   :  { %v2070_v44 = vadd.f32 %v5626_v0, %v2042_v31  ;;  %v2069_v11 = vadd.f32 %v5626_v0, %v2041_v34  ;;  %v2072_v38 = vadd.f32 %v5626_v0, %v2044_v53  ;;  %v2071_v50 = vadd.f32 %v5626_v0, %v2043_v48 }
 0x401   :  { %v2074_v47 = vadd.f32 %v5626_v0, %v2046_v1  ;;  %v2073_v30 = vadd.f32 %v5626_v0, %v2045_v28 }
 0x402   :  { %v2086_v42 = vmax.f32 %v2070_v44, 0.0  ;;  %v2085_v54 = vmax.f32 %v2069_v11, 0.0  ;;  %v2088_v3 = vmax.f32 %v2072_v38, 0.0  ;;  %v2087_v55 = vmax.f32 %v2071_v50, 0.0 }
 0x4a7   :  { %v1787_v63 = vpop.f32.mrf.mxu0 }
 0x4a8   :  { %2005 = vst [vmem:[#allocation10 + $0x40] sm:$0xff] %v1787_v63  ;;  %v2049_v37 = vmul.f32 %v5623_v49, %v1787_v63  ;;  %v2019_v63 = vld [vmem:[#allocation10 + $0x30] sm:$0xff] }
 0x4a9   :  { %v1789_v41 = vpop.f32.mrf.mxu0  ;;  %v2047_v34 = vmul.f32 %v5621_v29, %v2019_v63 }
 0x4aa   :  { %2006 = vst [vmem:[#allocation10 + $0x48] sm:$0xff] %v1789_v41  ;;  %v2050_v45 = vmul.f32 %v5623_v49, %v1789_v41  ;;  %v2077_v39 = vadd.f32 %v5628_v32, %v2049_v37  ;;  %v2048_v41 = vmul.f32 %v5621_v29, %v2020_v2 }
 0x4ab   :  { %v2075_v44 = vadd.f32 %v5626_v0, %v2047_v34 }
 0x4ac   :  { %v1858_v4 = vpop.f32.mrf.mxu1  ;;  %v2078_v52 = vadd.f32 %v5628_v32, %v2050_v45  ;;  %v2093_v14 = vmax.f32 %v2077_v39, 0.0  ;;  %v2090_v45 = vmax.f32 %v2074_v47, 0.0 }
 0x4ad   :  { %2007 = vst [vmem:[#allocation10 + $0x50] sm:$0xff] %v1858_v4  ;;  %v2051_v33 = vmul.f32 %v5623_v49, %v1858_v4  ;;  %v2076_v4 = vadd.f32 %v5626_v0, %v2048_v41  ;;  %v2091_v16 = vmax.f32 %v2075_v44, 0.0  ;;  %v5681_v0 = vpop.permute.xlu1 %2421 }
 0x4ae   :  { %v1860_v27 = vpop.f32.mrf.mxu1  ;;  %v2094_v24 = vmax.f32 %v2078_v52, 0.0 }
 0x4af   :  { %2008 = vst [vmem:[#allocation10 + $0x58] sm:$0xff] %v1860_v27  ;;  %v2052_v35 = vmul.f32 %v5623_v49, %v1860_v27  ;;  %v2079_v40 = vadd.f32 %v5628_v32, %v2051_v33  ;;  %v2092_v29 = vmax.f32 %v2076_v4, 0.0 }
 0x4b0   :  { %v1929_v26 = vpop.f32.mrf.mxu0  ;;  %2137 = vmatprep.subr.mxu0 %v2094_v24 }
 0x4b1   :  { %2009 = vst [vmem:[#allocation10 + $0x60] sm:$0xff] %v1929_v26  ;;  %2138 = vmatpush1.msra.mxu0 %v2093_v14  ;;  %v2080_v17 = vadd.f32 %v5628_v32, %v2052_v35  ;;  %v2053_v46 = vmul.f32 %v5623_v49, %v1929_v26  ;;  %v2095_v61 = vmax.f32 %v2079_v40, 0.0  ;;  %v5684_v13 = vpop.permute.xlu1 %2449 }
 0x4b2   :  { %v1931_v62 = vpop.f32.mrf.mxu0  ;;  %2139 = vmatprep.subr.mxu0 %v2086_v42 }
 0x4b3   :  { %2010 = vst [vmem:[#allocation10 + $0x68] sm:$0xff] %v1931_v62  ;;  %2140 = vmatpush1.msra.mxu0 %v2085_v54  ;;  %v2096_v51 = vmax.f32 %v2080_v17, 0.0  ;;  %v2054_v8 = vmul.f32 %v5623_v49, %v1931_v62  ;;  %v2081_v60 = vadd.f32 %v5628_v32, %v2053_v46  ;;  %v5718_v17 = vpop.permute.xlu0 %2426 }
 0x4b4   :  { %v2000_v25 = vpop.f32.mrf.mxu1  ;;  %3968 = vmatmul.mubr.msk.f32.vlgmr.msra.gmra.mxu0 %vm1277_vm1, %v5642_v21 }
 0x4b5   :  { %2011 = vst [vmem:[#allocation10 + $0x70] sm:$0xff] %v2000_v25  ;;  %2214 = vmatprep.subr.mxu1 %v2096_v51  ;;  %2179 = vmatprep.mubr.f32.mxu0 %v7132_v10  ;;  %v2082_v58 = vadd.f32 %v5628_v32, %v2054_v8  ;;  %v2055_v9 = vmul.f32 %v5623_v49, %v2000_v25  ;;  %v2097_v5 = vmax.f32 %v2081_v60, 0.0 }
 0x4b6   :  { %v2002_v7 = vpop.f32.mrf.mxu1  ;;  %2215 = vmatpush1.msra.mxu1 %v2095_v61 }
 0x4b7   :  { %2012 = vst [vmem:[#allocation10 + $0x78] sm:$0xff] %v2002_v7  ;;  %2216 = vmatprep.subr.mxu1 %v2088_v3  ;;  %v2098_v22 = vmax.f32 %v2082_v58, 0.0  ;;  %v2056_v37 = vmul.f32 %v5623_v49, %v2002_v7  ;;  %v2083_v39 = vadd.f32 %v5628_v32, %v2055_v9  ;;  %v2089_v49 = vmax.f32 %v2073_v30, 0.0  ;;  %v5730_v50 = vpop.permute.xlu0 %2454 }
 0x4b8   :  { %3969 = vmatmul.mubr.msk.f32.gmra.mxu0 %vm1277_vm1, %v2102_v59  ;;  %2217 = vmatpush1.msra.mxu1 %v2087_v55 }
 0x4b9   :  { %3970 = vmatmul.mubr.msk.f32.vlgmr.msra.gmra.mxu1 %vm1277_vm1, %v5642_v21  ;;  %2291 = vmatprep.subr.mxu0 %v2098_v22  ;;  %v2084_v31 = vadd.f32 %v5628_v32, %v2056_v37  ;;  %v2099_v32 = vmax.f32 %v2083_v39, 0.0 }
 0x4ba   :  { %2292 = vmatpush1.msra.mxu0 %v2097_v5  ;;  %2256 = vmatprep.mubr.f32.mxu1 %v7132_v10 }
 0x4bb   :  { %2293 = vmatprep.subr.mxu0 %v2090_v45  ;;  %2327 = vmatprep.mubr.f32.mxu0 %v7132_v10  ;;  %v2100_v52 = vmax.f32 %v2084_v31, 0.0 }
 0x4bc   :  { %2294 = vmatpush1.msra.mxu0 %v2089_v49 }
 0x4bd   :  { %3971 = vmatmul.mubr.msk.f32.gmra.mxu1 %vm1277_vm1, %v2102_v59  ;;  %3972 = vmatmul.mubr.msk.f32.vlgmr.msra.gmra.mxu0 %vm1277_vm1, %v5642_v21 }
 0x4be   :  { %2368 = vmatprep.subr.mxu1 %v2100_v52  ;;  %2333 = vmatprep.mubr.f32.mxu0 %v7132_v10 }
 0x4bf   :  { %2369 = vmatpush1.msra.mxu1 %v2099_v32  ;;  %2404 = vmatprep.mubr.f32.mxu1 %v7132_v10 }
 0x4c0   :  { %2370 = vmatprep.subr.mxu1 %v2092_v29 }
 0x4c1   :  { %2371 = vmatpush1.msra.mxu1 %v2091_v16  ;;  %3973 = vmatmul.mubr.msk.f32.gmra.mxu0 %vm1277_vm1, %v2102_v59 }
 0x4c2   :  { %3974 = vmatmul.mubr.msk.f32.vlgmr.msra.gmra.mxu1 %vm1277_vm1, %v5642_v21 }
 0x4c3   :  { %2410 = vmatprep.mubr.f32.mxu1 %v7132_v10 }
 0x4c6   :  { %3975 = vmatmul.mubr.msk.f32.gmra.mxu1 %vm1277_vm1, %v2102_v59 }
 0x574   :  { %v2175_v53 = vpop.f32.mrf.mxu0 }
 0x575   :  { %v2429_v26 = vmul.f32 %v5681_v0, %v2175_v53 }
 0x576   :  { %v2177_v54 = vpop.f32.mrf.mxu0 }
 0x577   :  { %v2457_v40 = vadd.f32 %v5684_v13, %v2429_v26  ;;  %v2430_v21 = vmul.f32 %v5681_v0, %v2177_v54 }
 0x578   :  { %v2181_v28 = vpop.f32.mrf.mxu0 }
 0x579   :  { %v2252_v11 = vpop.f32.mrf.mxu1  ;;  %v5707_v19 = vmax.f32 %v2457_v40, 0.0  ;;  %v2458_v46 = vadd.f32 %v5684_v13, %v2430_v21  ;;  %v2437_v3 = vmul.f32 %v5718_v17, %v2181_v28 }
 0x57a   :  { %v2431_v33 = vmul.f32 %v5681_v0, %v2252_v11  ;;  %v2183_v58 = vpop.f32.mrf.mxu0 }
 0x57b   :  { %v2254_v27 = vpop.f32.mrf.mxu1  ;;  %v5732_v51 = vmax.f32 %v2458_v46, 0.0  ;;  %v2465_v59 = vadd.f32 %v5730_v50, %v2437_v3  ;;  %v2438_v9 = vmul.f32 %v5718_v17, %v2183_v58 }
 0x57c   :  { %v2459_v24 = vadd.f32 %v5684_v13, %v2431_v33  ;;  %v2432_v35 = vmul.f32 %v5681_v0, %v2254_v27 }
 0x57d   :  { %v2258_v38 = vpop.f32.mrf.mxu1  ;;  %v5771_v47 = vmax.f32 %v2465_v59, 0.0  ;;  %v2466_v7 = vadd.f32 %v5730_v50, %v2438_v9  ;;  %v2329_v5 = vpop.f32.mrf.mxu0 }
 0x57e   :  { %v5687_v14 = vmax.f32 %v2459_v24, 0.0  ;;  %v2460_v42 = vadd.f32 %v5684_v13, %v2432_v35  ;;  %v2439_v15 = vmul.f32 %v5718_v17, %v2258_v38  ;;  %v2433_v41 = vmul.f32 %v5681_v0, %v2329_v5 }
 0x57f   :  { %v2260_v62 = vpop.f32.mrf.mxu1  ;;  %v5783_v30 = vmax.f32 %v2466_v7, 0.0  ;;  %v2331_v45 = vpop.f32.mrf.mxu0 }
 0x580   :  { %7137 = vst [vmem:[#allocation22_spill] sm:$0xff] %v5687_v14  ;;  %2815 = vrot.lane.b32.xlu1 %v5687_v14, %s4121_s19  ;;  %2603 = vrot.lane.b32.xlu0 %v5687_v14, %s4126_s5  ;;  %v5701_v48 = vmax.f32 %v2460_v42, 0.0  ;;  %v2467_v8 = vadd.f32 %v5730_v50, %v2439_v15  ;;  %v2440_v1 = vmul.f32 %v5718_v17, %v2260_v62 }
 0x581   :  { %v2461_v39 = vadd.f32 %v5684_v13, %v2433_v41  ;;  %v2335_v49 = vpop.f32.mrf.mxu0  ;;  %v2434_v35 = vmul.f32 %v5681_v0, %v2331_v45 }
 0x582   :  { %7138 = vst [vmem:[#allocation44_spill] sm:$0xff] %v5701_v48  ;;  %v5740_v25 = vmax.f32 %v2467_v8, 0.0  ;;  %v2468_v61 = vadd.f32 %v5730_v50, %v2440_v1  ;;  %v2406_v2 = vpop.f32.mrf.mxu1  ;;  %v2441_v44 = vmul.f32 %v5718_v17, %v2335_v49 }
 0x583   :  { %v5816_v52 = vmax.f32 %v2461_v39, 0.0  ;;  %v2435_v53 = vmul.f32 %v5681_v0, %v2406_v2  ;;  %v2462_v26 = vadd.f32 %v5684_v13, %v2434_v35  ;;  %v2337_v38 = vpop.f32.mrf.mxu0 }
 0x584   :  { %2709 = vrot.lane.b32.xlu1 %v5687_v14, %s4129_s4  ;;  %2497 = vrot.lane.b32.xlu0 %v5687_v14, %s4127_s3  ;;  %7139 = vst [vmem:[#allocation31_spill] sm:$0xff] %v5740_v25  ;;  %v5747_v60 = vmax.f32 %v2468_v61, 0.0  ;;  %v2408_v55 = vpop.f32.mrf.mxu1  ;;  %v2469_v16 = vadd.f32 %v5730_v50, %v2441_v44  ;;  %v2442_v46 = vmul.f32 %v5718_v17, %v2337_v38 }
 0x585   :  { %v2436_v63 = vmul.f32 %v5681_v0, %v2408_v55  ;;  %7142 = vst [vmem:[#allocation65_spill] sm:$0xff] %v5816_v52  ;;  %v2463_v42 = vadd.f32 %v5684_v13, %v2435_v53  ;;  %v5857_v40 = vmax.f32 %v2462_v26, 0.0  ;;  %v5868_v0 = vld [vmem:[%s6881_s15 + $0x8] sm:$0xff] }
 0x586   :  { %7140 = vst [vmem:[#allocation32_spill] sm:$0xff] %v5747_v60  ;;  %v2412_v31 = vpop.f32.mrf.mxu1  ;;  %v5833_v27 = vmax.f32 %v2469_v16, 0.0  ;;  %7148 = vst [vmem:[#allocation36_spill] sm:$0xff] %v5868_v0  ;;  %3983 = vmatprep.mubr.msk.f32.mxu0 %vm1277_vm1, %v5868_v0  ;;  %3984 = vmatprep.mubr.msk.f32.mxu1 %vm1277_vm1, %v5868_v0  ;;  %v2470_v8 = vadd.f32 %v5730_v50, %v2442_v46 }
 0x587   :  { %v2464_v22 = vadd.f32 %v5684_v13, %v2436_v63  ;;  %v2443_v34 = vmul.f32 %v5718_v17, %v2412_v31  ;;  %7146 = vst [vmem:[#allocation33_spill] sm:$0xff] %v5857_v40  ;;  %v5859_v54 = vmax.f32 %v2463_v42, 0.0 }
 0x588   :  { %2607 = vrot.lane.b32.xlu1 %v5701_v48, %s4126_s5  ;;  %2921 = vrot.lane.b32.xlu0 %v5687_v14, %s4128_s24  ;;  %v2414_v4 = vpop.f32.mrf.mxu1  ;;  %7144 = vst [vmem:[#allocation34_spill] sm:$0xff] %v5833_v27 }
 0x589   :  { %v5795_v37 = vmax.f32 %v2464_v22, 0.0  ;;  %v2471_v32 = vadd.f32 %v5730_v50, %v2443_v34  ;;  %v2444_v29 = vmul.f32 %v5718_v17, %v2414_v4  ;;  %7147 = vst [vmem:[#allocation67_spill] sm:$0xff] %v5859_v54  ;;  %v5900_v17 = vmax.f32 %v2470_v8, 0.0 }
 0x58b   :  { %7141 = vst [vmem:[#allocation53_spill] sm:$0xff] %v5795_v37  ;;  %v5826_v11 = vmax.f32 %v2471_v32, 0.0  ;;  %v2472_v33 = vadd.f32 %v5730_v50, %v2444_v29  ;;  %7151 = vst [vmem:[#allocation42_spill] sm:$0xff] %v5900_v17 }
 0x58c   :  { %2501 = vrot.lane.b32.xlu0 %v5701_v48, %s4127_s3  ;;  %2595 = vrot.lane.b32.xlu1 %v5707_v19, %s4126_s5 }
 0x58d   :  { %7143 = vst [vmem:[#allocation58_spill] sm:$0xff] %v5826_v11  ;;  %v5835_v24 = vmax.f32 %v2472_v33, 0.0 }
 0x58f   :  { %7145 = vst [vmem:[#allocation64_spill] sm:$0xff] %v5835_v24 }
 0x590   :  { %2925 = vrot.lane.b32.xlu0 %v5701_v48, %s4128_s24  ;;  %2489 = vrot.lane.b32.xlu1 %v5707_v19, %s4127_s3 }
 0x594   :  { %2819 = vrot.lane.b32.xlu0 %v5701_v48, %s4121_s19  ;;  %2913 = vrot.lane.b32.xlu1 %v5707_v19, %s4128_s24 }
 0x598   :  { %2713 = vrot.lane.b32.xlu0 %v5701_v48, %s4129_s4  ;;  %2807 = vrot.lane.b32.xlu1 %v5707_v19, %s4121_s19  ;;  %v6079_v48 = vld [vmem:[%s7034_s2 + $0x28] sm:$0xff] }
 0x59c   :  { %2811 = vrot.lane.b32.xlu0 %v5732_v51, %s4121_s19  ;;  %2701 = vrot.lane.b32.xlu1 %v5707_v19, %s4129_s4 }
 0x5a0   :  { %2705 = vrot.lane.b32.xlu0 %v5732_v51, %s4129_s4  ;;  %2605 = vrot.lane.b32.xlu1 %v5740_v25, %s4126_s5 }
 0x5a4   :  { %2609 = vrot.lane.b32.xlu0 %v5747_v60, %s4126_s5  ;;  %2499 = vrot.lane.b32.xlu1 %v5740_v25, %s4127_s3 }
 0x5a8   :  { %2503 = vrot.lane.b32.xlu0 %v5747_v60, %s4127_s3  ;;  %2923 = vrot.lane.b32.xlu1 %v5740_v25, %s4128_s24 }
 0x5ac   :  { %2927 = vrot.lane.b32.xlu0 %v5747_v60, %s4128_s24  ;;  %2817 = vrot.lane.b32.xlu1 %v5740_v25, %s4121_s19 }
 0x5b0   :  { %2821 = vrot.lane.b32.xlu0 %v5747_v60, %s4121_s19  ;;  %2711 = vrot.lane.b32.xlu1 %v5740_v25, %s4129_s4 }
 0x5b4   :  { %2715 = vrot.lane.b32.xlu0 %v5747_v60, %s4129_s4  ;;  %2599 = vrot.lane.b32.xlu1 %v5732_v51, %s4126_s5 }
 0x5b8   :  { %2597 = vrot.lane.b32.xlu0 %v5771_v47, %s4126_s5  ;;  %2493 = vrot.lane.b32.xlu1 %v5732_v51, %s4127_s3 }
 0x5bc   :  { %2491 = vrot.lane.b32.xlu0 %v5771_v47, %s4127_s3  ;;  %2917 = vrot.lane.b32.xlu1 %v5732_v51, %s4128_s24 }
 0x5c0   :  { %2915 = vrot.lane.b32.xlu0 %v5771_v47, %s4128_s24  ;;  %2813 = vrot.lane.b32.xlu1 %v5783_v30, %s4121_s19 }
 0x5c4   :  { %2809 = vrot.lane.b32.xlu0 %v5771_v47, %s4121_s19  ;;  %2707 = vrot.lane.b32.xlu1 %v5783_v30, %s4129_s4 }
 0x5c8   :  { %2703 = vrot.lane.b32.xlu0 %v5771_v47, %s4129_s4  ;;  %2835 = vrot.lane.b32.xlu1 %v5795_v37, %s4121_s19 }
 0x5cc   :  { %2601 = vrot.lane.b32.xlu0 %v5783_v30, %s4126_s5  ;;  %2729 = vrot.lane.b32.xlu1 %v5795_v37, %s4129_s4 }
 0x5d0   :  { %2495 = vrot.lane.b32.xlu0 %v5783_v30, %s4127_s3  ;;  %2623 = vrot.lane.b32.xlu1 %v5795_v37, %s4126_s5 }
 0x5d4   :  { %2919 = vrot.lane.b32.xlu0 %v5783_v30, %s4128_s24  ;;  %2517 = vrot.lane.b32.xlu1 %v5795_v37, %s4127_s3 }
 0x5d8   :  { %2611 = vrot.lane.b32.xlu0 %v5816_v52, %s4126_s5  ;;  %2505 = vrot.lane.b32.xlu1 %v5816_v52, %s4127_s3 }
 0x5dc   :  { %2621 = vrot.lane.b32.xlu0 %v5826_v11, %s4126_s5  ;;  %2929 = vrot.lane.b32.xlu1 %v5816_v52, %s4128_s24 }
 0x5e0   :  { %2837 = vrot.lane.b32.xlu0 %v5835_v24, %s4121_s19  ;;  %2613 = vrot.lane.b32.xlu1 %v5833_v27, %s4126_s5 }
 0x5e4   :  { %2731 = vrot.lane.b32.xlu0 %v5835_v24, %s4129_s4  ;;  %2507 = vrot.lane.b32.xlu1 %v5833_v27, %s4127_s3 }
 0x5e8   :  { %2625 = vrot.lane.b32.xlu0 %v5835_v24, %s4126_s5  ;;  %2931 = vrot.lane.b32.xlu1 %v5833_v27, %s4128_s24 }
 0x5ec   :  { %2519 = vrot.lane.b32.xlu0 %v5835_v24, %s4127_s3  ;;  %2717 = vrot.lane.b32.xlu1 %v5816_v52, %s4129_s4 }
 0x5f0   :  { %2615 = vrot.lane.b32.xlu0 %v5857_v40, %s4126_s5  ;;  %2619 = vrot.lane.b32.xlu1 %v5859_v54, %s4126_s5 }
 0x5f2   :  { %v5874_v13 = vpop.permute.xlu1 %2815  ;;  %v5876_v21 = vpop.permute.xlu0 %2603 }
 0x5f3   :  { %7149 = vst [vmem:[#allocation68_spill] sm:$0xff] %v5874_v13 }
 0x5f4   :  { %2509 = vrot.lane.b32.xlu0 %v5857_v40, %s4127_s3  ;;  %2515 = vrot.lane.b32.xlu1 %v5826_v11, %s4127_s3 }
 0x5f6   :  { %v5883_v15 = vpop.permute.xlu1 %2709  ;;  %v5885_v62 = vpop.permute.xlu0 %2497 }
 0x5f7   :  { %7150 = vst [vmem:[#allocation37_spill] sm:$0xff] %v5883_v15 }
 0x5f8   :  { %2933 = vrot.lane.b32.xlu0 %v5857_v40, %s4128_s24  ;;  %2513 = vrot.lane.b32.xlu1 %v5859_v54, %s4127_s3 }
 0x5fa   :  { %v5892_v1 = vpop.permute.xlu1 %2607  ;;  %v5894_v61 = vpop.permute.xlu0 %2921 }
 0x5fc   :  { %2719 = vrot.lane.b32.xlu0 %v5833_v27, %s4129_s4  ;;  %2939 = vrot.lane.b32.xlu1 %v5826_v11, %s4128_s24 }
 0x5fe   :  { %v5902_v28 = vpop.permute.xlu0 %2501  ;;  %v5904_v3 = vpop.permute.xlu1 %2595 }
 0x600   :  { %2943 = vrot.lane.b32.xlu0 %v5835_v24, %s4128_s24  ;;  %2617 = vrot.lane.b32.xlu1 %v5900_v17, %s4126_s5 }
 0x602   :  { %v5910_v50 = vpop.permute.xlu0 %2925  ;;  %v5912_v59 = vpop.permute.xlu1 %2489 }
 0x604   :  { %2825 = vrot.lane.b32.xlu0 %v5833_v27, %s4121_s19  ;;  %2937 = vrot.lane.b32.xlu1 %v5859_v54, %s4128_s24 }
 0x606   :  { %v5918_v58 = vpop.permute.xlu0 %2819  ;;  %v5920_v9 = vpop.permute.xlu1 %2913 }
 0x607   :  { %7152 = vst [vmem:[#allocation23_spill] sm:$0xff] %v5918_v58  ;;  %7153 = vst [vmem:[#allocation56_spill] sm:$0xff] %v5920_v9 }
 0x608   :  { %2511 = vrot.lane.b32.xlu0 %v5900_v17, %s4127_s3  ;;  %2941 = vrot.lane.b32.xlu1 %v5795_v37, %s4128_s24 }
 0x60a   :  { %v5926_v2 = vpop.permute.xlu0 %2713  ;;  %v5928_v7 = vpop.permute.xlu1 %2807 }
 0x60b   :  { %7154 = vst [vmem:[#allocation35_spill] sm:$0xff] %v5926_v2 }
 0x60c   :  { %2935 = vrot.lane.b32.xlu0 %v5900_v17, %s4128_s24  ;;  %2827 = vrot.lane.b32.xlu1 %v5857_v40, %s4121_s19 }
 0x60e   :  { %v2812_v55 = vpop.permute.xlu0 %2811  ;;  %v5934_v63 = vpop.permute.xlu1 %2701 }
 0x60f   :  { %v5939_v22 = vsel %vm914_vm5, %v2812_v55, %v5874_v13  ;;  %v5944_v5 = vsel %vm914_vm5, %v5928_v7, %v2812_v55 }
 0x610   :  { %7155 = vst [vmem:[#allocation45_spill] sm:$0xff] %v5939_v22  ;;  %2823 = vrot.lane.b32.xlu0 %v5816_v52, %s4121_s19  ;;  %2829 = vrot.lane.b32.xlu1 %v5900_v17, %s4121_s19  ;;  %v6044_v22 = vld [vmem:[%s7034_s2 + $0x30] sm:$0xff] }
 0x611   :  { %v3028_v2 = vrot.slane %v6044_v22, %v7134_v57 }
 0x612   :  { %v2706_v41 = vpop.permute.xlu0 %2705  ;;  %v5950_v45 = vpop.permute.xlu1 %2605 }
 0x613   :  { %v5955_v31 = vsel %vm806_vm6, %v2706_v41, %v5883_v15  ;;  %v5960_v39 = vsel %vm806_vm6, %v5934_v63, %v2706_v41 }
 0x614   :  { %7156 = vst [vmem:[#allocation38_spill] sm:$0xff] %v5955_v31  ;;  %2833 = vrot.lane.b32.xlu0 %v5826_v11, %s4121_s19  ;;  %2723 = vrot.lane.b32.xlu1 %v5900_v17, %s4129_s4 }
 0x616   :  { %v5966_v34 = vpop.permute.xlu0 %2609  ;;  %v5968_v49 = vpop.permute.xlu1 %2499 }
 0x618   :  { %2831 = vrot.lane.b32.xlu0 %v5859_v54, %s4121_s19  ;;  %2721 = vrot.lane.b32.xlu1 %v5857_v40, %s4129_s4 }
 0x61a   :  { %v5974_v4 = vpop.permute.xlu0 %2503  ;;  %v5976_v44 = vpop.permute.xlu1 %2923 }
 0x61c   :  { %2727 = vrot.lane.b32.xlu0 %v5826_v11, %s4129_s4  ;;  %2725 = vrot.lane.b32.xlu1 %v5859_v54, %s4129_s4  ;;  %v6011_v11 = vld [vmem:[%s7034_s2 + $0x38] sm:$0xff] }
 0x61d   :  { %v3082_v52 = vrot.slane %v6011_v11, %v7133_v43  ;;  %v3086_v24 = vrot.slane %v6011_v11, %v7134_v57 }
 0x61e   :  { %v5982_v32 = vpop.permute.xlu0 %2927  ;;  %v5984_v29 = vpop.permute.xlu1 %2817 }
 0x61f   :  { %7157 = vst [vmem:[#allocation47_spill] sm:$0xff] %v5984_v29 }
 0x622   :  { %v5986_v16 = vpop.permute.xlu0 %2821  ;;  %v5988_v33 = vpop.permute.xlu1 %2711 }
 0x626   :  { %v5990_v35 = vpop.permute.xlu0 %2715  ;;  %v2600_v53 = vpop.permute.xlu1 %2599 }
 0x627   :  { %7158 = vst [vmem:[#allocation69_spill] sm:$0xff] %v5990_v35  ;;  %v6022_v17 = vsel %vm698_vm2, %v2600_v53, %v5876_v21  ;;  %v6037_v12 = vsel %vm698_vm2, %v5904_v3, %v2600_v53 }
 0x628   :  { %7162 = vst [vmem:[#allocation54_spill] sm:$0xff] %v6022_v17  ;;  %v3120_v15 = vmul.f32 %v3086_v24, %v6022_v17  ;;  %v3119_v35 = vmul.f32 %v3082_v52, %v6037_v12 }
 0x62a   :  { %v5992_v26 = vpop.permute.xlu0 %2597  ;;  %v2494_v42 = vpop.permute.xlu1 %2493 }
 0x62e   :  { %v5994_v38 = vpop.permute.xlu0 %2491  ;;  %v2918_v46 = vpop.permute.xlu1 %2917 }
 0x632   :  { %v5996_v8 = vpop.permute.xlu0 %2915  ;;  %v5998_v55 = vpop.permute.xlu1 %2813 }
 0x633   :  { %7159 = vst [vmem:[#allocation49_spill] sm:$0xff] %v5996_v8 }
 0x636   :  { %v6000_v41 = vpop.permute.xlu0 %2809  ;;  %v6002_v10 = vpop.permute.xlu1 %2707 }
 0x63a   :  { %v6004_v54 = vpop.permute.xlu0 %2703  ;;  %v6006_v37 = vpop.permute.xlu1 %2835 }
 0x63b   :  { %7160 = vst [vmem:[#allocation62_spill] sm:$0xff] %v6006_v37 }
 0x63e   :  { %v2602_v40 = vpop.permute.xlu0 %2601  ;;  %v6017_v27 = vpop.permute.xlu1 %2729 }
 0x63f   :  { %7161 = vst [vmem:[#allocation40_spill] sm:$0xff] %v6017_v27  ;;  %v6027_v18 = vsel %vm698_vm2, %v2602_v40, %v5950_v45  ;;  %v6032_v20 = vsel %vm698_vm2, %v5992_v26, %v2602_v40  ;;  %v3024_v40 = vrot.slane %v6044_v22, %v7133_v43 }
 0x640   :  { %7163 = vst [vmem:[#allocation26_spill] sm:$0xff] %v6027_v18  ;;  %v3127_v36 = vmul.f32 %v3082_v52, %v6032_v20  ;;  %v3128_v0 = vmul.f32 %v3086_v24, %v6027_v18  ;;  %v6057_v18 = vsel %vm591_vm3, %v2494_v42, %v5885_v62  ;;  %v6072_v52 = vsel %vm591_vm3, %v5912_v59, %v2494_v42 }
 0x641   :  { %7164 = vst [vmem:[#allocation39_spill] sm:$0xff] %v6057_v18  ;;  %7166 = vst [vmem:[#allocation43_spill] sm:$0xff] %v6072_v52  ;;  %v2970_v42 = vrot.slane %v6079_v48, %v7134_v57 }
 0x642   :  { %v2496_v14 = vpop.permute.xlu0 %2495  ;;  %3198 = vmatprep.subr.mxu0 %v3128_v0  ;;  %v6051_v53 = vpop.permute.xlu1 %2623 }
 0x643   :  { %v6062_v24 = vsel %vm591_vm3, %v2496_v14, %v5968_v49  ;;  %v6067_v17 = vsel %vm591_vm3, %v5994_v38, %v2496_v14  ;;  %3199 = vmatpush1.msra.mxu0 %v3127_v36  ;;  %v3062_v14 = vmul.f32 %v3028_v2, %v6057_v18  ;;  %v2966_v36 = vrot.slane %v6079_v48, %v7133_v43 }
 0x644   :  { %7165 = vst [vmem:[#allocation73_spill] sm:$0xff] %v6062_v24  ;;  %v3069_v0 = vmul.f32 %v3024_v40, %v6067_v17  ;;  %v3070_v31 = vmul.f32 %v3028_v2, %v6062_v24  ;;  %3200 = vmatprep.subr.mxu0 %v3120_v15  ;;  %v3061_v15 = vmul.f32 %v3024_v40, %v6072_v52 }
 0x645   :  { %3201 = vmatpush1.msra.mxu0 %v3119_v35  ;;  %v2955_v24 = vsel %vm1022_vm4, %v2918_v46, %v5894_v61 }
 0x646   :  { %v2920_v25 = vpop.permute.xlu0 %2919  ;;  %3202 = vmatprep.subr.mxu0 %v3070_v31  ;;  %v6086_v13 = vpop.permute.xlu1 %2517  ;;  %v2957_v31 = vsel %vm1022_vm4, %v5920_v9, %v2918_v46  ;;  %v3004_v40 = vmul.f32 %v2970_v42, %v2955_v24  ;;  %v2852_v46 = vsel %vm914_vm5, %v6000_v41, %v5998_v55 }
 0x647   :  { %v2956_v2 = vsel %vm1022_vm4, %v2920_v25, %v5976_v44  ;;  %v2958_v35 = vsel %vm1022_vm4, %v5996_v8, %v2920_v25  ;;  %3203 = vmatpush1.msra.mxu0 %v3069_v0  ;;  %v3003_v29 = vmul.f32 %v2966_v36, %v2957_v31  ;;  %v6108_v25 = vld [vmem:[%s7034_s2 + $0x18] sm:$0xff]  ;;  %v6125_v0 = vld [vmem:[%s7034_s2 + $0x8] sm:$0xff]  ;;  %v3094_v31 = vrot.slane %v6011_v11, %v7135_v6 }
 0x648   :  { %v3011_v18 = vmul.f32 %v2966_v36, %v2958_v35  ;;  %v3012_v58 = vmul.f32 %v2970_v42, %v2956_v2  ;;  %3204 = vmatprep.subr.mxu0 %v3062_v14  ;;  %v2864_v24 = vrot.slane %v6108_v25, %v7134_v57  ;;  %7168 = vst [vmem:[#allocation41_spill] sm:$0xff] %v6125_v0  ;;  %v6134_v36 = vld [vmem:[%s7034_s2 + $0x10] sm:$0xff] }
 0x649   :  { %3205 = vmatpush1.msra.mxu0 %v3061_v15  ;;  %v3090_v14 = vrot.slane %v6011_v11, %v7136_v56  ;;  %v2758_v42 = vrot.slane %v6134_v36, %v7134_v57  ;;  %v6145_v15 = vrot.slane %v6125_v0, %v7134_v57  ;;  %v2860_v2 = vrot.slane %v6108_v25, %v7133_v43 }
 0x64a   :  { %v6101_v60 = vpop.permute.xlu0 %2611  ;;  %3206 = vmatprep.subr.mxu0 %v3012_v58  ;;  %v6103_v52 = vpop.permute.xlu1 %2505  ;;  %v2754_v35 = vrot.slane %v6134_v36, %v7133_v43 }
 0x64b   :  { %3207 = vmatpush1.msra.mxu0 %v3011_v18 }
 0x64c   :  { %3208 = vmatprep.subr.mxu0 %v3004_v40  ;;  %v3036_v40 = vrot.slane %v6044_v22, %v7135_v6 }
 0x64d   :  { %3209 = vmatpush1.msra.mxu0 %v3003_v29  ;;  %v3032_v29 = vrot.slane %v6044_v22, %v7136_v56 }
 0x64e   :  { %v6116_v58 = vpop.permute.xlu0 %2621  ;;  %3210 = vmatprep.subr.mxu0 %v5783_v30  ;;  %v6119_v18 = vpop.permute.xlu1 %2929  ;;  %v2906_v30 = vmul.f32 %v2864_v24, %v2852_v46 }
 0x64f   :  { %7167 = vst [vmem:[#allocation63_spill] sm:$0xff] %v6116_v58  ;;  %3211 = vmatpush1.msra.mxu0 %v5771_v47  ;;  %v6139_v47 = vrot.slane %v6079_v48, %v7136_v56  ;;  %v6190_v58 = vsel %vm698_vm2, %v5876_v21, %v5892_v1 }
 0x650   :  { %3212 = vmatprep.subr.mxu0 %v5732_v51  ;;  %v6154_v51 = vsel %vm698_vm2, %v5950_v45, %v5966_v34  ;;  %v2853_v45 = vsel %vm914_vm5, %v6006_v37, %v5928_v7  ;;  %v6196_v7 = vsel %vm698_vm2, %v5892_v1, %v6101_v60 }
 0x651   :  { %3213 = vmatpush1.msra.mxu0 %v5707_v19  ;;  %v6170_v19 = vsel %vm806_vm6, %v6004_v54, %v6002_v10  ;;  %7172 = vst [vmem:[#allocation16_spill] sm:$0xff] %v6196_v7  ;;  %v3129_v21 = vmul.f32 %v3090_v14, %v6154_v51 }
 0x652   :  { %v6162_v46 = vpop.permute.xlu0 %2837  ;;  %3214 = vmatprep.subr.mxu0 %v2906_v30  ;;  %v6164_v9 = vpop.permute.xlu1 %2613  ;;  %v2800_v1 = vmul.f32 %v2758_v42, %v6170_v19 }
 0x653   :  { %7169 = vst [vmem:[#allocation59_spill] sm:$0xff] %v6162_v46  ;;  %7170 = vst [vmem:[#allocation21_spill] sm:$0xff] %v6164_v9  ;;  %v2854_v8 = vsel %vm914_vm5, %v6162_v46, %v6000_v41  ;;  %v6184_v30 = vsel %vm698_vm2, %v5966_v34, %v6164_v9  ;;  %v6203_v34 = vsel %vm591_vm3, %v5885_v62, %v5902_v28 }
 0x654   :  { %7171 = vst [vmem:[#allocation20_spill] sm:$0xff] %v6184_v30  ;;  %v2905_v37 = vmul.f32 %v2860_v2, %v2854_v8  ;;  %v3130_v41 = vmul.f32 %v3094_v31, %v6184_v30  ;;  %v2898_v46 = vmul.f32 %v2864_v24, %v5944_v5  ;;  %v6211_v9 = vsel %vm591_vm3, %v5968_v49, %v5974_v4 }
 0x655   :  { %v2897_v8 = vmul.f32 %v2860_v2, %v2853_v45  ;;  %v6218_v30 = vsel %vm806_vm6, %v6017_v27, %v5934_v63  ;;  %v3122_v24 = vmul.f32 %v3094_v31, %v6196_v7  ;;  %v6242_v2 = vsel %vm591_vm3, %v5902_v28, %v6103_v52  ;;  %v7201_v7 = vld [vmem:[#allocation70_spill] sm:$0xff] }
 0x656   :  { %7173 = vst [vmem:[#allocation18_spill] sm:$0xff] %v6218_v30  ;;  %v6220_v62 = vpop.permute.xlu0 %2731  ;;  %3215 = vmatpush1.msra.mxu0 %v2905_v37  ;;  %3269 = vmatprep.subr.mxu1 %v3130_v41  ;;  %v6222_v5 = vpop.permute.xlu1 %2507  ;;  %v3121_v37 = vmul.f32 %v3090_v14, %v6190_v58  ;;  %7177 = vst [vmem:[#allocation60_spill] sm:$0xff] %v6242_v2  ;;  %v2792_v45 = vmul.f32 %v2758_v42, %v5960_v39 }
 0x657   :  { %7174 = vst [vmem:[#allocation25_spill] sm:$0xff] %v6220_v62  ;;  %v6229_v49 = vsel %vm806_vm6, %v6220_v62, %v6004_v54  ;;  %v6235_v63 = vsel %vm591_vm3, %v5974_v4, %v6222_v5  ;;  %3216 = vmatprep.subr.mxu0 %v2898_v46  ;;  %3270 = vmatpush1.msra.mxu1 %v3129_v21 }
 0x658   :  { %7175 = vst [vmem:[#allocation30_spill] sm:$0xff] %v6229_v49  ;;  %7176 = vst [vmem:[#allocation27_spill] sm:$0xff] %v6235_v63  ;;  %v2799_v31 = vmul.f32 %v2754_v35, %v6229_v49  ;;  %v3072_v54 = vmul.f32 %v3036_v40, %v6235_v63  ;;  %3217 = vmatpush1.msra.mxu0 %v2897_v8  ;;  %v2648_v4 = vrot.slane %v6125_v0, %v7133_v43 }
 0x659   :  { %v2978_v46 = vrot.slane %v6079_v48, %v7135_v6  ;;  %3271 = vmatprep.subr.mxu1 %v3122_v24  ;;  %3218 = vmatprep.subr.mxu0 %v2800_v1  ;;  %v3063_v14 = vmul.f32 %v3032_v29, %v6203_v34  ;;  %v3071_v28 = vmul.f32 %v3032_v29, %v6211_v9 }
 0x65a   :  { %v2791_v41 = vmul.f32 %v2754_v35, %v6218_v30  ;;  %3272 = vmatpush1.msra.mxu1 %v3121_v37  ;;  %v6254_v21 = vpop.permute.xlu0 %2625  ;;  %3219 = vmatpush1.msra.mxu0 %v2799_v31  ;;  %v6256_v8 = vpop.permute.xlu1 %2931  ;;  %v3064_v42 = vmul.f32 %v3036_v40, %v6242_v2  ;;  %v6272_v35 = vld [vmem:[%s7034_s2] sm:$0xff]  ;;  %v2954_v40 = vsel %vm1022_vm4, %v5976_v44, %v5982_v32  ;;  %v7197_v30 = vld [vmem:[#allocation66_spill] sm:$0xff]  ;;  %v7206_v62 = vld [vmem:[#allocation21_spill] sm:$0xff] }
 0x65b   :  { %v6263_v24 = vsel %vm698_vm2, %v6254_v21, %v5992_v26  ;;  %3273 = vmatprep.subr.mxu1 %v3072_v54  ;;  %v2952_v29 = vsel %vm1022_vm4, %v5982_v32, %v6256_v8  ;;  %3220 = vmatprep.subr.mxu0 %v2792_v45  ;;  %7178 = vst [vmem:[#allocation19_spill] sm:$0xff] %v6272_v35  ;;  %v7198_v2 = vld [vmem:[#allocation54_spill] sm:$0xff] }
 0x65c   :  { %v2694_v26 = vmul.f32 %v6145_v15, %v6032_v20  ;;  %v6284_v1 = vsel %vm698_vm2, %v6051_v53, %v5904_v3  ;;  %v2693_v37 = vmul.f32 %v2648_v4, %v6263_v24  ;;  %3274 = vmatpush1.msra.mxu1 %v3071_v28  ;;  %v2546_v31 = vrot.slane %v6272_v35, %v7134_v57 }
 0x65d   :  { %v2951_v44 = vsel %vm1022_vm4, %v5910_v50, %v6119_v18  ;;  %v3014_v32 = vmul.f32 %v2978_v46, %v2952_v29  ;;  %3221 = vmatpush1.msra.mxu0 %v2791_v41  ;;  %3275 = vmatprep.subr.mxu1 %v3064_v42  ;;  %v2953_v20 = vsel %vm1022_vm4, %v5894_v61, %v5910_v50  ;;  %v7181_v29 = vld [vmem:[#allocation47_spill] sm:$0xff] }
 0x65e   :  { %v2686_v3 = vmul.f32 %v6145_v15, %v6037_v12  ;;  %v2542_v54 = vrot.slane %v6272_v35, %v7133_v43  ;;  %3222 = vmatprep.subr.mxu0 %v2694_v26  ;;  %3276 = vmatpush1.msra.mxu1 %v3063_v14  ;;  %v6301_v45 = vpop.permute.xlu0 %2519  ;;  %v6303_v28 = vpop.permute.xlu1 %2717  ;;  %v3013_v41 = vmul.f32 %v6139_v47, %v2954_v40  ;;  %v7182_v26 = vld [vmem:[#allocation43_spill] sm:$0xff] }
 0x65f   :  { %7179 = vst [vmem:[#allocation17_spill] sm:$0xff] %v6303_v28  ;;  %v2685_v42 = vmul.f32 %v2648_v4, %v6284_v1  ;;  %v6311_v61 = vsel %vm591_vm3, %v6301_v45, %v5994_v38  ;;  %3223 = vmatpush1.msra.mxu0 %v2693_v37  ;;  %3277 = vmatprep.subr.mxu1 %v3014_v32  ;;  %v6325_v38 = vld [vmem:[%s7034_s2 + $0x40] sm:$0xff] }
 0x660   :  { %v2588_v12 = vmul.f32 %v2546_v31, %v6067_v17  ;;  %v3006_v50 = vmul.f32 %v2978_v46, %v2951_v44  ;;  %v2587_v15 = vmul.f32 %v2542_v54, %v6311_v61  ;;  %3224 = vmatprep.subr.mxu0 %v2686_v3  ;;  %v3005_v14 = vmul.f32 %v6139_v47, %v2953_v20  ;;  %v7183_v3 = vld [vmem:[#allocation32_spill] sm:$0xff] }
 0x661   :  { %v6320_v4 = vsel %vm591_vm3, %v6086_v13, %v5912_v59  ;;  %3278 = vmatpush1.msra.mxu1 %v3013_v41  ;;  %3225 = vmatpush1.msra.mxu0 %v2685_v42  ;;  %7180 = vst [vmem:[#allocation15_spill] sm:$0xff] %v6325_v38  ;;  %v2744_v17 = vsel %vm806_vm6, %v6002_v10, %v5988_v33  ;;  %v7184_v41 = vld [vmem:[#allocation23_spill] sm:$0xff]  ;;  %v7185_v42 = vld [vmem:[#allocation68_spill] sm:$0xff] }
 0x662   :  { %3279 = vmatprep.subr.mxu1 %v3006_v50  ;;  %3226 = vmatprep.subr.mxu0 %v2588_v12  ;;  %v6331_v47 = vpop.permute.xlu0 %2615  ;;  %v6333_v46 = vpop.permute.xlu1 %2619  ;;  %v3144_v59 = vrot.slane %v6325_v38, %v7134_v57  ;;  %v2848_v40 = vsel %vm914_vm5, %v7181_v29, %v5986_v16  ;;  %v2580_v37 = vmul.f32 %v2546_v31, %v7182_v26 }
 0x663   :  { %3280 = vmatpush1.msra.mxu1 %v3005_v14  ;;  %3227 = vmatpush1.msra.mxu0 %v2587_v15  ;;  %v2872_v10 = vrot.slane %v6108_v25, %v7135_v6  ;;  %v3140_v44 = vrot.slane %v6325_v38, %v7133_v43  ;;  %v2850_v32 = vsel %vm914_vm5, %v5998_v55, %v7181_v29  ;;  %v7186_v15 = vld [vmem:[#allocation31_spill] sm:$0xff]  ;;  %v7187_v55 = vld [vmem:[#allocation44_spill] sm:$0xff] }
 0x664   :  { %v2579_v20 = vmul.f32 %v2542_v54, %v6320_v4  ;;  %3281 = vmatprep.subr.mxu1 %v7183_v3  ;;  %v2847_v31 = vsel %vm914_vm5, %v7185_v42, %v7184_v41  ;;  %v2868_v12 = vrot.slane %v6108_v25, %v7136_v56  ;;  %v3186_v50 = vmul.f32 %v3144_v59, %v2744_v17  ;;  %v7188_v3 = vld [vmem:[#allocation38_spill] sm:$0xff]  ;;  %v7189_v42 = vld [vmem:[#allocation69_spill] sm:$0xff] }
 0x665   :  { %3228 = vmatprep.subr.mxu0 %v2580_v37  ;;  %3282 = vmatpush1.msra.mxu1 %v7186_v15  ;;  %v2908_v14 = vmul.f32 %v2872_v10, %v2848_v40  ;;  %v3185_v26 = vmul.f32 %v3140_v44, %v6170_v19  ;;  %v3178_v57 = vmul.f32 %v3144_v59, %v7188_v3  ;;  %v7190_v40 = vld [vmem:[#allocation22_spill] sm:$0xff]  ;;  %v6379_v59 = vld [vmem:[%s6881_s15] sm:$0xff]  ;;  %s4132_s15 = smov [#allocation10]  }
 0x666   :  { %3229 = vmatpush1.msra.mxu0 %v2579_v20  ;;  %3283 = vmatprep.subr.mxu1 %v7187_v55  ;;  %v6361_v54 = vpop.permute.xlu0 %2509  ;;  %v6363_v29 = vpop.permute.xlu1 %2515  ;;  %v6370_v43 = vsel %vm806_vm6, %v5988_v33, %v7189_v42  ;;  %v2907_v37 = vmul.f32 %v2868_v12, %v2850_v32  ;;  %v2900_v19 = vmul.f32 %v2872_v10, %v2847_v31  ;;  %v7191_v55 = vld [vmem:[#allocation35_spill] sm:$0xff]  ;;  %v7192_v33 = vld [vmem:[#allocation37_spill] sm:$0xff] }
 0x667   :  { %3258 = vmatprep.subr.mxu0 %v3186_v50  ;;  %3284 = vmatpush1.msra.mxu1 %v7190_v40  ;;  %v2766_v20 = vrot.slane %v6134_v36, %v7135_v6  ;;  %v3177_v15 = vmul.f32 %v3140_v44, %v5960_v39  ;;  %v6385_v32 = vsel %vm806_vm6, %v7192_v33, %v7191_v55  ;;  %v7193_v50 = vld [vmem:[#allocation45_spill] sm:$0xff] }
 0x668   :  { %3259 = vmatpush2.msra.mxu0 %v3185_v26  ;;  %3285 = vmatprep.subr.mxu1 %v2908_v14  ;;  %v2899_v10 = vmul.f32 %v2868_v12, %v7193_v50  ;;  %v2762_v31 = vrot.slane %v6134_v36, %v7136_v56  ;;  %v2660_v12 = vrot.slane %v6125_v0, %v7135_v6 }
 0x669   :  { %3260 = vmatprep.subr.mxu0 %v3178_v57  ;;  %3286 = vmatpush1.msra.mxu1 %v2907_v37  ;;  %v2802_v39 = vmul.f32 %v2766_v20, %v6370_v43  ;;  %v2794_v40 = vmul.f32 %v2766_v20, %v6385_v32  ;;  %v2656_v37 = vrot.slane %v6125_v0, %v7136_v56 }
 0x66a   :  { %3261 = vmatpush2.msra.mxu0 %v3177_v15  ;;  %3287 = vmatprep.subr.mxu1 %v2900_v19  ;;  %v6391_v44 = vpop.permute.xlu0 %2933  ;;  %v6393_v14 = vpop.permute.xlu1 %2513  ;;  %v2801_v26 = vmul.f32 %v2762_v31, %v2744_v17  ;;  %v2793_v57 = vmul.f32 %v2762_v31, %v7188_v3  ;;  %v7194_v19 = vld [vmem:[#allocation36_spill] sm:$0xff]  ;;  %v2696_v17 = vmul.f32 %v2660_v12, %v6154_v51 }
 0x66b   :  { %3288 = vmatpush1.msra.mxu1 %v2899_v10  ;;  %3263 = vmatmul.mubr.f32.vlgmr.msra.gmra.mxu0 %v6379_v59  ;;  %v2554_v20 = vrot.slane %v6272_v35, %v7135_v6  ;;  %v3148_v3 = vrot.slane %v6325_v38, %v7136_v56  ;;  %v2550_v50 = vrot.slane %v6272_v35, %v7136_v56  ;;  %v7195_v10 = vld [vmem:[#allocation26_spill] sm:$0xff]  ;;  %v7196_v51 = vld [vmem:[#allocation72_spill] sm:$0xff]  ;;  %v7199_v56 = vld [vmem:[#allocation71_spill] sm:$0xff] }
 0x66c   :  { %3289 = vmatprep.subr.mxu1 %v2802_v39  ;;  %3985 = vmatprep.mubr.msk.f32.mxu0 %vm1277_vm1, %v7194_v19  ;;  %v2695_v31 = vmul.f32 %v2656_v37, %v7195_v10  ;;  %v2688_v39 = vmul.f32 %v2660_v12, %v6190_v58  ;;  %v6425_v49 = vrot.slane %v6011_v11, %v7197_v30 }
 0x66d   :  { %3290 = vmatpush1.msra.mxu1 %v2801_v26  ;;  %v3110_v26 = vrot.slane %v6011_v11, %v7196_v51  ;;  %v2687_v63 = vmul.f32 %v2656_v37, %v7198_v2  ;;  %v6430_v10 = vrot.slane %v6134_v36, %v7199_v56  ;;  %v3152_v58 = vrot.slane %v6325_v38, %v7135_v6  ;;  %v7202_v38 = vld [vmem:[#allocation73_spill] sm:$0xff] }
 0x66e   :  { %3291 = vmatprep.subr.mxu1 %v2794_v40  ;;  %v6405_v15 = vpop.permute.xlu0 %2719  ;;  %v6407_v33 = vpop.permute.xlu1 %2939  ;;  %v6421_v40 = vrot.slane %v6044_v22, %v7196_v51  ;;  %v3098_v12 = vrot.slane %v6011_v11, %v7199_v56  ;;  %v3102_v35 = vrot.slane %v6011_v11, %v7201_v7  ;;  %v6443_v2 = vrot.slane %v6044_v22, %v7197_v30  ;;  %v7204_v11 = vld [vmem:[#allocation63_spill] sm:$0xff] }
 0x66f   :  { %3292 = vmatpush1.msra.mxu1 %v2793_v57  ;;  %7200 = vst [vmem:[#allocation24_spill] sm:$0xff] %v6430_v10  ;;  %v2590_v57 = vmul.f32 %v2554_v20, %v6211_v9  ;;  %v2589_v27 = vmul.f32 %v2550_v50, %v7202_v38  ;;  %v6452_v9 = vsel %vm806_vm6, %v7189_v42, %v6405_v15  ;;  %v7208_v38 = vld [vmem:[#allocation39_spill] sm:$0xff] }
 0x670   :  { %3293 = vmatprep.subr.mxu1 %v2696_v17  ;;  %v3040_v17 = vrot.slane %v6044_v22, %v7199_v56  ;;  %7203 = vst [vmem:[#allocation61_spill] sm:$0xff] %v6452_v9  ;;  %v2582_v0 = vmul.f32 %v2554_v20, %v6203_v34  ;;  %v2581_v10 = vmul.f32 %v2550_v50, %v7208_v38 }
 0x671   :  { %3294 = vmatpush1.msra.mxu1 %v2695_v31  ;;  %v6470_v42 = vsel %vm698_vm2, %v6331_v47, %v6333_v46  ;;  %v6486_v34 = vsel %vm698_vm2, %v6101_v60, %v6331_v47  ;;  %v3044_v50 = vrot.slane %v6044_v22, %v7201_v7  ;;  %v6499_v38 = vrot.slane %v6079_v48, %v7196_v51 }
 0x672   :  { %3295 = vmatprep.subr.mxu1 %v2688_v39  ;;  %v6445_v37 = vpop.permute.xlu0 %2943  ;;  %v2618_v6 = vpop.permute.xlu1 %2617  ;;  %v6509_v22 = vrot.slane %v6108_v25, %v7199_v56 }
 0x673   :  { %3296 = vmatpush1.msra.mxu1 %v2687_v63  ;;  %v6457_v31 = vsel %vm698_vm2, %v2618_v6, %v7204_v11  ;;  %v6462_v39 = vsel %vm698_vm2, %v7206_v62, %v2618_v6  ;;  %v6474_v63 = vrot.slane %v6079_v48, %v7199_v56  ;;  %v6480_v6 = vsel %vm806_vm6, %v7191_v55, %v6303_v28 }
 0x674   :  { %7205 = vst [vmem:[#allocation51_spill] sm:$0xff] %v6457_v31  ;;  %7207 = vst [vmem:[#allocation52_spill] sm:$0xff] %v6462_v39  ;;  %3297 = vmatprep.subr.mxu1 %v2590_v57  ;;  %v3131_v62 = vmul.f32 %v3098_v12, %v6462_v39  ;;  %v3132_v20 = vmul.f32 %v3102_v35, %v6457_v31  ;;  %v3188_v57 = vmul.f32 %v3152_v58, %v6452_v9 }
 0x675   :  { %3298 = vmatpush1.msra.mxu1 %v2589_v27  ;;  %v6495_v55 = vrot.slane %v6079_v48, %v7197_v30  ;;  %v3187_v27 = vmul.f32 %v3148_v3, %v6370_v43  ;;  %v3124_v31 = vmul.f32 %v3102_v35, %v6470_v42  ;;  %v3180_v39 = vmul.f32 %v3152_v58, %v6480_v6 }
 0x676   :  { %3299 = vmatprep.subr.mxu1 %v2582_v0  ;;  %v6501_v60 = vpop.permute.xlu0 %2825  ;;  %v6503_v47 = vpop.permute.xlu1 %2937  ;;  %3340 = vmatprep.subr.mxu0 %v3132_v20  ;;  %v3123_v9 = vmul.f32 %v3098_v12, %v6486_v34  ;;  %v2986_v0 = vrot.slane %v6079_v48, %v7201_v7  ;;  %v3179_v28 = vmul.f32 %v3148_v3, %v6385_v32 }
 0x677   :  { %3300 = vmatpush1.msra.mxu1 %v2581_v10  ;;  %3341 = vmatpush1.msra.mxu0 %v3131_v62  ;;  %v3126_v43 = vmul.f32 %v3110_v26, %v6284_v1  ;;  %v6521_v35 = vsel %vm698_vm2, %v7204_v11, %v6254_v21  ;;  %v6527_v10 = vsel %vm698_vm2, %v6333_v46, %v6051_v53 }
 0x678   :  { %3329 = vmatprep.subr.mxu1 %v3188_v57  ;;  %3342 = vmatprep.subr.mxu0 %v3124_v31  ;;  %v6533_v48 = vsel %vm591_vm3, %v6103_v52, %v6361_v54  ;;  %v6539_v21 = vsel %vm591_vm3, %v6363_v29, %v6301_v45  ;;  %v3134_v3 = vmul.f32 %v3110_v26, %v6263_v24 }
 0x679   :  { %3330 = vmatpush2.msra.mxu1 %v3187_v27  ;;  %3343 = vmatpush1.msra.mxu0 %v3123_v9  ;;  %v6546_v53 = vsel %vm591_vm3, %v6361_v54, %v6393_v14  ;;  %v3133_v24 = vmul.f32 %v6425_v49, %v6521_v35  ;;  %v3076_v46 = vmul.f32 %v6421_v40, %v6311_v61 }
 0x67a   :  { %3331 = vmatprep.subr.mxu1 %v3180_v39  ;;  %v2512_v1 = vpop.permute.xlu0 %2511  ;;  %v2942_v32 = vpop.permute.xlu1 %2941  ;;  %v3065_v26 = vmul.f32 %v3040_v17, %v6533_v48  ;;  %v2949_v61 = vsel %vm1022_vm4, %v6119_v18, %v6391_v44  ;;  %v6580_v58 = vsel %vm591_vm3, %v6393_v14, %v6086_v13  ;;  %v7209_v14 = vld [vmem:[#allocation49_spill] sm:$0xff]  ;;  %v2946_v39 = vsel %vm1022_vm4, %v6407_v33, %v6445_v37 }
 0x67b   :  { %3332 = vmatpush2.msra.mxu1 %v3179_v28  ;;  %v6551_v52 = vsel %vm591_vm3, %v2512_v1, %v6363_v29  ;;  %v6556_v45 = vsel %vm591_vm3, %v6222_v5, %v2512_v1  ;;  %v3125_v29 = vmul.f32 %v6425_v49, %v6527_v10  ;;  %v3075_v5 = vmul.f32 %v6443_v2, %v6539_v21 }
 0x67c   :  { %v3073_v54 = vmul.f32 %v3040_v17, %v6556_v45  ;;  %v3074_v28 = vmul.f32 %v3044_v50, %v6551_v52  ;;  %3334 = vmatmul.mubr.f32.vlgmr.msra.gmra.mxu1 %v6379_v59  ;;  %3411 = vmatprep.subr.mxu1 %v3134_v3  ;;  %v3066_v49 = vmul.f32 %v3044_v50, %v6546_v53  ;;  %v7210_v50 = vld [vmem:[#allocation56_spill] sm:$0xff] }
 0x67d   :  { %3986 = vmatprep.mubr.msk.f32.mxu1 %vm1277_vm1, %v7194_v19  ;;  %3412 = vmatpush1.msra.mxu1 %v3133_v24  ;;  %v2947_v19 = vsel %vm1022_vm4, %v6391_v44, %v6503_v47  ;;  %v2960_v9 = vsel %vm1022_vm4, %v6445_v37, %v7209_v14  ;;  %v3068_v44 = vmul.f32 %v6421_v40, %v6320_v4  ;;  %v7211_v24 = vld [vmem:[#allocation42_spill] sm:$0xff] }
 0x67e   :  { %v2936_v12 = vpop.permute.xlu0 %2935  ;;  %3344 = vmatprep.subr.mxu0 %v3074_v28  ;;  %v6583_v17 = vpop.permute.xlu1 %2827  ;;  %3413 = vmatprep.subr.mxu1 %v3126_v43  ;;  %v3067_v62 = vmul.f32 %v6443_v2, %v6580_v58  ;;  %v3008_v20 = vmul.f32 %v2986_v0, %v2947_v19  ;;  %v2959_v57 = vsel %vm1022_vm4, %v2942_v32, %v7210_v50  ;;  %v7216_v19 = vld [vmem:[#allocation65_spill] sm:$0xff] }
 0x67f   :  { %v2948_v18 = vsel %vm1022_vm4, %v2936_v12, %v6407_v33  ;;  %v2950_v13 = vsel %vm1022_vm4, %v6256_v8, %v2936_v12  ;;  %3345 = vmatpush1.msra.mxu0 %v3073_v54  ;;  %3414 = vmatpush1.msra.mxu1 %v3125_v29  ;;  %v2880_v8 = vrot.slane %v6108_v25, %v7201_v7  ;;  %v7212_v54 = vld [vmem:[#allocation59_spill] sm:$0xff]  ;;  %v7215_v12 = vld [vmem:[#allocation64_spill] sm:$0xff] }
 0x680   :  { %v3015_v11 = vmul.f32 %v6474_v63, %v2950_v13  ;;  %v3016_v31 = vmul.f32 %v2986_v0, %v2948_v18  ;;  %3346 = vmatprep.subr.mxu0 %v3066_v49  ;;  %3415 = vmatprep.subr.mxu1 %v3076_v46  ;;  %v3007_v27 = vmul.f32 %v6474_v63, %v2949_v61 }
 0x681   :  { %3347 = vmatpush1.msra.mxu0 %v3065_v26  ;;  %3416 = vmatpush1.msra.mxu1 %v3075_v5  ;;  %v3018_v33 = vmul.f32 %v6499_v38, %v2960_v9  ;;  %v2945_v37 = vsel %vm1022_vm4, %v6503_v47, %v2942_v32  ;;  %v3017_v2 = vmul.f32 %v6495_v55, %v2946_v39  ;;  %v7214_v5 = vld [vmem:[#allocation33_spill] sm:$0xff]  ;;  %v7217_v9 = vld [vmem:[#allocation58_spill] sm:$0xff] }
 0x682   :  { %v2824_v4 = vpop.permute.xlu0 %2823  ;;  %3348 = vmatprep.subr.mxu0 %v3016_v31  ;;  %v2830_v40 = vpop.permute.xlu1 %2829  ;;  %3417 = vmatprep.subr.mxu1 %v3068_v44  ;;  %v2884_v0 = vrot.slane %v6108_v25, %v7197_v30  ;;  %v2888_v43 = vrot.slane %v6108_v25, %v7196_v51  ;;  %v3010_v63 = vmul.f32 %v6499_v38, %v2959_v57  ;;  %v7218_v44 = vld [vmem:[#allocation53_spill] sm:$0xff]  ;;  %v7219_v39 = vld [vmem:[#allocation62_spill] sm:$0xff] }
 0x683   :  { %3349 = vmatpush1.msra.mxu0 %v3015_v11  ;;  %3418 = vmatpush1.msra.mxu1 %v3067_v62  ;;  %v2844_v1 = vsel %vm914_vm5, %v6501_v60, %v2830_v40  ;;  %v2774_v47 = vrot.slane %v6134_v36, %v7201_v7  ;;  %v2846_v32 = vsel %vm914_vm5, %v5986_v16, %v6501_v60  ;;  %v7213_v60 = vld [vmem:[#allocation34_spill] sm:$0xff]  ;;  %v7221_v57 = vld [vmem:[#allocation17_spill] sm:$0xff] }
 0x684   :  { %3350 = vmatprep.subr.mxu0 %v3008_v20  ;;  %3419 = vmatprep.subr.mxu1 %v3018_v33  ;;  %v3009_v3 = vmul.f32 %v6495_v55, %v2945_v37  ;;  %v2843_v25 = vsel %vm914_vm5, %v2824_v4, %v6583_v17  ;;  %v2845_v46 = vsel %vm914_vm5, %v7184_v41, %v2824_v4  ;;  %v7224_v37 = vld [vmem:[#allocation41_spill] sm:$0xff] }
 0x685   :  { %3351 = vmatpush1.msra.mxu0 %v3007_v27  ;;  %3420 = vmatpush1.msra.mxu1 %v3017_v2  ;;  %v2910_v29 = vmul.f32 %v2880_v8, %v2844_v1  ;;  %v2778_v41 = vrot.slane %v6134_v36, %v7197_v30  ;;  %v2909_v61 = vmul.f32 %v6509_v22, %v2846_v32  ;;  %v7223_v27 = vld [vmem:[#allocation24_spill] sm:$0xff] }
 0x686   :  { %v2834_v38 = vpop.permute.xlu0 %2833  ;;  %3352 = vmatprep.subr.mxu0 %v7211_v24  ;;  %3421 = vmatprep.subr.mxu1 %v3010_v63  ;;  %v2724_v55 = vpop.permute.xlu1 %2723  ;;  %v2782_v18 = vrot.slane %v6134_v36, %v7196_v51  ;;  %v2901_v13 = vmul.f32 %v6509_v22, %v2845_v46  ;;  %v2902_v14 = vmul.f32 %v2880_v8, %v2843_v25  ;;  %v7220_v22 = vld [vmem:[#allocation67_spill] sm:$0xff]  ;;  %v7226_v46 = vld [vmem:[#allocation52_spill] sm:$0xff] }
 0x687   :  { %v2840_v28 = vsel %vm914_vm5, %v2834_v38, %v7212_v54  ;;  %v2842_v16 = vsel %vm914_vm5, %v2830_v40, %v2834_v38  ;;  %3353 = vmatpush1.msra.mxu0 %v7213_v60  ;;  %3422 = vmatpush1.msra.mxu1 %v3009_v3  ;;  %v6650_v26 = vsel %vm806_vm6, %v6405_v15, %v2724_v55  ;;  %v7222_v40 = vld [vmem:[#allocation61_spill] sm:$0xff] }
 0x688   :  { %3354 = vmatprep.subr.mxu0 %v7214_v5  ;;  %v2912_v49 = vmul.f32 %v2888_v43, %v2840_v28  ;;  %3423 = vmatprep.subr.mxu1 %v7215_v12  ;;  %v2911_v15 = vmul.f32 %v2884_v0, %v2842_v16  ;;  %v2804_v31 = vmul.f32 %v2774_v47, %v6650_v26  ;;  %v7227_v28 = vld [vmem:[#allocation40_spill] sm:$0xff] }
 0x689   :  { %3355 = vmatpush1.msra.mxu0 %v7216_v19  ;;  %3424 = vmatpush1.msra.mxu1 %v7217_v9  ;;  %v2803_v33 = vmul.f32 %v7223_v27, %v7222_v40  ;;  %v2664_v3 = vrot.slane %v7224_v37, %v7199_v56  ;;  %v2795_v25 = vmul.f32 %v7223_v27, %v6480_v6  ;;  %v7228_v6 = vld [vmem:[#allocation19_spill] sm:$0xff] }
 0x68a   :  { %v2832_v11 = vpop.permute.xlu0 %2831  ;;  %3356 = vmatprep.subr.mxu0 %v2910_v29  ;;  %3425 = vmatprep.subr.mxu1 %v7218_v44  ;;  %v2722_v20 = vpop.permute.xlu1 %2721  ;;  %v2676_v24 = vrot.slane %v7224_v37, %v7196_v51  ;;  %v2558_v60 = vrot.slane %v7228_v6, %v7199_v56  ;;  %v7229_v29 = vld [vmem:[#allocation20_spill] sm:$0xff]  ;;  %v2562_v12 = vrot.slane %v7228_v6, %v7201_v7 }
 0x68b   :  { %v2839_v62 = vsel %vm914_vm5, %v2832_v11, %v7219_v39  ;;  %v2841_v36 = vsel %vm914_vm5, %v6583_v17, %v2832_v11  ;;  %3357 = vmatpush1.msra.mxu0 %v2909_v61  ;;  %3426 = vmatpush1.msra.mxu1 %v7220_v22  ;;  %v6674_v4 = vsel %vm806_vm6, %v7221_v57, %v2722_v20 }
 0x68c   :  { %v2903_v8 = vmul.f32 %v2884_v0, %v2841_v36  ;;  %v2904_v50 = vmul.f32 %v2888_v43, %v2839_v62  ;;  %3358 = vmatprep.subr.mxu0 %v2902_v14  ;;  %3427 = vmatprep.subr.mxu1 %v2912_v49  ;;  %v2668_v17 = vrot.slane %v7224_v37, %v7201_v7  ;;  %v7225_v43 = vld [vmem:[#allocation25_spill] sm:$0xff]  ;;  %v7233_v62 = vld [vmem:[#allocation51_spill] sm:$0xff] }
 0x68d   :  { %3359 = vmatpush1.msra.mxu0 %v2901_v13  ;;  %3428 = vmatpush1.msra.mxu1 %v2911_v15  ;;  %v2796_v0 = vmul.f32 %v2774_v47, %v6674_v4  ;;  %v2697_v5 = vmul.f32 %v2664_v3, %v7229_v29  ;;  %v2672_v61 = vrot.slane %v7224_v37, %v7197_v30  ;;  %v7230_v13 = vld [vmem:[#allocation16_spill] sm:$0xff] }
 0x68e   :  { %v2728_v2 = vpop.permute.xlu0 %2727  ;;  %3360 = vmatprep.subr.mxu0 %v2804_v31  ;;  %3429 = vmatprep.subr.mxu1 %v2904_v50  ;;  %v2726_v32 = vpop.permute.xlu1 %2725  ;;  %v2698_v54 = vmul.f32 %v2668_v17, %v7226_v46  ;;  %v2690_v49 = vmul.f32 %v2668_v17, %v6486_v34  ;;  %v2689_v14 = vmul.f32 %v2664_v3, %v7230_v13  ;;  %v7231_v34 = vld [vmem:[#allocation15_spill] sm:$0xff]  ;;  %v6791_v29 = vld [vmem:[#allocation2] sm:$0xff] }
 0x68f   :  { %v6684_v63 = vsel %vm806_vm6, %v2728_v2, %v7225_v43  ;;  %v2736_v1 = vsel %vm806_vm6, %v2724_v55, %v2728_v2  ;;  %3361 = vmatpush1.msra.mxu0 %v2803_v33  ;;  %3430 = vmatpush1.msra.mxu1 %v2903_v8  ;;  %v6699_v16 = vsel %vm806_vm6, %v2726_v32, %v7227_v28  ;;  %v7238_v28 = vld [vmem:[#allocation29_spill] sm:$0xff] }
 0x690   :  { %v2805_v38 = vmul.f32 %v2778_v41, %v2736_v1  ;;  %v2806_v47 = vmul.f32 %v2782_v18, %v6684_v63  ;;  %v2735_v55 = vsel %vm806_vm6, %v2722_v20, %v2726_v32  ;;  %3362 = vmatprep.subr.mxu0 %v2796_v0  ;;  %v2798_v19 = vmul.f32 %v2782_v18, %v6699_v16  ;;  %v7232_v18 = vld [vmem:[#allocation27_spill] sm:$0xff]  ;;  %v7236_v0 = vld [vmem:[#allocation18_spill] sm:$0xff] }
 0x691   :  { %3363 = vmatpush1.msra.mxu0 %v2795_v25  ;;  %v2570_v15 = vrot.slane %v7228_v6, %v7196_v51  ;;  %v2797_v9 = vmul.f32 %v2778_v41, %v2735_v55  ;;  %v2700_v11 = vmul.f32 %v2676_v24, %v6521_v35  ;;  %v2592_v31 = vmul.f32 %v2562_v12, %v6556_v45  ;;  %v7234_v45 = vld [vmem:[#allocation60_spill] sm:$0xff] }
 0x692   :  { %3364 = vmatprep.subr.mxu0 %v2698_v54  ;;  %3431 = vmatprep.subr.mxu1 %v2806_v47  ;;  %v3160_v44 = vrot.slane %v7231_v34, %v7201_v7  ;;  %v2591_v39 = vmul.f32 %v2558_v60, %v7232_v18  ;;  %v2699_v36 = vmul.f32 %v2672_v61, %v7233_v62  ;;  %v7241_v18 = vld [vmem:[#allocation46_spill] sm:$0xff] }
 0x693   :  { %3365 = vmatpush1.msra.mxu0 %v2697_v5  ;;  %3432 = vmatpush1.msra.mxu1 %v2805_v38  ;;  %v3156_v20 = vrot.slane %v7231_v34, %v7199_v56  ;;  %v2692_v41 = vmul.f32 %v2676_v24, %v6527_v10  ;;  %v2584_v35 = vmul.f32 %v2562_v12, %v6533_v48  ;;  %v6783_v24 = vld [vmem:[#allocation2 + $0x10] sm:$0xff] }
 0x694   :  { %3366 = vmatprep.subr.mxu0 %v2690_v49  ;;  %3433 = vmatprep.subr.mxu1 %v2798_v19  ;;  %v2583_v22 = vmul.f32 %v2558_v60, %v7234_v45  ;;  %v2691_v8 = vmul.f32 %v2672_v61, %v6470_v42  ;;  %v2566_v50 = vrot.slane %v7228_v6, %v7197_v30  ;;  %v7239_v6 = vld [vmem:[#allocation28_spill] sm:$0xff] }
 0x695   :  { %3367 = vmatpush1.msra.mxu0 %v2689_v14  ;;  %3434 = vmatpush1.msra.mxu1 %v2797_v9  ;;  %v2594_v57 = vmul.f32 %v2570_v15, %v6539_v21  ;;  %v3190_v40 = vmul.f32 %v3160_v44, %v2736_v1  ;;  %v3189_v48 = vmul.f32 %v3156_v20, %v6650_v26 }
 0x696   :  { %3368 = vmatprep.subr.mxu0 %v2592_v31  ;;  %3435 = vmatprep.subr.mxu1 %v2700_v11  ;;  %v2593_v10 = vmul.f32 %v2566_v50, %v6551_v52  ;;  %v3164_v27 = vrot.slane %v7231_v34, %v7197_v30  ;;  %v3168_v42 = vrot.slane %v7231_v34, %v7196_v51  ;;  %v7235_v52 = vld [vmem:[#allocation30_spill] sm:$0xff]  ;;  %v7240_v34 = vld [vmem:[#allocation48_spill] sm:$0xff] }
 0x697   :  { %3369 = vmatpush1.msra.mxu0 %v2591_v39  ;;  %3436 = vmatpush1.msra.mxu1 %v2699_v36  ;;  %v2586_v33 = vmul.f32 %v2570_v15, %v6580_v58  ;;  %v3182_v37 = vmul.f32 %v3160_v44, %v2735_v55  ;;  %v2585_v21 = vmul.f32 %v2566_v50, %v6546_v53  ;;  %v7237_v53 = vmov 0.0  }
 0x698   :  { %3370 = vmatprep.subr.mxu0 %v2584_v35  ;;  %3437 = vmatprep.subr.mxu1 %v2692_v41  ;;  %v3181_v17 = vmul.f32 %v3156_v20, %v6674_v4  ;;  %v3192_v26 = vmul.f32 %v3168_v42, %v7235_v52  ;;  %v3191_v2 = vmul.f32 %v3164_v27, %v6684_v63 }
 0x699   :  { %3371 = vmatpush1.msra.mxu0 %v2583_v22  ;;  %3438 = vmatpush1.msra.mxu1 %v2691_v8  ;;  %v3184_v43 = vmul.f32 %v3168_v42, %v7236_v0  ;;  %v3183_v58 = vmul.f32 %v3164_v27, %v6699_v16  ;;  %v3585_v16 = vrot.slane %v6783_v24, %v7238_v28 }
 0x69a   :  { %3400 = vmatprep.subr.mxu0 %v3190_v40  ;;  %3439 = vmatprep.subr.mxu1 %v2594_v57  ;;  %v3589_v60 = vrot.slane %v6783_v24, %v7239_v6  ;;  %v3515_v12 = vrot.slane %v6791_v29, %v7239_v6  ;;  %v3597_v44 = vrot.slane %v6783_v24, %v7240_v34 }
 0x69b   :  { %3401 = vmatpush2.msra.mxu0 %v3189_v48  ;;  %3440 = vmatpush1.msra.mxu1 %v2593_v10  ;;  %v3593_v39 = vrot.slane %v6783_v24, %v7241_v18  ;;  %v3523_v41 = vrot.slane %v6791_v29, %v7240_v34  ;;  %v3519_v8 = vrot.slane %v6791_v29, %v7241_v18 }
 0x69c   :  { %3402 = vmatprep.subr.mxu0 %v3182_v37  ;;  %3441 = vmatprep.subr.mxu1 %v2586_v33  ;;  %v3609_v10 = vrot.slane %v6783_v24, %v7197_v30  ;;  %v3613_v48 = vrot.slane %v6783_v24, %v7196_v51  ;;  %v3511_v33 = vrot.slane %v6791_v29, %v7238_v28 }
 0x69d   :  { %3403 = vmatpush2.msra.mxu0 %v3181_v17  ;;  %3442 = vmatpush1.msra.mxu1 %v2585_v21  ;;  %v3605_v21 = vrot.slane %v6783_v24, %v7201_v7 }
 0x69e   :  { %3405 = vmatmul.mubr.f32.vlgmr.msra.gmra.mxu0 %v6379_v59  ;;  %3471 = vmatprep.subr.mxu1 %v3192_v26  ;;  %v3630_v26 = vld [vmem:[#allocation8] sm:$0xff] }
 0x69f   :  { %3472 = vmatpush2.msra.mxu1 %v3191_v2  ;;  %3698 = vmatprep.mubr.f32.mxu0 %v7237_v53 }
 0x6a0   :  { %3473 = vmatprep.subr.mxu1 %v3184_v43 }
 0x6a1   :  { %3474 = vmatpush2.msra.mxu1 %v3183_v58 }
 0x6a2   :  { %3476 = vmatmul.mubr.f32.vlgmr.msra.gmra.mxu1 %v6379_v59 }
 0x6a3   :  { %3769 = vmatprep.mubr.f32.mxu1 %v7237_v53 }
 0x72b   :  { %v3264_v4 = vpop.f32.mrf.mxu0 }
 0x72c   :  { %3556 = vrot.lane.b32.xlu0 %v3264_v4, %s4130_s27  ;;  %3482 = vrot.lane.b32.xlu1 %v3264_v4, %s4131_s12 }
 0x72d   :  { %v3266_v63 = vpop.f32.mrf.mxu0 }
 0x730   :  { %3558 = vrot.lane.b32.xlu0 %v3266_v63, %s4130_s27 }
 0x734   :  { %3484 = vrot.lane.b32.xlu0 %v3266_v63, %s4131_s12 }
 0x73c   :  { %v6751_v1 = vpop.f32.mrf.mxu1 }
 0x73d   :  { %3560 = vrot.lane.b32.xlu1 %v6751_v1, %s4130_s27 }
 0x73e   :  { %v3337_v32 = vpop.f32.mrf.mxu1 }
 0x73f   :  { %3562 = vrot.lane.b32.xlu0 %v3337_v32, %s4130_s27 }
 0x741   :  { %3486 = vrot.lane.b32.xlu1 %v6751_v1, %s4131_s12 }
 0x743   :  { %3488 = vrot.lane.b32.xlu0 %v3337_v32, %s4131_s12 }
 0x75e   :  { %v6759_v59 = vpop.f32.mrf.mxu0 }
 0x75f   :  { %3564 = vrot.lane.b32.xlu1 %v6759_v59, %s4130_s27 }
 0x760   :  { %v6763_v3 = vpop.f32.mrf.mxu0 }
 0x761   :  { %3566 = vrot.lane.b32.xlu0 %v6763_v3, %s4130_s27 }
 0x762   :  { %v6767_v25 = vpop.f32.mrf.mxu1 }
 0x763   :  { %3568 = vrot.lane.b32.xlu1 %v6767_v25, %s4130_s27 }
 0x764   :  { %v6771_v38 = vpop.f32.mrf.mxu1 }
 0x765   :  { %3570 = vrot.lane.b32.xlu0 %v6771_v38, %s4130_s27  ;;  %s3931_s27 = sshll.u32 %s4132_s15, 4  ;;  %s3932_s27 = int_to_ptr.vmem [resolvable:$true] %s3931_s27 }
 0x766   :  { %p4095_p7 = scmp.lt.s32.totalorder %s3932_s27, %s3932_s27 }
 0x767   :  { %3496 = vrot.lane.b32.xlu1 %v6771_v38, %s4131_s12 }
 0x769   :  { %3492 = vrot.lane.b32.xlu0 %v6763_v3, %s4131_s12 }
 0x76b   :  { %3490 = vrot.lane.b32.xlu1 %v6759_v59, %s4131_s12 }
 0x76f   :  { %3494 = vrot.lane.b32.xlu1 %v6767_v25, %s4131_s12  ;;  %s4090_s12 = scalar_lea.vmem %s3932_s27, 3072 }
 0x770   :  { %p4091_p6 = scmp.ne.s32.totalorder %s3932_s27, %s4090_s12  ;;  %p4096_p8 = scmp.lt.s32.totalorder %s4090_s12, %s4090_s12 }
 0x772   :  { %p4097_p9 = por %p4096_p8, %p4095_p7 }
 0x774   :  { %p4098_p10 = pnand %p4097_p9, %p4091_p6 }
 0x79e   :  { %v3557_v47 = vpop.permute.xlu0 %3556  ;;  %v3483_v46 = vpop.permute.xlu1 %3482 }
 0x7a2   :  { %v3559_v54 = vpop.permute.xlu0 %3558 }
 0x7a3   :  { %v3578_v55 = vsel %vm1656_vm7, %v3557_v47, %v3559_v54 }
 0x7a4   :  { %v3622_v61 = vmul.f32 %v3585_v16, %v3578_v55  ;;  %v3527_v16 = vrot.slane %v6791_v29, %v7199_v56 }
 0x7a6   :  { %v3485_v19 = vpop.permute.xlu0 %3484 }
 0x7a7   :  { %v3504_v14 = vsel %vm1581_vm8, %v3483_v46, %v3485_v19 }
 0x7a8   :  { %v3549_v15 = vmul.f32 %v3515_v12, %v3504_v14 }
 0x7af   :  { %v3561_v5 = vpop.permute.xlu1 %3560 }
 0x7b0   :  { %v3577_v49 = vsel %vm1656_vm7, %v3559_v54, %v3561_v5 }
 0x7b1   :  { %v3623_v13 = vmul.f32 %v3589_v60, %v3577_v49  ;;  %v3563_v9 = vpop.permute.xlu0 %3562  ;;  %v3539_v60 = vrot.slane %v6791_v29, %v7196_v51 }
 0x7b2   :  { %v3576_v62 = vsel %vm1656_vm7, %v3561_v5, %v3563_v9 }
 0x7b3   :  { %3660 = vmatprep.subr.mxu0 %v3623_v13  ;;  %v3487_v11 = vpop.permute.xlu1 %3486  ;;  %v3624_v22 = vmul.f32 %v3593_v39, %v3576_v62 }
 0x7b4   :  { %3661 = vmatpush1.msra.mxu0 %v3622_v61  ;;  %v3503_v57 = vsel %vm1581_vm8, %v3485_v19, %v3487_v11 }
 0x7b5   :  { %3662 = vmatprep.subr.mxu0 %v3266_v63  ;;  %v3489_v31 = vpop.permute.xlu0 %3488  ;;  %v3550_v37 = vmul.f32 %v3519_v8, %v3503_v57 }
 0x7b6   :  { %3663 = vmatpush1.msra.mxu0 %v3264_v4  ;;  %v3502_v50 = vsel %vm1581_vm8, %v3487_v11, %v3489_v31  ;;  %v3601_v4 = vrot.slane %v6783_v24, %v7199_v56 }
 0x7b7   :  { %3664 = vmatprep.subr.mxu0 %v3549_v15  ;;  %v3551_v27 = vmul.f32 %v3523_v41, %v3502_v50 }
 0x7d1   :  { %v3565_v36 = vpop.permute.xlu1 %3564 }
 0x7d2   :  { %v3575_v20 = vsel %vm1656_vm7, %v3563_v9, %v3565_v36 }
 0x7d3   :  { %v3625_v35 = vmul.f32 %v3597_v44, %v3575_v20  ;;  %v3567_v45 = vpop.permute.xlu0 %3566 }
 0x7d5   :  { %3731 = vmatprep.subr.mxu1 %v3625_v35  ;;  %v3569_v40 = vpop.permute.xlu1 %3568 }
 0x7d6   :  { %3732 = vmatpush1.msra.mxu1 %v3624_v22  ;;  %v3573_v2 = vsel %vm1656_vm7, %v3567_v45, %v3569_v40 }
 0x7d7   :  { %v3571_v42 = vpop.permute.xlu0 %3570  ;;  %3733 = vmatprep.subr.mxu1 %v3337_v32  ;;  %v3574_v32 = vsel %vm1656_vm7, %v3565_v36, %v3567_v45  ;;  %v3627_v54 = vmul.f32 %v3605_v21, %v3573_v2 }
 0x7d8   :  { %v3572_v17 = vsel %vm1656_vm7, %v3569_v40, %v3571_v42  ;;  %v3579_v52 = vsel %vm1656_vm7, %v3571_v42, %v3557_v47  ;;  %3734 = vmatpush1.msra.mxu1 %v6751_v1  ;;  %v3531_v1 = vrot.slane %v6791_v29, %v7201_v7 }
 0x7d9   :  { %v3628_v0 = vmul.f32 %v3609_v10, %v3572_v17  ;;  %v3629_v43 = vmul.f32 %v3613_v48, %v3579_v52  ;;  %3735 = vmatprep.subr.mxu1 %v3551_v27  ;;  %v3497_v58 = vpop.permute.xlu1 %3496 }
 0x7da   :  { %v3505_v63 = vsel %vm1581_vm8, %v3497_v58, %v3483_v46  ;;  %3736 = vmatpush1.msra.mxu1 %v3550_v37  ;;  %v3626_v46 = vmul.f32 %v3601_v4, %v3574_v32 }
 0x7db   :  { %v3548_v47 = vmul.f32 %v3511_v33, %v3505_v63  ;;  %3873 = vmatprep.subr.mxu1 %v3629_v43  ;;  %3988 = vmatmul.mubr.msk.f32.vlgmr.msra.gmra.mxu1 %vm1717_vm9, %v3630_v26  ;;  %v3493_v28 = vpop.permute.xlu0 %3492 }
 0x7dc   :  { %3874 = vmatpush1.msra.mxu1 %v3628_v0  ;;  %3911 = vmatprep.mubr.f32.mxu1 %v7237_v53 }
 0x7dd   :  { %3665 = vmatpush1.msra.mxu0 %v3548_v47  ;;  %3875 = vmatprep.subr.mxu1 %v6771_v38  ;;  %v3491_v24 = vpop.permute.xlu1 %3490  ;;  %v3535_v38 = vrot.slane %v6791_v29, %v7197_v30 }
 0x7de   :  { %v3500_v55 = vsel %vm1581_vm8, %v3491_v24, %v3493_v28  ;;  %3802 = vmatprep.subr.mxu0 %v3627_v54  ;;  %3876 = vmatpush1.msra.mxu1 %v6767_v25  ;;  %v3501_v7 = vsel %vm1581_vm8, %v3489_v31, %v3491_v24 }
 0x7df   :  { %v3553_v6 = vmul.f32 %v3531_v1, %v3500_v55  ;;  %3987 = vmatmul.mubr.msk.f32.vlgmr.msra.gmra.mxu0 %vm1717_vm9, %v3630_v26  ;;  %v3552_v5 = vmul.f32 %v3527_v16, %v3501_v7 }
 0x7e0   :  { %3803 = vmatpush1.msra.mxu0 %v3626_v46  ;;  %3840 = vmatprep.mubr.f32.mxu0 %v7237_v53 }
 0x7e1   :  { %3804 = vmatprep.subr.mxu0 %v6763_v3  ;;  %v3495_v56 = vpop.permute.xlu1 %3494 }
 0x7e2   :  { %3805 = vmatpush1.msra.mxu0 %v6759_v59  ;;  %v3498_v25 = vsel %vm1581_vm8, %v3495_v56, %v3497_v58  ;;  %v3499_v61 = vsel %vm1581_vm8, %v3493_v28, %v3495_v56 }
 0x7e3   :  { %v3554_v49 = vmul.f32 %v3535_v38, %v3499_v61  ;;  %v3555_v30 = vmul.f32 %v3539_v60, %v3498_v25  ;;  %3806 = vmatprep.subr.mxu0 %v3553_v6 }
 0x7e4   :  { %3807 = vmatpush1.msra.mxu0 %v3552_v5 }
 0x7e5   :  { %3877 = vmatprep.subr.mxu1 %v3555_v30  ;;  %3989 = vmatmul.mubr.msk.f32.vlgmr.msra.gmra.mxu0 %vm1717_vm9, %v3630_v26 }
 0x7e6   :  { %3878 = vmatpush1.msra.mxu1 %v3554_v49 }
 0x7e7   :  { %3990 = vmatmul.mubr.msk.f32.vlgmr.msra.gmra.mxu1 %vm1717_vm9, %v3630_v26 }
 0x89b   :  { %v3771_v51 = vpop.f32.mrf.mxu1 }
 0x89c   :  { %3920 = vst [vmem:[#allocation10 + $0x90] sm:$0xff] %v3771_v51 }
 0x89d   :  { %v3773_v53 = vpop.f32.mrf.mxu1 }
 0x89e   :  { %3921 = vst [vmem:[#allocation10 + $0x98] sm:$0xff] %v3773_v53 }
 0x89f   :  { %v3700_v59 = vpop.f32.mrf.mxu0 }
 0x8a0   :  { %3918 = vst [vmem:[#allocation10 + $0x80] sm:$0xff] %v3700_v59 }
 0x8a1   :  { %v3702_v3 = vpop.f32.mrf.mxu0 }
 0x8a2   :  { %3919 = vst [vmem:[#allocation10 + $0x88] sm:$0xff] %v3702_v3 }
 0x8a5   :  { %v3842_v23 = vpop.f32.mrf.mxu0 }
 0x8a6   :  { %3922 = vst [vmem:[#allocation10 + $0xa0] sm:$0xff] %v3842_v23 }
 0x8a7   :  { %v3913_v29 = vpop.f32.mrf.mxu1  ;;  %v3844_v12 = vpop.f32.mrf.mxu0 }
 0x8a8   :  { %3924 = vst [vmem:[#allocation10 + $0xb0] sm:$0xff] %v3913_v29  ;;  %3923 = vst [vmem:[#allocation10 + $0xa8] sm:$0xff] %v3844_v12 }
 0x8a9   :  { %v3915_v19 = vpop.f32.mrf.mxu1 }
 0x8aa   :  { %3925 = vst [vmem:[#allocation10 + $0xb8] sm:$0xff] %v3915_v19 }
 0x8ab   :  { %4101 = shalt.err (!%p4098_p10)
}
 0x8ac   :  { %s4133_s7 = smov 1024  }
 0x8ad   :  { %3937 = dma.vmem_to_hbm [thread:$0]  %s3932_s27, 3072, %s6883_s17, [#allocation4], %s4133_s7, %s4133_s7, %s4126_s5  }
 0x8ae   :  { %4116 = dma.done.wait [#allocation4], 3072  }
 0x8af   :  { %4117 = vsyncadd [#allocation4], 4294964224 }
 0x8b0   :  { %3941 = vsyncpa [#allocation3], 1 }
 0x8b1   :  { %3942 = vsyncpa [#allocation6], 1 }
 0x8b2   :  { %3943 = vsyncpa [#allocation9], 1 }
 0x8b3   :  { %3944 = vsyncpa [#allocation4], 1 }

</bundles_post_ra>
